<compile_context>
chip_gen: v7x
topology: tpu7x:2x2x1
jax: 0.10.0
libtpu: 0.0.40
codegen_flags: <defaults>
</compile_context>

<pallas_src>
import functools

import jax
import jax.numpy as jnp
from jax import lax
from jax.experimental import pallas as pl
from jax.experimental.pallas import tpu as pltpu

ALPHA_C = 1.0  # rt_params.alpha_c


# ---------------------------------------------------------------------------
# Fused kernel: encoder (1x1 conv + ReLU + adaptive avg pool), attention LSTM
# decoder, masked cross-entropy + doubly-stochastic attention regularizer.
# ---------------------------------------------------------------------------
def _fused_kernel(B, P, E, A, Hd, Tdec, V,
                  x_ref, poolbd_ref, emb_ref, vmask_ref, tgt_ref,
                  encw_ref, encb_ref,
                  wihc_ref, bihc_ref,
                  wae_ref, bae_ref,
                  whcat_ref, bhcat_ref, wfa_ref,
                  wlc_ref, wlx_ref, bl_ref,
                  wfc_ref, bfc_ref,
                  scores_ref, loss_ref,
                  hslab_ref):
    f32 = jnp.float32
    Vp = wfc_ref.shape[1]

    # ---------------- encoder ----------------
    # 1x1 conv (channel mixing) + ReLU: one matmul over all pixels of all images.
    y = jnp.maximum(
        jnp.dot(x_ref[...], encw_ref[...], preferred_element_type=f32) + encb_ref[...],
        0.0)                                                       # (B*N, E)
    # adaptive avg pool as a single block-diagonal pooling matmul.
    enc_flat = jnp.dot(poolbd_ref[...], y, preferred_element_type=f32)  # (B*P, E)
    enc3 = enc_flat.reshape(B, P, E)

    # ---------------- decoder init ----------------
    mean_enc = jnp.mean(enc3, axis=1)                              # (B, E)
    hc0 = jnp.dot(mean_enc, wihc_ref[...], preferred_element_type=f32) + bihc_ref[...]
    h = hc0[:, 0:Hd]
    c = hc0[:, Hd:2 * Hd]

    # loop-invariant attention projection of the encoder features.
    att1 = (jnp.dot(enc_flat, wae_ref[...], preferred_element_type=f32)
            + bae_ref[...]).reshape(B, P, A)                       # (B, P, A)
    w_fa = wfa_ref[...]                                            # (1, A)

    # hoisted input-gate contribution for all timesteps (includes LSTM bias b_l).
    xg = jnp.dot(emb_ref[...], wlx_ref[...], preferred_element_type=f32) + bl_ref[...]

    whcat = whcat_ref[...]                                         # (Hd, A+E+4Hd)
    bhcat = bhcat_ref[...]
    wlc = wlc_ref[...]
    vmask = vmask_ref[...]                                         # (Tdec*B, 1), {0,1}

    asum = jnp.zeros((B, P), f32)

    for t in range(Tdec):                                          # static unroll (small Tdec)
        # One fused h-matmul per step: [att2 | gate_pre | lstm_h_gates].
        hproj = jnp.dot(h, whcat, preferred_element_type=f32) + bhcat
        att2 = hproj[:, 0:A]
        gate = jax.nn.sigmoid(hproj[:, A:A + E])
        hgate = hproj[:, A + E:A + E + 4 * Hd]

        # Soft attention over pixels (b_full dropped: constant shift, cancels in softmax).
        att = jnp.maximum(att1 + att2[:, None, :], 0.0)            # (B, P, A)
        e = jnp.sum(att * w_fa, axis=-1)                           # (B, P)
        e = e - jnp.max(e, axis=-1, keepdims=True)
        pe = jnp.exp(e)
        alpha = pe / jnp.sum(pe, axis=-1, keepdims=True)           # (B, P)
        ctx = gate * jnp.sum(alpha[:, :, None] * enc3, axis=1)     # (B, E)

        # LSTM cell (PyTorch gate order i, f, g, o).
        gates = (xg[t * B:(t + 1) * B, :]
                 + jnp.dot(ctx, wlc, preferred_element_type=f32)
                 + hgate)                                          # (B, 4*Hd)
        i_g = jax.nn.sigmoid(gates[:, 0:Hd])
        f_g = jax.nn.sigmoid(gates[:, Hd:2 * Hd])
        g_g = jnp.tanh(gates[:, 2 * Hd:3 * Hd])
        o_g = jax.nn.sigmoid(gates[:, 3 * Hd:4 * Hd])
        c_new = f_g * c + i_g * g_g
        h_new = o_g * jnp.tanh(c_new)

        valid = vmask[t * B:(t + 1) * B, :]                        # (B, 1)
        vb = valid > 0.5
        h = jnp.where(vb, h_new, h)                                # freeze finished captions
        c = jnp.where(vb, c_new, c)
        asum = asum + valid * alpha                                # masked alpha accumulation
        hslab_ref[t * B:(t + 1) * B, :] = h_new                    # deferred vocab projection

    # ---------------- deferred vocab projection (one matmul, lane-dense store) ----------
    sc = jnp.dot(hslab_ref[...], wfc_ref[...], preferred_element_type=f32) + bfc_ref[...]
    sc = sc * vmask                                                # zero padded timesteps
    scores_ref[...] = sc                                           # (Tdec*B, Vp=128)

    # ---------------- loss: masked CE (== CE over pack_padded_sequence) + attn reg -------
    cols = lax.broadcasted_iota(jnp.int32, (Tdec * B, Vp), 1)
    sc_ce = jnp.where(cols < V, sc, jnp.float32(-1e30))            # ignore padded vocab lanes
    m = jnp.max(sc_ce, axis=-1, keepdims=True)
    lse = m + jnp.log(jnp.sum(jnp.exp(sc_ce - m), axis=-1, keepdims=True))
    tgt_logit = jnp.sum(jnp.where(cols == tgt_ref[...], sc, 0.0), axis=-1, keepdims=True)
    ce = (lse - tgt_logit) * vmask
    loss_ce = jnp.sum(ce) / jnp.maximum(jnp.sum(vmask), 1.0)

    reg = jnp.mean((1.0 - asum) ** 2)
    loss_ref[...] = jnp.reshape(loss_ce + ALPHA_C * reg, (1, 1))


# ---------------------------------------------------------------------------
# Parameter setup / wrapper glue
# ---------------------------------------------------------------------------
def make_pool_T(H, W, out_hw):
    bh, bw = H // out_hw, W // out_hw
    hh = jnp.arange(H * W) // W
    ww = jnp.arange(H * W) % W
    block = (hh // bh) * out_hw + (ww // bw)                       # (H*W,)
    poolT = (jnp.arange(out_hw * out_hw)[:, None] == block[None, :]).astype(jnp.float32)
    return poolT / float(bh * bw)                                  # (P, H*W)


def init_params(key, C_in=3, E=32, Em=16, A=32, Hd=32, V=24, H=16, W=16, enc_size=4):
    ks = jax.random.split(key, 24)

    def nrm(k, shape, scale=0.1):
        return scale * jax.random.normal(k, shape, jnp.float32)

    p = dict(
        enc_w=nrm(ks[0], (C_in, E)), enc_b=nrm(ks[1], (1, E)),
        emb_table=nrm(ks[2], (V, Em)),
        w_init_h=nrm(ks[3], (E, Hd)), b_init_h=nrm(ks[4], (1, Hd)),
        w_init_c=nrm(ks[5], (E, Hd)), b_init_c=nrm(ks[6], (1, Hd)),
        w_att_e=nrm(ks[7], (E, A)), b_att_e=nrm(ks[8], (1, A)),
        w_att_d=nrm(ks[9], (Hd, A)), b_att_d=nrm(ks[10], (1, A)),
        w_full=nrm(ks[11], (1, A)), b_full=nrm(ks[12], (1, 1)),   # b_full unused in-kernel (softmax shift invariance)
        w_fbeta=nrm(ks[13], (Hd, E)), b_fbeta=nrm(ks[14], (1, E)),
        w_lx=nrm(ks[15], (Em, 4 * Hd)), w_lc=nrm(ks[16], (E, 4 * Hd)),
        w_lh=nrm(ks[17], (Hd, 4 * Hd)), b_l=nrm(ks[18], (1, 4 * Hd)),
        w_fc=nrm(ks[19], (Hd, V)), b_fc=nrm(ks[20], (1, V)),
        poolT=make_pool_T(H, W, enc_size),
    )
    return p


def receiver_train_forward(params, images, text, mask, batch_id=0, training=True):
    B, C, H, W = images.shape
    T = text.shape[1]
    P, N = params["poolT"].shape
    E = params["enc_w"].shape[1]
    A = params["w_att_e"].shape[1]
    Hd = params["w_init_h"].shape[1]
    Em = params["emb_table"].shape[1]
    V = params["w_fc"].shape[1]
    Vp = ((V + 127) // 128) * 128                                  # lane-dense vocab dim
    Tdec = T - 1

    # --- decoder contract: sort by caption length, descending ---
    cap_len = jnp.sum(mask, axis=1).astype(jnp.int32)
    sort_ind = jnp.argsort(-cap_len)
    caps_sorted = text[sort_ind]
    decode_lengths = cap_len[sort_ind] - 1                         # (B,)

    # --- layout plumbing (kept in XLA outside the kernel) ---
    x_sorted = images[sort_ind]
    x_flat = jnp.transpose(x_sorted, (0, 2, 3, 1)).reshape(B * H * W, C)
    poolT_bd = jnp.kron(jnp.eye(B, dtype=jnp.float32), params["poolT"])  # (B*P, B*N)

    emb = params["emb_table"][caps_sorted[:, :Tdec]]               # (B, Tdec, Em)
    emb_tb = jnp.transpose(emb, (1, 0, 2)).reshape(Tdec * B, Em)   # row = t*B + b

    vmask_tb = (jnp.arange(Tdec)[:, None] < decode_lengths[None, :]).astype(jnp.float32)
    vmask_tb = vmask_tb.reshape(Tdec * B, 1)                       # row = t*B + b
    targets = caps_sorted[:, 1:].astype(jnp.int32)                 # (B, Tdec)
    tgt_tb = jnp.transpose(targets, (1, 0)).reshape(Tdec * B, 1)

    # fused / padded weight preprocessing
    w_init_hc = jnp.concatenate([params["w_init_h"], params["w_init_c"]], axis=1)
    b_init_hc = jnp.concatenate([params["b_init_h"], params["b_init_c"]], axis=1)
    w_hcat = jnp.concatenate([params["w_att_d"], params["w_fbeta"], params["w_lh"]], axis=1)
    b_hcat = jnp.concatenate([params["b_att_d"], params["b_fbeta"],
                              jnp.zeros((1, 4 * Hd), jnp.float32)], axis=1)
    w_fc_pad = jnp.pad(params["w_fc"], ((0, 0), (0, Vp - V)))
    b_fc_pad = jnp.pad(params["b_fc"], ((0, 0), (0, Vp - V)))

    kernel = functools.partial(_fused_kernel, B, P, E, A, Hd, Tdec, V)
    n_in = 19
    scores_tb, loss2d = pl.pallas_call(
        kernel,
        out_shape=(jax.ShapeDtypeStruct((Tdec * B, Vp), jnp.float32),
                   jax.ShapeDtypeStruct((1, 1), jnp.float32)),
        in_specs=[pl.BlockSpec(memory_space=pltpu.MemorySpace.VMEM)] * n_in,
        out_specs=(pl.BlockSpec(memory_space=pltpu.MemorySpace.VMEM),
                   pl.BlockSpec(memory_space=pltpu.MemorySpace.VMEM)),
        scratch_shapes=[pltpu.VMEM((Tdec * B, Hd), jnp.float32)],
    )(x_flat, poolT_bd, emb_tb, vmask_tb, tgt_tb,
      params["enc_w"], params["enc_b"],
      w_init_hc, b_init_hc,
      params["w_att_e"], params["b_att_e"],
      w_hcat, b_hcat, params["w_full"],
      params["w_lc"], params["w_lx"], params["b_l"],
      w_fc_pad, b_fc_pad)

    # back to (B, Tdec, V) logical layout; drop the vocab padding lanes.
    scores = jnp.transpose(scores_tb.reshape(Tdec, B, Vp), (1, 0, 2))[:, :, :V]
    loss = loss2d[0, 0]

    # preds = argmax over vocab of scores for the first (longest) caption
    preds = jnp.argmax(scores[0], axis=1)
    img = images[0]

    # TODO(synk): pack_padded_sequence yields variable-length packed tensors (dynamic
    # shapes); aux stores the padded masked scores/targets instead of the packed form.
    interaction = dict(
        sender_input=img, labels=text, message_length=mask,
        receiver_input=None, aux_input=None, message=None,
        receiver_output=preds,
        aux=dict(scores=scores, targets=targets, decode_lengths=decode_lengths),
        batch_id=batch_id,
    )
    return loss, interaction


if __name__ == "__main__":
    key = jax.random.PRNGKey(0)
    kp, k1, k2 = jax.random.split(key, 3)

    B, C, H, W = 2, 3, 16, 16
    T, V = 8, 24

    params = init_params(kp, C_in=C, V=V, H=H, W=W)

    images = jax.random.normal(k1, (B, C, H, W), jnp.float32)
    text = jax.random.randint(k2, (B, T), 0, V).astype(jnp.int32)
    lengths = jnp.array([8, 6], jnp.int32)
    mask = (jnp.arange(T)[None, :] < lengths[:, None]).astype(jnp.float32)

    loss, interaction = receiver_train_forward(params, images, text, mask, batch_id=0)
    loss = jax.block_until_ready(loss)
    jax.block_until_ready(interaction["receiver_output"])

    assert bool(jnp.isfinite(loss)), "loss is not finite"
    print("KERNEL_OK")
</pallas_src>

<mosaic_0001>
module attributes {stable_mosaic.version = 11 : i64} {
  func.func @_fused_kernel(%arg0: memref<512x3xf32, #tpu.memory_space<vmem>>, %arg1: memref<32x512xf32, #tpu.memory_space<vmem>>, %arg2: memref<14x16xf32, #tpu.memory_space<vmem>>, %arg3: memref<14x1xf32, #tpu.memory_space<vmem>>, %arg4: memref<14x1xi32, #tpu.memory_space<vmem>>, %arg5: memref<3x32xf32, #tpu.memory_space<vmem>>, %arg6: memref<1x32xf32, #tpu.memory_space<vmem>>, %arg7: memref<32x64xf32, #tpu.memory_space<vmem>>, %arg8: memref<1x64xf32, #tpu.memory_space<vmem>>, %arg9: memref<32x32xf32, #tpu.memory_space<vmem>>, %arg10: memref<1x32xf32, #tpu.memory_space<vmem>>, %arg11: memref<32x192xf32, #tpu.memory_space<vmem>>, %arg12: memref<1x192xf32, #tpu.memory_space<vmem>>, %arg13: memref<1x32xf32, #tpu.memory_space<vmem>>, %arg14: memref<32x128xf32, #tpu.memory_space<vmem>>, %arg15: memref<16x128xf32, #tpu.memory_space<vmem>>, %arg16: memref<1x128xf32, #tpu.memory_space<vmem>>, %arg17: memref<32x128xf32, #tpu.memory_space<vmem>>, %arg18: memref<1x128xf32, #tpu.memory_space<vmem>>, %arg19: memref<14x128xf32, #tpu.memory_space<vmem>>, %arg20: memref<1x1xf32, #tpu.memory_space<vmem>>, %arg21: memref<14x32xf32, #tpu.memory_space<vmem>>) attributes {dimension_semantics = [], scalar_prefetch = 0 : i64, scratch_operands = 1 : i64, tpu.core_type = #tpu.core_type<tc>} {
    %c0 = arith.constant 0 : index
    %c0_0 = arith.constant 0 : index
    %0 = vector.load %arg0[%c0, %c0_0] : memref<512x3xf32, #tpu.memory_space<vmem>>, vector<512x3xf32>
    %c0_1 = arith.constant 0 : index
    %c0_2 = arith.constant 0 : index
    %1 = vector.load %arg5[%c0_1, %c0_2] : memref<3x32xf32, #tpu.memory_space<vmem>>, vector<3x32xf32>
    %cst = arith.constant dense<0.000000e+00> : vector<512x32xf32>
    %2 = tpu.matmul %0, %1, %cst {dimension_numbers = #tpu.dot_dimension_numbers<[1], [0], [0], [1], [0, 0, 1, 1], [], []>} : vector<512x3xf32>, vector<3x32xf32>, vector<512x32xf32> -> vector<512x32xf32>
    %c0_3 = arith.constant 0 : index
    %c0_4 = arith.constant 0 : index
    %3 = vector.load %arg6[%c0_3, %c0_4] : memref<1x32xf32, #tpu.memory_space<vmem>>, vector<1x32xf32>
    %4 = vector.broadcast %3 : vector<1x32xf32> to vector<512x32xf32>
    %5 = arith.addf %2, %4 : vector<512x32xf32>
    %cst_5 = arith.constant 0.000000e+00 : f32
    %6 = vector.broadcast %cst_5 : f32 to vector<512x32xf32>
    %7 = arith.maximumf %5, %6 : vector<512x32xf32>
    %c0_6 = arith.constant 0 : index
    %c0_7 = arith.constant 0 : index
    %8 = vector.load %arg1[%c0_6, %c0_7] : memref<32x512xf32, #tpu.memory_space<vmem>>, vector<32x512xf32>
    %cst_8 = arith.constant dense<0.000000e+00> : vector<32x32xf32>
    %9 = tpu.matmul %8, %7, %cst_8 {dimension_numbers = #tpu.dot_dimension_numbers<[1], [0], [0], [1], [0, 0, 1, 1], [], []>} : vector<32x512xf32>, vector<512x32xf32>, vector<32x32xf32> -> vector<32x32xf32>
    %10 = vector.shape_cast %9 : vector<32x32xf32> to vector<2x16x32xf32>
    %cst_9 = arith.constant dense<0.000000e+00> : vector<2x32xf32>
    %11 = vector.multi_reduction <add>, %10, %cst_9 [1] : vector<2x16x32xf32> to vector<2x32xf32>
    %cst_10 = arith.constant 1.600000e+01 : f32
    %12 = vector.broadcast %cst_10 : f32 to vector<2x32xf32>
    %13 = arith.divf %11, %12 : vector<2x32xf32>
    %c0_11 = arith.constant 0 : index
    %c0_12 = arith.constant 0 : index
    %14 = vector.load %arg7[%c0_11, %c0_12] : memref<32x64xf32, #tpu.memory_space<vmem>>, vector<32x64xf32>
    %cst_13 = arith.constant dense<0.000000e+00> : vector<2x64xf32>
    %15 = tpu.matmul %13, %14, %cst_13 {dimension_numbers = #tpu.dot_dimension_numbers<[1], [0], [0], [1], [0, 0, 1, 1], [], []>} : vector<2x32xf32>, vector<32x64xf32>, vector<2x64xf32> -> vector<2x64xf32>
    %c0_14 = arith.constant 0 : index
    %c0_15 = arith.constant 0 : index
    %16 = vector.load %arg8[%c0_14, %c0_15] : memref<1x64xf32, #tpu.memory_space<vmem>>, vector<1x64xf32>
    %17 = vector.broadcast %16 : vector<1x64xf32> to vector<2x64xf32>
    %18 = arith.addf %15, %17 : vector<2x64xf32>
    %19 = vector.extract_strided_slice %18 {offsets = [0, 0], sizes = [2, 32], strides = [1, 1]} : vector<2x64xf32> to vector<2x32xf32>
    %20 = vector.extract_strided_slice %18 {offsets = [0, 32], sizes = [2, 32], strides = [1, 1]} : vector<2x64xf32> to vector<2x32xf32>
    %c0_16 = arith.constant 0 : index
    %c0_17 = arith.constant 0 : index
    %21 = vector.load %arg9[%c0_16, %c0_17] : memref<32x32xf32, #tpu.memory_space<vmem>>, vector<32x32xf32>
    %cst_18 = arith.constant dense<0.000000e+00> : vector<32x32xf32>
    %22 = tpu.matmul %9, %21, %cst_18 {dimension_numbers = #tpu.dot_dimension_numbers<[1], [0], [0], [1], [0, 0, 1, 1], [], []>} : vector<32x32xf32>, vector<32x32xf32>, vector<32x32xf32> -> vector<32x32xf32>
    %c0_19 = arith.constant 0 : index
    %c0_20 = arith.constant 0 : index
    %23 = vector.load %arg10[%c0_19, %c0_20] : memref<1x32xf32, #tpu.memory_space<vmem>>, vector<1x32xf32>
    %24 = vector.broadcast %23 : vector<1x32xf32> to vector<32x32xf32>
    %25 = arith.addf %22, %24 : vector<32x32xf32>
    %26 = vector.shape_cast %25 : vector<32x32xf32> to vector<2x16x32xf32>
    %c0_21 = arith.constant 0 : index
    %c0_22 = arith.constant 0 : index
    %27 = vector.load %arg13[%c0_21, %c0_22] : memref<1x32xf32, #tpu.memory_space<vmem>>, vector<1x32xf32>
    %c0_23 = arith.constant 0 : index
    %c0_24 = arith.constant 0 : index
    %28 = vector.load %arg2[%c0_23, %c0_24] : memref<14x16xf32, #tpu.memory_space<vmem>>, vector<14x16xf32>
    %c0_25 = arith.constant 0 : index
    %c0_26 = arith.constant 0 : index
    %29 = vector.load %arg15[%c0_25, %c0_26] : memref<16x128xf32, #tpu.memory_space<vmem>>, vector<16x128xf32>
    %cst_27 = arith.constant dense<0.000000e+00> : vector<14x128xf32>
    %30 = tpu.matmul %28, %29, %cst_27 {dimension_numbers = #tpu.dot_dimension_numbers<[1], [0], [0], [1], [0, 0, 1, 1], [], []>} : vector<14x16xf32>, vector<16x128xf32>, vector<14x128xf32> -> vector<14x128xf32>
    %c0_28 = arith.constant 0 : index
    %c0_29 = arith.constant 0 : index
    %31 = vector.load %arg16[%c0_28, %c0_29] : memref<1x128xf32, #tpu.memory_space<vmem>>, vector<1x128xf32>
    %32 = vector.broadcast %31 : vector<1x128xf32> to vector<14x128xf32>
    %33 = arith.addf %30, %32 : vector<14x128xf32>
    %c0_30 = arith.constant 0 : index
    %c0_31 = arith.constant 0 : index
    %34 = vector.load %arg11[%c0_30, %c0_31] : memref<32x192xf32, #tpu.memory_space<vmem>>, vector<32x192xf32>
    %c0_32 = arith.constant 0 : index
    %c0_33 = arith.constant 0 : index
    %35 = vector.load %arg12[%c0_32, %c0_33] : memref<1x192xf32, #tpu.memory_space<vmem>>, vector<1x192xf32>
    %c0_34 = arith.constant 0 : index
    %c0_35 = arith.constant 0 : index
    %36 = vector.load %arg14[%c0_34, %c0_35] : memref<32x128xf32, #tpu.memory_space<vmem>>, vector<32x128xf32>
    %c0_36 = arith.constant 0 : index
    %c0_37 = arith.constant 0 : index
    %37 = vector.load %arg3[%c0_36, %c0_37] : memref<14x1xf32, #tpu.memory_space<vmem>>, vector<14x1xf32>
    %cst_38 = arith.constant 0.000000e+00 : f32
    %38 = vector.broadcast %cst_38 : f32 to vector<2x16xf32>
    %cst_39 = arith.constant dense<0.000000e+00> : vector<2x192xf32>
    %39 = tpu.matmul %19, %34, %cst_39 {dimension_numbers = #tpu.dot_dimension_numbers<[1], [0], [0], [1], [0, 0, 1, 1], [], []>} : vector<2x32xf32>, vector<32x192xf32>, vector<2x192xf32> -> vector<2x192xf32>
    %40 = vector.broadcast %35 : vector<1x192xf32> to vector<2x192xf32>
    %41 = arith.addf %39, %40 : vector<2x192xf32>
    %42 = vector.extract_strided_slice %41 {offsets = [0, 0], sizes = [2, 32], strides = [1, 1]} : vector<2x192xf32> to vector<2x32xf32>
    %43 = vector.extract_strided_slice %41 {offsets = [0, 32], sizes = [2, 32], strides = [1, 1]} : vector<2x192xf32> to vector<2x32xf32>
    %44 = arith.negf %43 : vector<2x32xf32>
    %45 = math.exp %44 : vector<2x32xf32>
    %cst_40 = arith.constant 1.000000e+00 : f32
    %46 = vector.broadcast %cst_40 : f32 to vector<2x32xf32>
    %47 = arith.addf %46, %45 : vector<2x32xf32>
    %48 = arith.divf %46, %47 : vector<2x32xf32>
    %49 = vector.extract_strided_slice %41 {offsets = [0, 64], sizes = [2, 128], strides = [1, 1]} : vector<2x192xf32> to vector<2x128xf32>
    %50 = vector.shape_cast %42 : vector<2x32xf32> to vector<2x1x32xf32>
    %51 = vector.broadcast %50 : vector<2x1x32xf32> to vector<2x16x32xf32>
    %52 = arith.addf %26, %51 : vector<2x16x32xf32>
    %cst_41 = arith.constant 0.000000e+00 : f32
    %53 = vector.broadcast %cst_41 : f32 to vector<2x16x32xf32>
    %54 = arith.maximumf %52, %53 : vector<2x16x32xf32>
    %55 = vector.shape_cast %27 : vector<1x32xf32> to vector<1x1x32xf32>
    %56 = vector.broadcast %55 : vector<1x1x32xf32> to vector<2x16x32xf32>
    %57 = arith.mulf %54, %56 : vector<2x16x32xf32>
    %cst_42 = arith.constant dense<0.000000e+00> : vector<2x16xf32>
    %58 = vector.multi_reduction <add>, %57, %cst_42 [2] : vector<2x16x32xf32> to vector<2x16xf32>
    %cst_43 = arith.constant dense<0xFF800000> : vector<2xf32>
    %59 = vector.multi_reduction <maximumf>, %58, %cst_43 [1] : vector<2x16xf32> to vector<2xf32>
    %60 = vector.shape_cast %59 : vector<2xf32> to vector<2x1xf32>
    %61 = vector.broadcast %60 : vector<2x1xf32> to vector<2x16xf32>
    %62 = arith.subf %58, %61 : vector<2x16xf32>
    %63 = math.exp %62 : vector<2x16xf32>
    %cst_44 = arith.constant dense<0.000000e+00> : vector<2xf32>
    %64 = vector.multi_reduction <add>, %63, %cst_44 [1] : vector<2x16xf32> to vector<2xf32>
    %65 = vector.shape_cast %64 : vector<2xf32> to vector<2x1xf32>
    %66 = vector.broadcast %65 : vector<2x1xf32> to vector<2x16xf32>
    %67 = arith.divf %63, %66 : vector<2x16xf32>
    %68 = vector.shape_cast %67 : vector<2x16xf32> to vector<2x16x1xf32>
    %69 = vector.broadcast %68 : vector<2x16x1xf32> to vector<2x16x32xf32>
    %70 = arith.mulf %69, %10 : vector<2x16x32xf32>
    %cst_45 = arith.constant dense<0.000000e+00> : vector<2x32xf32>
    %71 = vector.multi_reduction <add>, %70, %cst_45 [1] : vector<2x16x32xf32> to vector<2x32xf32>
    %72 = arith.mulf %48, %71 : vector<2x32xf32>
    %73 = vector.extract_strided_slice %33 {offsets = [0, 0], sizes = [2, 128], strides = [1, 1]} : vector<14x128xf32> to vector<2x128xf32>
    %cst_46 = arith.constant dense<0.000000e+00> : vector<2x128xf32>
    %74 = tpu.matmul %72, %36, %cst_46 {dimension_numbers = #tpu.dot_dimension_numbers<[1], [0], [0], [1], [0, 0, 1, 1], [], []>} : vector<2x32xf32>, vector<32x128xf32>, vector<2x128xf32> -> vector<2x128xf32>
    %75 = arith.addf %73, %74 : vector<2x128xf32>
    %76 = arith.addf %75, %49 : vector<2x128xf32>
    %77 = vector.extract_strided_slice %76 {offsets = [0, 0], sizes = [2, 32], strides = [1, 1]} : vector<2x128xf32> to vector<2x32xf32>
    %78 = arith.negf %77 : vector<2x32xf32>
    %79 = math.exp %78 : vector<2x32xf32>
    %cst_47 = arith.constant 1.000000e+00 : f32
    %80 = vector.broadcast %cst_47 : f32 to vector<2x32xf32>
    %81 = arith.addf %80, %79 : vector<2x32xf32>
    %82 = arith.divf %80, %81 : vector<2x32xf32>
    %83 = vector.extract_strided_slice %76 {offsets = [0, 32], sizes = [2, 32], strides = [1, 1]} : vector<2x128xf32> to vector<2x32xf32>
    %84 = arith.negf %83 : vector<2x32xf32>
    %85 = math.exp %84 : vector<2x32xf32>
    %cst_48 = arith.constant 1.000000e+00 : f32
    %86 = vector.broadcast %cst_48 : f32 to vector<2x32xf32>
    %87 = arith.addf %86, %85 : vector<2x32xf32>
    %88 = arith.divf %86, %87 : vector<2x32xf32>
    %89 = vector.extract_strided_slice %76 {offsets = [0, 64], sizes = [2, 32], strides = [1, 1]} : vector<2x128xf32> to vector<2x32xf32>
    %90 = math.tanh %89 : vector<2x32xf32>
    %91 = vector.extract_strided_slice %76 {offsets = [0, 96], sizes = [2, 32], strides = [1, 1]} : vector<2x128xf32> to vector<2x32xf32>
    %92 = arith.negf %91 : vector<2x32xf32>
    %93 = math.exp %92 : vector<2x32xf32>
    %cst_49 = arith.constant 1.000000e+00 : f32
    %94 = vector.broadcast %cst_49 : f32 to vector<2x32xf32>
    %95 = arith.addf %94, %93 : vector<2x32xf32>
    %96 = arith.divf %94, %95 : vector<2x32xf32>
    %97 = arith.mulf %88, %20 : vector<2x32xf32>
    %98 = arith.mulf %82, %90 : vector<2x32xf32>
    %99 = arith.addf %97, %98 : vector<2x32xf32>
    %100 = math.tanh %99 : vector<2x32xf32>
    %101 = arith.mulf %96, %100 : vector<2x32xf32>
    %102 = vector.extract_strided_slice %37 {offsets = [0, 0], sizes = [2, 1], strides = [1, 1]} : vector<14x1xf32> to vector<2x1xf32>
    %cst_50 = arith.constant 5.000000e-01 : f32
    %103 = vector.broadcast %cst_50 : f32 to vector<2x1xf32>
    %104 = arith.cmpf ogt, %102, %103 : vector<2x1xf32>
    %105 = vector.shape_cast %104 : vector<2x1xi1> to vector<2x1xi1>
    %106 = vector.broadcast %105 : vector<2x1xi1> to vector<2x32xi1>
    %107 = arith.select %106, %101, %19 : vector<2x32xi1>, vector<2x32xf32>
    %108 = vector.shape_cast %104 : vector<2x1xi1> to vector<2x1xi1>
    %109 = vector.broadcast %108 : vector<2x1xi1> to vector<2x32xi1>
    %110 = arith.select %109, %99, %20 : vector<2x32xi1>, vector<2x32xf32>
    %111 = vector.broadcast %102 : vector<2x1xf32> to vector<2x16xf32>
    %112 = arith.mulf %111, %67 : vector<2x16xf32>
    %113 = arith.addf %38, %112 : vector<2x16xf32>
    %c0_51 = arith.constant 0 : index
    %c0_52 = arith.constant 0 : index
    %114 = vector.load %arg21[%c0_51, %c0_52] : memref<14x32xf32, #tpu.memory_space<vmem>>, vector<2x32xf32>
    tpu.vector_store %arg21[%c0_51, %c0_52], %101 {strides = array<i32>} : memref<14x32xf32, #tpu.memory_space<vmem>>, vector<2x32xf32>,
    %cst_53 = arith.constant dense<0.000000e+00> : vector<2x192xf32>
    %115 = tpu.matmul %107, %34, %cst_53 {dimension_numbers = #tpu.dot_dimension_numbers<[1], [0], [0], [1], [0, 0, 1, 1], [], []>} : vector<2x32xf32>, vector<32x192xf32>, vector<2x192xf32> -> vector<2x192xf32>
    %116 = vector.broadcast %35 : vector<1x192xf32> to vector<2x192xf32>
    %117 = arith.addf %115, %116 : vector<2x192xf32>
    %118 = vector.extract_strided_slice %117 {offsets = [0, 0], sizes = [2, 32], strides = [1, 1]} : vector<2x192xf32> to vector<2x32xf32>
    %119 = vector.extract_strided_slice %117 {offsets = [0, 32], sizes = [2, 32], strides = [1, 1]} : vector<2x192xf32> to vector<2x32xf32>
    %120 = arith.negf %119 : vector<2x32xf32>
    %121 = math.exp %120 : vector<2x32xf32>
    %cst_54 = arith.constant 1.000000e+00 : f32
    %122 = vector.broadcast %cst_54 : f32 to vector<2x32xf32>
    %123 = arith.addf %122, %121 : vector<2x32xf32>
    %124 = arith.divf %122, %123 : vector<2x32xf32>
    %125 = vector.extract_strided_slice %117 {offsets = [0, 64], sizes = [2, 128], strides = [1, 1]} : vector<2x192xf32> to vector<2x128xf32>
    %126 = vector.shape_cast %118 : vector<2x32xf32> to vector<2x1x32xf32>
    %127 = vector.broadcast %126 : vector<2x1x32xf32> to vector<2x16x32xf32>
    %128 = arith.addf %26, %127 : vector<2x16x32xf32>
    %cst_55 = arith.constant 0.000000e+00 : f32
    %129 = vector.broadcast %cst_55 : f32 to vector<2x16x32xf32>
    %130 = arith.maximumf %128, %129 : vector<2x16x32xf32>
    %131 = vector.shape_cast %27 : vector<1x32xf32> to vector<1x1x32xf32>
    %132 = vector.broadcast %131 : vector<1x1x32xf32> to vector<2x16x32xf32>
    %133 = arith.mulf %130, %132 : vector<2x16x32xf32>
    %cst_56 = arith.constant dense<0.000000e+00> : vector<2x16xf32>
    %134 = vector.multi_reduction <add>, %133, %cst_56 [2] : vector<2x16x32xf32> to vector<2x16xf32>
    %cst_57 = arith.constant dense<0xFF800000> : vector<2xf32>
    %135 = vector.multi_reduction <maximumf>, %134, %cst_57 [1] : vector<2x16xf32> to vector<2xf32>
    %136 = vector.shape_cast %135 : vector<2xf32> to vector<2x1xf32>
    %137 = vector.broadcast %136 : vector<2x1xf32> to vector<2x16xf32>
    %138 = arith.subf %134, %137 : vector<2x16xf32>
    %139 = math.exp %138 : vector<2x16xf32>
    %cst_58 = arith.constant dense<0.000000e+00> : vector<2xf32>
    %140 = vector.multi_reduction <add>, %139, %cst_58 [1] : vector<2x16xf32> to vector<2xf32>
    %141 = vector.shape_cast %140 : vector<2xf32> to vector<2x1xf32>
    %142 = vector.broadcast %141 : vector<2x1xf32> to vector<2x16xf32>
    %143 = arith.divf %139, %142 : vector<2x16xf32>
    %144 = vector.shape_cast %143 : vector<2x16xf32> to vector<2x16x1xf32>
    %145 = vector.broadcast %144 : vector<2x16x1xf32> to vector<2x16x32xf32>
    %146 = arith.mulf %145, %10 : vector<2x16x32xf32>
    %cst_59 = arith.constant dense<0.000000e+00> : vector<2x32xf32>
    %147 = vector.multi_reduction <add>, %146, %cst_59 [1] : vector<2x16x32xf32> to vector<2x32xf32>
    %148 = arith.mulf %124, %147 : vector<2x32xf32>
    %149 = vector.extract_strided_slice %33 {offsets = [2, 0], sizes = [2, 128], strides = [1, 1]} : vector<14x128xf32> to vector<2x128xf32>
    %cst_60 = arith.constant dense<0.000000e+00> : vector<2x128xf32>
    %150 = tpu.matmul %148, %36, %cst_60 {dimension_numbers = #tpu.dot_dimension_numbers<[1], [0], [0], [1], [0, 0, 1, 1], [], []>} : vector<2x32xf32>, vector<32x128xf32>, vector<2x128xf32> -> vector<2x128xf32>
    %151 = arith.addf %149, %150 : vector<2x128xf32>
    %152 = arith.addf %151, %125 : vector<2x128xf32>
    %153 = vector.extract_strided_slice %152 {offsets = [0, 0], sizes = [2, 32], strides = [1, 1]} : vector<2x128xf32> to vector<2x32xf32>
    %154 = arith.negf %153 : vector<2x32xf32>
    %155 = math.exp %154 : vector<2x32xf32>
    %cst_61 = arith.constant 1.000000e+00 : f32
    %156 = vector.broadcast %cst_61 : f32 to vector<2x32xf32>
    %157 = arith.addf %156, %155 : vector<2x32xf32>
    %158 = arith.divf %156, %157 : vector<2x32xf32>
    %159 = vector.extract_strided_slice %152 {offsets = [0, 32], sizes = [2, 32], strides = [1, 1]} : vector<2x128xf32> to vector<2x32xf32>
    %160 = arith.negf %159 : vector<2x32xf32>
    %161 = math.exp %160 : vector<2x32xf32>
    %cst_62 = arith.constant 1.000000e+00 : f32
    %162 = vector.broadcast %cst_62 : f32 to vector<2x32xf32>
    %163 = arith.addf %162, %161 : vector<2x32xf32>
    %164 = arith.divf %162, %163 : vector<2x32xf32>
    %165 = vector.extract_strided_slice %152 {offsets = [0, 64], sizes = [2, 32], strides = [1, 1]} : vector<2x128xf32> to vector<2x32xf32>
    %166 = math.tanh %165 : vector<2x32xf32>
    %167 = vector.extract_strided_slice %152 {offsets = [0, 96], sizes = [2, 32], strides = [1, 1]} : vector<2x128xf32> to vector<2x32xf32>
    %168 = arith.negf %167 : vector<2x32xf32>
    %169 = math.exp %168 : vector<2x32xf32>
    %cst_63 = arith.constant 1.000000e+00 : f32
    %170 = vector.broadcast %cst_63 : f32 to vector<2x32xf32>
    %171 = arith.addf %170, %169 : vector<2x32xf32>
    %172 = arith.divf %170, %171 : vector<2x32xf32>
    %173 = arith.mulf %164, %110 : vector<2x32xf32>
    %174 = arith.mulf %158, %166 : vector<2x32xf32>
    %175 = arith.addf %173, %174 : vector<2x32xf32>
    %176 = math.tanh %175 : vector<2x32xf32>
    %177 = arith.mulf %172, %176 : vector<2x32xf32>
    %178 = vector.extract_strided_slice %37 {offsets = [2, 0], sizes = [2, 1], strides = [1, 1]} : vector<14x1xf32> to vector<2x1xf32>
    %cst_64 = arith.constant 5.000000e-01 : f32
    %179 = vector.broadcast %cst_64 : f32 to vector<2x1xf32>
    %180 = arith.cmpf ogt, %178, %179 : vector<2x1xf32>
    %181 = vector.shape_cast %180 : vector<2x1xi1> to vector<2x1xi1>
    %182 = vector.broadcast %181 : vector<2x1xi1> to vector<2x32xi1>
    %183 = arith.select %182, %177, %107 : vector<2x32xi1>, vector<2x32xf32>
    %184 = vector.shape_cast %180 : vector<2x1xi1> to vector<2x1xi1>
    %185 = vector.broadcast %184 : vector<2x1xi1> to vector<2x32xi1>
    %186 = arith.select %185, %175, %110 : vector<2x32xi1>, vector<2x32xf32>
    %187 = vector.broadcast %178 : vector<2x1xf32> to vector<2x16xf32>
    %188 = arith.mulf %187, %143 : vector<2x16xf32>
    %189 = arith.addf %113, %188 : vector<2x16xf32>
    %c2 = arith.constant 2 : index
    %c0_65 = arith.constant 0 : index
    %190 = vector.load %arg21[%c2, %c0_65] : memref<14x32xf32, #tpu.memory_space<vmem>>, vector<2x32xf32>
    tpu.vector_store %arg21[%c2, %c0_65], %177 {strides = array<i32>} : memref<14x32xf32, #tpu.memory_space<vmem>>, vector<2x32xf32>,
    %cst_66 = arith.constant dense<0.000000e+00> : vector<2x192xf32>
    %191 = tpu.matmul %183, %34, %cst_66 {dimension_numbers = #tpu.dot_dimension_numbers<[1], [0], [0], [1], [0, 0, 1, 1], [], []>} : vector<2x32xf32>, vector<32x192xf32>, vector<2x192xf32> -> vector<2x192xf32>
    %192 = vector.broadcast %35 : vector<1x192xf32> to vector<2x192xf32>
    %193 = arith.addf %191, %192 : vector<2x192xf32>
    %194 = vector.extract_strided_slice %193 {offsets = [0, 0], sizes = [2, 32], strides = [1, 1]} : vector<2x192xf32> to vector<2x32xf32>
    %195 = vector.extract_strided_slice %193 {offsets = [0, 32], sizes = [2, 32], strides = [1, 1]} : vector<2x192xf32> to vector<2x32xf32>
    %196 = arith.negf %195 : vector<2x32xf32>
    %197 = math.exp %196 : vector<2x32xf32>
    %cst_67 = arith.constant 1.000000e+00 : f32
    %198 = vector.broadcast %cst_67 : f32 to vector<2x32xf32>
    %199 = arith.addf %198, %197 : vector<2x32xf32>
    %200 = arith.divf %198, %199 : vector<2x32xf32>
    %201 = vector.extract_strided_slice %193 {offsets = [0, 64], sizes = [2, 128], strides = [1, 1]} : vector<2x192xf32> to vector<2x128xf32>
    %202 = vector.shape_cast %194 : vector<2x32xf32> to vector<2x1x32xf32>
    %203 = vector.broadcast %202 : vector<2x1x32xf32> to vector<2x16x32xf32>
    %204 = arith.addf %26, %203 : vector<2x16x32xf32>
    %cst_68 = arith.constant 0.000000e+00 : f32
    %205 = vector.broadcast %cst_68 : f32 to vector<2x16x32xf32>
    %206 = arith.maximumf %204, %205 : vector<2x16x32xf32>
    %207 = vector.shape_cast %27 : vector<1x32xf32> to vector<1x1x32xf32>
    %208 = vector.broadcast %207 : vector<1x1x32xf32> to vector<2x16x32xf32>
    %209 = arith.mulf %206, %208 : vector<2x16x32xf32>
    %cst_69 = arith.constant dense<0.000000e+00> : vector<2x16xf32>
    %210 = vector.multi_reduction <add>, %209, %cst_69 [2] : vector<2x16x32xf32> to vector<2x16xf32>
    %cst_70 = arith.constant dense<0xFF800000> : vector<2xf32>
    %211 = vector.multi_reduction <maximumf>, %210, %cst_70 [1] : vector<2x16xf32> to vector<2xf32>
    %212 = vector.shape_cast %211 : vector<2xf32> to vector<2x1xf32>
    %213 = vector.broadcast %212 : vector<2x1xf32> to vector<2x16xf32>
    %214 = arith.subf %210, %213 : vector<2x16xf32>
    %215 = math.exp %214 : vector<2x16xf32>
    %cst_71 = arith.constant dense<0.000000e+00> : vector<2xf32>
    %216 = vector.multi_reduction <add>, %215, %cst_71 [1] : vector<2x16xf32> to vector<2xf32>
    %217 = vector.shape_cast %216 : vector<2xf32> to vector<2x1xf32>
    %218 = vector.broadcast %217 : vector<2x1xf32> to vector<2x16xf32>
    %219 = arith.divf %215, %218 : vector<2x16xf32>
    %220 = vector.shape_cast %219 : vector<2x16xf32> to vector<2x16x1xf32>
    %221 = vector.broadcast %220 : vector<2x16x1xf32> to vector<2x16x32xf32>
    %222 = arith.mulf %221, %10 : vector<2x16x32xf32>
    %cst_72 = arith.constant dense<0.000000e+00> : vector<2x32xf32>
    %223 = vector.multi_reduction <add>, %222, %cst_72 [1] : vector<2x16x32xf32> to vector<2x32xf32>
    %224 = arith.mulf %200, %223 : vector<2x32xf32>
    %225 = vector.extract_strided_slice %33 {offsets = [4, 0], sizes = [2, 128], strides = [1, 1]} : vector<14x128xf32> to vector<2x128xf32>
    %cst_73 = arith.constant dense<0.000000e+00> : vector<2x128xf32>
    %226 = tpu.matmul %224, %36, %cst_73 {dimension_numbers = #tpu.dot_dimension_numbers<[1], [0], [0], [1], [0, 0, 1, 1], [], []>} : vector<2x32xf32>, vector<32x128xf32>, vector<2x128xf32> -> vector<2x128xf32>
    %227 = arith.addf %225, %226 : vector<2x128xf32>
    %228 = arith.addf %227, %201 : vector<2x128xf32>
    %229 = vector.extract_strided_slice %228 {offsets = [0, 0], sizes = [2, 32], strides = [1, 1]} : vector<2x128xf32> to vector<2x32xf32>
    %230 = arith.negf %229 : vector<2x32xf32>
    %231 = math.exp %230 : vector<2x32xf32>
    %cst_74 = arith.constant 1.000000e+00 : f32
    %232 = vector.broadcast %cst_74 : f32 to vector<2x32xf32>
    %233 = arith.addf %232, %231 : vector<2x32xf32>
    %234 = arith.divf %232, %233 : vector<2x32xf32>
    %235 = vector.extract_strided_slice %228 {offsets = [0, 32], sizes = [2, 32], strides = [1, 1]} : vector<2x128xf32> to vector<2x32xf32>
    %236 = arith.negf %235 : vector<2x32xf32>
    %237 = math.exp %236 : vector<2x32xf32>
    %cst_75 = arith.constant 1.000000e+00 : f32
    %238 = vector.broadcast %cst_75 : f32 to vector<2x32xf32>
    %239 = arith.addf %238, %237 : vector<2x32xf32>
    %240 = arith.divf %238, %239 : vector<2x32xf32>
    %241 = vector.extract_strided_slice %228 {offsets = [0, 64], sizes = [2, 32], strides = [1, 1]} : vector<2x128xf32> to vector<2x32xf32>
    %242 = math.tanh %241 : vector<2x32xf32>
    %243 = vector.extract_strided_slice %228 {offsets = [0, 96], sizes = [2, 32], strides = [1, 1]} : vector<2x128xf32> to vector<2x32xf32>
    %244 = arith.negf %243 : vector<2x32xf32>
    %245 = math.exp %244 : vector<2x32xf32>
    %cst_76 = arith.constant 1.000000e+00 : f32
    %246 = vector.broadcast %cst_76 : f32 to vector<2x32xf32>
    %247 = arith.addf %246, %245 : vector<2x32xf32>
    %248 = arith.divf %246, %247 : vector<2x32xf32>
    %249 = arith.mulf %240, %186 : vector<2x32xf32>
    %250 = arith.mulf %234, %242 : vector<2x32xf32>
    %251 = arith.addf %249, %250 : vector<2x32xf32>
    %252 = math.tanh %251 : vector<2x32xf32>
    %253 = arith.mulf %248, %252 : vector<2x32xf32>
    %254 = vector.extract_strided_slice %37 {offsets = [4, 0], sizes = [2, 1], strides = [1, 1]} : vector<14x1xf32> to vector<2x1xf32>
    %cst_77 = arith.constant 5.000000e-01 : f32
    %255 = vector.broadcast %cst_77 : f32 to vector<2x1xf32>
    %256 = arith.cmpf ogt, %254, %255 : vector<2x1xf32>
    %257 = vector.shape_cast %256 : vector<2x1xi1> to vector<2x1xi1>
    %258 = vector.broadcast %257 : vector<2x1xi1> to vector<2x32xi1>
    %259 = arith.select %258, %253, %183 : vector<2x32xi1>, vector<2x32xf32>
    %260 = vector.shape_cast %256 : vector<2x1xi1> to vector<2x1xi1>
    %261 = vector.broadcast %260 : vector<2x1xi1> to vector<2x32xi1>
    %262 = arith.select %261, %251, %186 : vector<2x32xi1>, vector<2x32xf32>
    %263 = vector.broadcast %254 : vector<2x1xf32> to vector<2x16xf32>
    %264 = arith.mulf %263, %219 : vector<2x16xf32>
    %265 = arith.addf %189, %264 : vector<2x16xf32>
    %c4 = arith.constant 4 : index
    %c0_78 = arith.constant 0 : index
    %266 = vector.load %arg21[%c4, %c0_78] : memref<14x32xf32, #tpu.memory_space<vmem>>, vector<2x32xf32>
    tpu.vector_store %arg21[%c4, %c0_78], %253 {strides = array<i32>} : memref<14x32xf32, #tpu.memory_space<vmem>>, vector<2x32xf32>,
    %cst_79 = arith.constant dense<0.000000e+00> : vector<2x192xf32>
    %267 = tpu.matmul %259, %34, %cst_79 {dimension_numbers = #tpu.dot_dimension_numbers<[1], [0], [0], [1], [0, 0, 1, 1], [], []>} : vector<2x32xf32>, vector<32x192xf32>, vector<2x192xf32> -> vector<2x192xf32>
    %268 = vector.broadcast %35 : vector<1x192xf32> to vector<2x192xf32>
    %269 = arith.addf %267, %268 : vector<2x192xf32>
    %270 = vector.extract_strided_slice %269 {offsets = [0, 0], sizes = [2, 32], strides = [1, 1]} : vector<2x192xf32> to vector<2x32xf32>
    %271 = vector.extract_strided_slice %269 {offsets = [0, 32], sizes = [2, 32], strides = [1, 1]} : vector<2x192xf32> to vector<2x32xf32>
    %272 = arith.negf %271 : vector<2x32xf32>
    %273 = math.exp %272 : vector<2x32xf32>
    %cst_80 = arith.constant 1.000000e+00 : f32
    %274 = vector.broadcast %cst_80 : f32 to vector<2x32xf32>
    %275 = arith.addf %274, %273 : vector<2x32xf32>
    %276 = arith.divf %274, %275 : vector<2x32xf32>
    %277 = vector.extract_strided_slice %269 {offsets = [0, 64], sizes = [2, 128], strides = [1, 1]} : vector<2x192xf32> to vector<2x128xf32>
    %278 = vector.shape_cast %270 : vector<2x32xf32> to vector<2x1x32xf32>
    %279 = vector.broadcast %278 : vector<2x1x32xf32> to vector<2x16x32xf32>
    %280 = arith.addf %26, %279 : vector<2x16x32xf32>
    %cst_81 = arith.constant 0.000000e+00 : f32
    %281 = vector.broadcast %cst_81 : f32 to vector<2x16x32xf32>
    %282 = arith.maximumf %280, %281 : vector<2x16x32xf32>
    %283 = vector.shape_cast %27 : vector<1x32xf32> to vector<1x1x32xf32>
    %284 = vector.broadcast %283 : vector<1x1x32xf32> to vector<2x16x32xf32>
    %285 = arith.mulf %282, %284 : vector<2x16x32xf32>
    %cst_82 = arith.constant dense<0.000000e+00> : vector<2x16xf32>
    %286 = vector.multi_reduction <add>, %285, %cst_82 [2] : vector<2x16x32xf32> to vector<2x16xf32>
    %cst_83 = arith.constant dense<0xFF800000> : vector<2xf32>
    %287 = vector.multi_reduction <maximumf>, %286, %cst_83 [1] : vector<2x16xf32> to vector<2xf32>
    %288 = vector.shape_cast %287 : vector<2xf32> to vector<2x1xf32>
    %289 = vector.broadcast %288 : vector<2x1xf32> to vector<2x16xf32>
    %290 = arith.subf %286, %289 : vector<2x16xf32>
    %291 = math.exp %290 : vector<2x16xf32>
    %cst_84 = arith.constant dense<0.000000e+00> : vector<2xf32>
    %292 = vector.multi_reduction <add>, %291, %cst_84 [1] : vector<2x16xf32> to vector<2xf32>
    %293 = vector.shape_cast %292 : vector<2xf32> to vector<2x1xf32>
    %294 = vector.broadcast %293 : vector<2x1xf32> to vector<2x16xf32>
    %295 = arith.divf %291, %294 : vector<2x16xf32>
    %296 = vector.shape_cast %295 : vector<2x16xf32> to vector<2x16x1xf32>
    %297 = vector.broadcast %296 : vector<2x16x1xf32> to vector<2x16x32xf32>
    %298 = arith.mulf %297, %10 : vector<2x16x32xf32>
    %cst_85 = arith.constant dense<0.000000e+00> : vector<2x32xf32>
    %299 = vector.multi_reduction <add>, %298, %cst_85 [1] : vector<2x16x32xf32> to vector<2x32xf32>
    %300 = arith.mulf %276, %299 : vector<2x32xf32>
    %301 = vector.extract_strided_slice %33 {offsets = [6, 0], sizes = [2, 128], strides = [1, 1]} : vector<14x128xf32> to vector<2x128xf32>
    %cst_86 = arith.constant dense<0.000000e+00> : vector<2x128xf32>
    %302 = tpu.matmul %300, %36, %cst_86 {dimension_numbers = #tpu.dot_dimension_numbers<[1], [0], [0], [1], [0, 0, 1, 1], [], []>} : vector<2x32xf32>, vector<32x128xf32>, vector<2x128xf32> -> vector<2x128xf32>
    %303 = arith.addf %301, %302 : vector<2x128xf32>
    %304 = arith.addf %303, %277 : vector<2x128xf32>
    %305 = vector.extract_strided_slice %304 {offsets = [0, 0], sizes = [2, 32], strides = [1, 1]} : vector<2x128xf32> to vector<2x32xf32>
    %306 = arith.negf %305 : vector<2x32xf32>
    %307 = math.exp %306 : vector<2x32xf32>
    %cst_87 = arith.constant 1.000000e+00 : f32
    %308 = vector.broadcast %cst_87 : f32 to vector<2x32xf32>
    %309 = arith.addf %308, %307 : vector<2x32xf32>
    %310 = arith.divf %308, %309 : vector<2x32xf32>
    %311 = vector.extract_strided_slice %304 {offsets = [0, 32], sizes = [2, 32], strides = [1, 1]} : vector<2x128xf32> to vector<2x32xf32>
    %312 = arith.negf %311 : vector<2x32xf32>
    %313 = math.exp %312 : vector<2x32xf32>
    %cst_88 = arith.constant 1.000000e+00 : f32
    %314 = vector.broadcast %cst_88 : f32 to vector<2x32xf32>
    %315 = arith.addf %314, %313 : vector<2x32xf32>
    %316 = arith.divf %314, %315 : vector<2x32xf32>
    %317 = vector.extract_strided_slice %304 {offsets = [0, 64], sizes = [2, 32], strides = [1, 1]} : vector<2x128xf32> to vector<2x32xf32>
    %318 = math.tanh %317 : vector<2x32xf32>
    %319 = vector.extract_strided_slice %304 {offsets = [0, 96], sizes = [2, 32], strides = [1, 1]} : vector<2x128xf32> to vector<2x32xf32>
    %320 = arith.negf %319 : vector<2x32xf32>
    %321 = math.exp %320 : vector<2x32xf32>
    %cst_89 = arith.constant 1.000000e+00 : f32
    %322 = vector.broadcast %cst_89 : f32 to vector<2x32xf32>
    %323 = arith.addf %322, %321 : vector<2x32xf32>
    %324 = arith.divf %322, %323 : vector<2x32xf32>
    %325 = arith.mulf %316, %262 : vector<2x32xf32>
    %326 = arith.mulf %310, %318 : vector<2x32xf32>
    %327 = arith.addf %325, %326 : vector<2x32xf32>
    %328 = math.tanh %327 : vector<2x32xf32>
    %329 = arith.mulf %324, %328 : vector<2x32xf32>
    %330 = vector.extract_strided_slice %37 {offsets = [6, 0], sizes = [2, 1], strides = [1, 1]} : vector<14x1xf32> to vector<2x1xf32>
    %cst_90 = arith.constant 5.000000e-01 : f32
    %331 = vector.broadcast %cst_90 : f32 to vector<2x1xf32>
    %332 = arith.cmpf ogt, %330, %331 : vector<2x1xf32>
    %333 = vector.shape_cast %332 : vector<2x1xi1> to vector<2x1xi1>
    %334 = vector.broadcast %333 : vector<2x1xi1> to vector<2x32xi1>
    %335 = arith.select %334, %329, %259 : vector<2x32xi1>, vector<2x32xf32>
    %336 = vector.shape_cast %332 : vector<2x1xi1> to vector<2x1xi1>
    %337 = vector.broadcast %336 : vector<2x1xi1> to vector<2x32xi1>
    %338 = arith.select %337, %327, %262 : vector<2x32xi1>, vector<2x32xf32>
    %339 = vector.broadcast %330 : vector<2x1xf32> to vector<2x16xf32>
    %340 = arith.mulf %339, %295 : vector<2x16xf32>
    %341 = arith.addf %265, %340 : vector<2x16xf32>
    %c6 = arith.constant 6 : index
    %c0_91 = arith.constant 0 : index
    %342 = vector.load %arg21[%c6, %c0_91] : memref<14x32xf32, #tpu.memory_space<vmem>>, vector<2x32xf32>
    tpu.vector_store %arg21[%c6, %c0_91], %329 {strides = array<i32>} : memref<14x32xf32, #tpu.memory_space<vmem>>, vector<2x32xf32>,
    %cst_92 = arith.constant dense<0.000000e+00> : vector<2x192xf32>
    %343 = tpu.matmul %335, %34, %cst_92 {dimension_numbers = #tpu.dot_dimension_numbers<[1], [0], [0], [1], [0, 0, 1, 1], [], []>} : vector<2x32xf32>, vector<32x192xf32>, vector<2x192xf32> -> vector<2x192xf32>
    %344 = vector.broadcast %35 : vector<1x192xf32> to vector<2x192xf32>
    %345 = arith.addf %343, %344 : vector<2x192xf32>
    %346 = vector.extract_strided_slice %345 {offsets = [0, 0], sizes = [2, 32], strides = [1, 1]} : vector<2x192xf32> to vector<2x32xf32>
    %347 = vector.extract_strided_slice %345 {offsets = [0, 32], sizes = [2, 32], strides = [1, 1]} : vector<2x192xf32> to vector<2x32xf32>
    %348 = arith.negf %347 : vector<2x32xf32>
    %349 = math.exp %348 : vector<2x32xf32>
    %cst_93 = arith.constant 1.000000e+00 : f32
    %350 = vector.broadcast %cst_93 : f32 to vector<2x32xf32>
    %351 = arith.addf %350, %349 : vector<2x32xf32>
    %352 = arith.divf %350, %351 : vector<2x32xf32>
    %353 = vector.extract_strided_slice %345 {offsets = [0, 64], sizes = [2, 128], strides = [1, 1]} : vector<2x192xf32> to vector<2x128xf32>
    %354 = vector.shape_cast %346 : vector<2x32xf32> to vector<2x1x32xf32>
    %355 = vector.broadcast %354 : vector<2x1x32xf32> to vector<2x16x32xf32>
    %356 = arith.addf %26, %355 : vector<2x16x32xf32>
    %cst_94 = arith.constant 0.000000e+00 : f32
    %357 = vector.broadcast %cst_94 : f32 to vector<2x16x32xf32>
    %358 = arith.maximumf %356, %357 : vector<2x16x32xf32>
    %359 = vector.shape_cast %27 : vector<1x32xf32> to vector<1x1x32xf32>
    %360 = vector.broadcast %359 : vector<1x1x32xf32> to vector<2x16x32xf32>
    %361 = arith.mulf %358, %360 : vector<2x16x32xf32>
    %cst_95 = arith.constant dense<0.000000e+00> : vector<2x16xf32>
    %362 = vector.multi_reduction <add>, %361, %cst_95 [2] : vector<2x16x32xf32> to vector<2x16xf32>
    %cst_96 = arith.constant dense<0xFF800000> : vector<2xf32>
    %363 = vector.multi_reduction <maximumf>, %362, %cst_96 [1] : vector<2x16xf32> to vector<2xf32>
    %364 = vector.shape_cast %363 : vector<2xf32> to vector<2x1xf32>
    %365 = vector.broadcast %364 : vector<2x1xf32> to vector<2x16xf32>
    %366 = arith.subf %362, %365 : vector<2x16xf32>
    %367 = math.exp %366 : vector<2x16xf32>
    %cst_97 = arith.constant dense<0.000000e+00> : vector<2xf32>
    %368 = vector.multi_reduction <add>, %367, %cst_97 [1] : vector<2x16xf32> to vector<2xf32>
    %369 = vector.shape_cast %368 : vector<2xf32> to vector<2x1xf32>
    %370 = vector.broadcast %369 : vector<2x1xf32> to vector<2x16xf32>
    %371 = arith.divf %367, %370 : vector<2x16xf32>
    %372 = vector.shape_cast %371 : vector<2x16xf32> to vector<2x16x1xf32>
    %373 = vector.broadcast %372 : vector<2x16x1xf32> to vector<2x16x32xf32>
    %374 = arith.mulf %373, %10 : vector<2x16x32xf32>
    %cst_98 = arith.constant dense<0.000000e+00> : vector<2x32xf32>
    %375 = vector.multi_reduction <add>, %374, %cst_98 [1] : vector<2x16x32xf32> to vector<2x32xf32>
    %376 = arith.mulf %352, %375 : vector<2x32xf32>
    %377 = vector.extract_strided_slice %33 {offsets = [8, 0], sizes = [2, 128], strides = [1, 1]} : vector<14x128xf32> to vector<2x128xf32>
    %cst_99 = arith.constant dense<0.000000e+00> : vector<2x128xf32>
    %378 = tpu.matmul %376, %36, %cst_99 {dimension_numbers = #tpu.dot_dimension_numbers<[1], [0], [0], [1], [0, 0, 1, 1], [], []>} : vector<2x32xf32>, vector<32x128xf32>, vector<2x128xf32> -> vector<2x128xf32>
    %379 = arith.addf %377, %378 : vector<2x128xf32>
    %380 = arith.addf %379, %353 : vector<2x128xf32>
    %381 = vector.extract_strided_slice %380 {offsets = [0, 0], sizes = [2, 32], strides = [1, 1]} : vector<2x128xf32> to vector<2x32xf32>
    %382 = arith.negf %381 : vector<2x32xf32>
    %383 = math.exp %382 : vector<2x32xf32>
    %cst_100 = arith.constant 1.000000e+00 : f32
    %384 = vector.broadcast %cst_100 : f32 to vector<2x32xf32>
    %385 = arith.addf %384, %383 : vector<2x32xf32>
    %386 = arith.divf %384, %385 : vector<2x32xf32>
    %387 = vector.extract_strided_slice %380 {offsets = [0, 32], sizes = [2, 32], strides = [1, 1]} : vector<2x128xf32> to vector<2x32xf32>
    %388 = arith.negf %387 : vector<2x32xf32>
    %389 = math.exp %388 : vector<2x32xf32>
    %cst_101 = arith.constant 1.000000e+00 : f32
    %390 = vector.broadcast %cst_101 : f32 to vector<2x32xf32>
    %391 = arith.addf %390, %389 : vector<2x32xf32>
    %392 = arith.divf %390, %391 : vector<2x32xf32>
    %393 = vector.extract_strided_slice %380 {offsets = [0, 64], sizes = [2, 32], strides = [1, 1]} : vector<2x128xf32> to vector<2x32xf32>
    %394 = math.tanh %393 : vector<2x32xf32>
    %395 = vector.extract_strided_slice %380 {offsets = [0, 96], sizes = [2, 32], strides = [1, 1]} : vector<2x128xf32> to vector<2x32xf32>
    %396 = arith.negf %395 : vector<2x32xf32>
    %397 = math.exp %396 : vector<2x32xf32>
    %cst_102 = arith.constant 1.000000e+00 : f32
    %398 = vector.broadcast %cst_102 : f32 to vector<2x32xf32>
    %399 = arith.addf %398, %397 : vector<2x32xf32>
    %400 = arith.divf %398, %399 : vector<2x32xf32>
    %401 = arith.mulf %392, %338 : vector<2x32xf32>
    %402 = arith.mulf %386, %394 : vector<2x32xf32>
    %403 = arith.addf %401, %402 : vector<2x32xf32>
    %404 = math.tanh %403 : vector<2x32xf32>
    %405 = arith.mulf %400, %404 : vector<2x32xf32>
    %406 = vector.extract_strided_slice %37 {offsets = [8, 0], sizes = [2, 1], strides = [1, 1]} : vector<14x1xf32> to vector<2x1xf32>
    %cst_103 = arith.constant 5.000000e-01 : f32
    %407 = vector.broadcast %cst_103 : f32 to vector<2x1xf32>
    %408 = arith.cmpf ogt, %406, %407 : vector<2x1xf32>
    %409 = vector.shape_cast %408 : vector<2x1xi1> to vector<2x1xi1>
    %410 = vector.broadcast %409 : vector<2x1xi1> to vector<2x32xi1>
    %411 = arith.select %410, %405, %335 : vector<2x32xi1>, vector<2x32xf32>
    %412 = vector.shape_cast %408 : vector<2x1xi1> to vector<2x1xi1>
    %413 = vector.broadcast %412 : vector<2x1xi1> to vector<2x32xi1>
    %414 = arith.select %413, %403, %338 : vector<2x32xi1>, vector<2x32xf32>
    %415 = vector.broadcast %406 : vector<2x1xf32> to vector<2x16xf32>
    %416 = arith.mulf %415, %371 : vector<2x16xf32>
    %417 = arith.addf %341, %416 : vector<2x16xf32>
    %c8 = arith.constant 8 : index
    %c0_104 = arith.constant 0 : index
    %418 = vector.load %arg21[%c8, %c0_104] : memref<14x32xf32, #tpu.memory_space<vmem>>, vector<2x32xf32>
    tpu.vector_store %arg21[%c8, %c0_104], %405 {strides = array<i32>} : memref<14x32xf32, #tpu.memory_space<vmem>>, vector<2x32xf32>,
    %cst_105 = arith.constant dense<0.000000e+00> : vector<2x192xf32>
    %419 = tpu.matmul %411, %34, %cst_105 {dimension_numbers = #tpu.dot_dimension_numbers<[1], [0], [0], [1], [0, 0, 1, 1], [], []>} : vector<2x32xf32>, vector<32x192xf32>, vector<2x192xf32> -> vector<2x192xf32>
    %420 = vector.broadcast %35 : vector<1x192xf32> to vector<2x192xf32>
    %421 = arith.addf %419, %420 : vector<2x192xf32>
    %422 = vector.extract_strided_slice %421 {offsets = [0, 0], sizes = [2, 32], strides = [1, 1]} : vector<2x192xf32> to vector<2x32xf32>
    %423 = vector.extract_strided_slice %421 {offsets = [0, 32], sizes = [2, 32], strides = [1, 1]} : vector<2x192xf32> to vector<2x32xf32>
    %424 = arith.negf %423 : vector<2x32xf32>
    %425 = math.exp %424 : vector<2x32xf32>
    %cst_106 = arith.constant 1.000000e+00 : f32
    %426 = vector.broadcast %cst_106 : f32 to vector<2x32xf32>
    %427 = arith.addf %426, %425 : vector<2x32xf32>
    %428 = arith.divf %426, %427 : vector<2x32xf32>
    %429 = vector.extract_strided_slice %421 {offsets = [0, 64], sizes = [2, 128], strides = [1, 1]} : vector<2x192xf32> to vector<2x128xf32>
    %430 = vector.shape_cast %422 : vector<2x32xf32> to vector<2x1x32xf32>
    %431 = vector.broadcast %430 : vector<2x1x32xf32> to vector<2x16x32xf32>
    %432 = arith.addf %26, %431 : vector<2x16x32xf32>
    %cst_107 = arith.constant 0.000000e+00 : f32
    %433 = vector.broadcast %cst_107 : f32 to vector<2x16x32xf32>
    %434 = arith.maximumf %432, %433 : vector<2x16x32xf32>
    %435 = vector.shape_cast %27 : vector<1x32xf32> to vector<1x1x32xf32>
    %436 = vector.broadcast %435 : vector<1x1x32xf32> to vector<2x16x32xf32>
    %437 = arith.mulf %434, %436 : vector<2x16x32xf32>
    %cst_108 = arith.constant dense<0.000000e+00> : vector<2x16xf32>
    %438 = vector.multi_reduction <add>, %437, %cst_108 [2] : vector<2x16x32xf32> to vector<2x16xf32>
    %cst_109 = arith.constant dense<0xFF800000> : vector<2xf32>
    %439 = vector.multi_reduction <maximumf>, %438, %cst_109 [1] : vector<2x16xf32> to vector<2xf32>
    %440 = vector.shape_cast %439 : vector<2xf32> to vector<2x1xf32>
    %441 = vector.broadcast %440 : vector<2x1xf32> to vector<2x16xf32>
    %442 = arith.subf %438, %441 : vector<2x16xf32>
    %443 = math.exp %442 : vector<2x16xf32>
    %cst_110 = arith.constant dense<0.000000e+00> : vector<2xf32>
    %444 = vector.multi_reduction <add>, %443, %cst_110 [1] : vector<2x16xf32> to vector<2xf32>
    %445 = vector.shape_cast %444 : vector<2xf32> to vector<2x1xf32>
    %446 = vector.broadcast %445 : vector<2x1xf32> to vector<2x16xf32>
    %447 = arith.divf %443, %446 : vector<2x16xf32>
    %448 = vector.shape_cast %447 : vector<2x16xf32> to vector<2x16x1xf32>
    %449 = vector.broadcast %448 : vector<2x16x1xf32> to vector<2x16x32xf32>
    %450 = arith.mulf %449, %10 : vector<2x16x32xf32>
    %cst_111 = arith.constant dense<0.000000e+00> : vector<2x32xf32>
    %451 = vector.multi_reduction <add>, %450, %cst_111 [1] : vector<2x16x32xf32> to vector<2x32xf32>
    %452 = arith.mulf %428, %451 : vector<2x32xf32>
    %453 = vector.extract_strided_slice %33 {offsets = [10, 0], sizes = [2, 128], strides = [1, 1]} : vector<14x128xf32> to vector<2x128xf32>
    %cst_112 = arith.constant dense<0.000000e+00> : vector<2x128xf32>
    %454 = tpu.matmul %452, %36, %cst_112 {dimension_numbers = #tpu.dot_dimension_numbers<[1], [0], [0], [1], [0, 0, 1, 1], [], []>} : vector<2x32xf32>, vector<32x128xf32>, vector<2x128xf32> -> vector<2x128xf32>
    %455 = arith.addf %453, %454 : vector<2x128xf32>
    %456 = arith.addf %455, %429 : vector<2x128xf32>
    %457 = vector.extract_strided_slice %456 {offsets = [0, 0], sizes = [2, 32], strides = [1, 1]} : vector<2x128xf32> to vector<2x32xf32>
    %458 = arith.negf %457 : vector<2x32xf32>
    %459 = math.exp %458 : vector<2x32xf32>
    %cst_113 = arith.constant 1.000000e+00 : f32
    %460 = vector.broadcast %cst_113 : f32 to vector<2x32xf32>
    %461 = arith.addf %460, %459 : vector<2x32xf32>
    %462 = arith.divf %460, %461 : vector<2x32xf32>
    %463 = vector.extract_strided_slice %456 {offsets = [0, 32], sizes = [2, 32], strides = [1, 1]} : vector<2x128xf32> to vector<2x32xf32>
    %464 = arith.negf %463 : vector<2x32xf32>
    %465 = math.exp %464 : vector<2x32xf32>
    %cst_114 = arith.constant 1.000000e+00 : f32
    %466 = vector.broadcast %cst_114 : f32 to vector<2x32xf32>
    %467 = arith.addf %466, %465 : vector<2x32xf32>
    %468 = arith.divf %466, %467 : vector<2x32xf32>
    %469 = vector.extract_strided_slice %456 {offsets = [0, 64], sizes = [2, 32], strides = [1, 1]} : vector<2x128xf32> to vector<2x32xf32>
    %470 = math.tanh %469 : vector<2x32xf32>
    %471 = vector.extract_strided_slice %456 {offsets = [0, 96], sizes = [2, 32], strides = [1, 1]} : vector<2x128xf32> to vector<2x32xf32>
    %472 = arith.negf %471 : vector<2x32xf32>
    %473 = math.exp %472 : vector<2x32xf32>
    %cst_115 = arith.constant 1.000000e+00 : f32
    %474 = vector.broadcast %cst_115 : f32 to vector<2x32xf32>
    %475 = arith.addf %474, %473 : vector<2x32xf32>
    %476 = arith.divf %474, %475 : vector<2x32xf32>
    %477 = arith.mulf %468, %414 : vector<2x32xf32>
    %478 = arith.mulf %462, %470 : vector<2x32xf32>
    %479 = arith.addf %477, %478 : vector<2x32xf32>
    %480 = math.tanh %479 : vector<2x32xf32>
    %481 = arith.mulf %476, %480 : vector<2x32xf32>
    %482 = vector.extract_strided_slice %37 {offsets = [10, 0], sizes = [2, 1], strides = [1, 1]} : vector<14x1xf32> to vector<2x1xf32>
    %cst_116 = arith.constant 5.000000e-01 : f32
    %483 = vector.broadcast %cst_116 : f32 to vector<2x1xf32>
    %484 = arith.cmpf ogt, %482, %483 : vector<2x1xf32>
    %485 = vector.shape_cast %484 : vector<2x1xi1> to vector<2x1xi1>
    %486 = vector.broadcast %485 : vector<2x1xi1> to vector<2x32xi1>
    %487 = arith.select %486, %481, %411 : vector<2x32xi1>, vector<2x32xf32>
    %488 = vector.shape_cast %484 : vector<2x1xi1> to vector<2x1xi1>
    %489 = vector.broadcast %488 : vector<2x1xi1> to vector<2x32xi1>
    %490 = arith.select %489, %479, %414 : vector<2x32xi1>, vector<2x32xf32>
    %491 = vector.broadcast %482 : vector<2x1xf32> to vector<2x16xf32>
    %492 = arith.mulf %491, %447 : vector<2x16xf32>
    %493 = arith.addf %417, %492 : vector<2x16xf32>
    %c10 = arith.constant 10 : index
    %c0_117 = arith.constant 0 : index
    %494 = vector.load %arg21[%c10, %c0_117] : memref<14x32xf32, #tpu.memory_space<vmem>>, vector<2x32xf32>
    tpu.vector_store %arg21[%c10, %c0_117], %481 {strides = array<i32>} : memref<14x32xf32, #tpu.memory_space<vmem>>, vector<2x32xf32>,
    %cst_118 = arith.constant dense<0.000000e+00> : vector<2x192xf32>
    %495 = tpu.matmul %487, %34, %cst_118 {dimension_numbers = #tpu.dot_dimension_numbers<[1], [0], [0], [1], [0, 0, 1, 1], [], []>} : vector<2x32xf32>, vector<32x192xf32>, vector<2x192xf32> -> vector<2x192xf32>
    %496 = vector.broadcast %35 : vector<1x192xf32> to vector<2x192xf32>
    %497 = arith.addf %495, %496 : vector<2x192xf32>
    %498 = vector.extract_strided_slice %497 {offsets = [0, 0], sizes = [2, 32], strides = [1, 1]} : vector<2x192xf32> to vector<2x32xf32>
    %499 = vector.extract_strided_slice %497 {offsets = [0, 32], sizes = [2, 32], strides = [1, 1]} : vector<2x192xf32> to vector<2x32xf32>
    %500 = arith.negf %499 : vector<2x32xf32>
    %501 = math.exp %500 : vector<2x32xf32>
    %cst_119 = arith.constant 1.000000e+00 : f32
    %502 = vector.broadcast %cst_119 : f32 to vector<2x32xf32>
    %503 = arith.addf %502, %501 : vector<2x32xf32>
    %504 = arith.divf %502, %503 : vector<2x32xf32>
    %505 = vector.extract_strided_slice %497 {offsets = [0, 64], sizes = [2, 128], strides = [1, 1]} : vector<2x192xf32> to vector<2x128xf32>
    %506 = vector.shape_cast %498 : vector<2x32xf32> to vector<2x1x32xf32>
    %507 = vector.broadcast %506 : vector<2x1x32xf32> to vector<2x16x32xf32>
    %508 = arith.addf %26, %507 : vector<2x16x32xf32>
    %cst_120 = arith.constant 0.000000e+00 : f32
    %509 = vector.broadcast %cst_120 : f32 to vector<2x16x32xf32>
    %510 = arith.maximumf %508, %509 : vector<2x16x32xf32>
    %511 = vector.shape_cast %27 : vector<1x32xf32> to vector<1x1x32xf32>
    %512 = vector.broadcast %511 : vector<1x1x32xf32> to vector<2x16x32xf32>
    %513 = arith.mulf %510, %512 : vector<2x16x32xf32>
    %cst_121 = arith.constant dense<0.000000e+00> : vector<2x16xf32>
    %514 = vector.multi_reduction <add>, %513, %cst_121 [2] : vector<2x16x32xf32> to vector<2x16xf32>
    %cst_122 = arith.constant dense<0xFF800000> : vector<2xf32>
    %515 = vector.multi_reduction <maximumf>, %514, %cst_122 [1] : vector<2x16xf32> to vector<2xf32>
    %516 = vector.shape_cast %515 : vector<2xf32> to vector<2x1xf32>
    %517 = vector.broadcast %516 : vector<2x1xf32> to vector<2x16xf32>
    %518 = arith.subf %514, %517 : vector<2x16xf32>
    %519 = math.exp %518 : vector<2x16xf32>
    %cst_123 = arith.constant dense<0.000000e+00> : vector<2xf32>
    %520 = vector.multi_reduction <add>, %519, %cst_123 [1] : vector<2x16xf32> to vector<2xf32>
    %521 = vector.shape_cast %520 : vector<2xf32> to vector<2x1xf32>
    %522 = vector.broadcast %521 : vector<2x1xf32> to vector<2x16xf32>
    %523 = arith.divf %519, %522 : vector<2x16xf32>
    %524 = vector.shape_cast %523 : vector<2x16xf32> to vector<2x16x1xf32>
    %525 = vector.broadcast %524 : vector<2x16x1xf32> to vector<2x16x32xf32>
    %526 = arith.mulf %525, %10 : vector<2x16x32xf32>
    %cst_124 = arith.constant dense<0.000000e+00> : vector<2x32xf32>
    %527 = vector.multi_reduction <add>, %526, %cst_124 [1] : vector<2x16x32xf32> to vector<2x32xf32>
    %528 = arith.mulf %504, %527 : vector<2x32xf32>
    %529 = vector.extract_strided_slice %33 {offsets = [12, 0], sizes = [2, 128], strides = [1, 1]} : vector<14x128xf32> to vector<2x128xf32>
    %cst_125 = arith.constant dense<0.000000e+00> : vector<2x128xf32>
    %530 = tpu.matmul %528, %36, %cst_125 {dimension_numbers = #tpu.dot_dimension_numbers<[1], [0], [0], [1], [0, 0, 1, 1], [], []>} : vector<2x32xf32>, vector<32x128xf32>, vector<2x128xf32> -> vector<2x128xf32>
    %531 = arith.addf %529, %530 : vector<2x128xf32>
    %532 = arith.addf %531, %505 : vector<2x128xf32>
    %533 = vector.extract_strided_slice %532 {offsets = [0, 0], sizes = [2, 32], strides = [1, 1]} : vector<2x128xf32> to vector<2x32xf32>
    %534 = arith.negf %533 : vector<2x32xf32>
    %535 = math.exp %534 : vector<2x32xf32>
    %cst_126 = arith.constant 1.000000e+00 : f32
    %536 = vector.broadcast %cst_126 : f32 to vector<2x32xf32>
    %537 = arith.addf %536, %535 : vector<2x32xf32>
    %538 = arith.divf %536, %537 : vector<2x32xf32>
    %539 = vector.extract_strided_slice %532 {offsets = [0, 32], sizes = [2, 32], strides = [1, 1]} : vector<2x128xf32> to vector<2x32xf32>
    %540 = arith.negf %539 : vector<2x32xf32>
    %541 = math.exp %540 : vector<2x32xf32>
    %cst_127 = arith.constant 1.000000e+00 : f32
    %542 = vector.broadcast %cst_127 : f32 to vector<2x32xf32>
    %543 = arith.addf %542, %541 : vector<2x32xf32>
    %544 = arith.divf %542, %543 : vector<2x32xf32>
    %545 = vector.extract_strided_slice %532 {offsets = [0, 64], sizes = [2, 32], strides = [1, 1]} : vector<2x128xf32> to vector<2x32xf32>
    %546 = math.tanh %545 : vector<2x32xf32>
    %547 = vector.extract_strided_slice %532 {offsets = [0, 96], sizes = [2, 32], strides = [1, 1]} : vector<2x128xf32> to vector<2x32xf32>
    %548 = arith.negf %547 : vector<2x32xf32>
    %549 = math.exp %548 : vector<2x32xf32>
    %cst_128 = arith.constant 1.000000e+00 : f32
    %550 = vector.broadcast %cst_128 : f32 to vector<2x32xf32>
    %551 = arith.addf %550, %549 : vector<2x32xf32>
    %552 = arith.divf %550, %551 : vector<2x32xf32>
    %553 = arith.mulf %544, %490 : vector<2x32xf32>
    %554 = arith.mulf %538, %546 : vector<2x32xf32>
    %555 = arith.addf %553, %554 : vector<2x32xf32>
    %556 = math.tanh %555 : vector<2x32xf32>
    %557 = arith.mulf %552, %556 : vector<2x32xf32>
    %558 = vector.extract_strided_slice %37 {offsets = [12, 0], sizes = [2, 1], strides = [1, 1]} : vector<14x1xf32> to vector<2x1xf32>
    %559 = vector.broadcast %558 : vector<2x1xf32> to vector<2x16xf32>
    %560 = arith.mulf %559, %523 : vector<2x16xf32>
    %561 = arith.addf %493, %560 : vector<2x16xf32>
    %c12 = arith.constant 12 : index
    %c0_129 = arith.constant 0 : index
    %562 = vector.load %arg21[%c12, %c0_129] : memref<14x32xf32, #tpu.memory_space<vmem>>, vector<2x32xf32>
    tpu.vector_store %arg21[%c12, %c0_129], %557 {strides = array<i32>} : memref<14x32xf32, #tpu.memory_space<vmem>>, vector<2x32xf32>,
    %c0_130 = arith.constant 0 : index
    %c0_131 = arith.constant 0 : index
    %563 = vector.load %arg21[%c0_130, %c0_131] : memref<14x32xf32, #tpu.memory_space<vmem>>, vector<14x32xf32>
    %c0_132 = arith.constant 0 : index
    %c0_133 = arith.constant 0 : index
    %564 = vector.load %arg17[%c0_132, %c0_133] : memref<32x128xf32, #tpu.memory_space<vmem>>, vector<32x128xf32>
    %cst_134 = arith.constant dense<0.000000e+00> : vector<14x128xf32>
    %565 = tpu.matmul %563, %564, %cst_134 {dimension_numbers = #tpu.dot_dimension_numbers<[1], [0], [0], [1], [0, 0, 1, 1], [], []>} : vector<14x32xf32>, vector<32x128xf32>, vector<14x128xf32> -> vector<14x128xf32>
    %c0_135 = arith.constant 0 : index
    %c0_136 = arith.constant 0 : index
    %566 = vector.load %arg18[%c0_135, %c0_136] : memref<1x128xf32, #tpu.memory_space<vmem>>, vector<1x128xf32>
    %567 = vector.broadcast %566 : vector<1x128xf32> to vector<14x128xf32>
    %568 = arith.addf %565, %567 : vector<14x128xf32>
    %569 = vector.broadcast %37 : vector<14x1xf32> to vector<14x128xf32>
    %570 = arith.mulf %568, %569 : vector<14x128xf32>
    %c0_137 = arith.constant 0 : index
    %c0_138 = arith.constant 0 : index
    %571 = vector.load %arg19[%c0_137, %c0_138] : memref<14x128xf32, #tpu.memory_space<vmem>>, vector<14x128xf32>
    tpu.vector_store %arg19[%c0_137, %c0_138], %570 {strides = array<i32>} : memref<14x128xf32, #tpu.memory_space<vmem>>, vector<14x128xf32>,
    %572 = tpu.iota {dimensions = array<i32: 1>} : vector<14x128xi32>
    %c24_i32 = arith.constant 24 : i32
    %573 = vector.broadcast %c24_i32 : i32 to vector<14x128xi32>
    %574 = arith.cmpi slt, %572, %573 : vector<14x128xi32>
    %cst_139 = arith.constant -1.000000e+30 : f32
    %575 = vector.broadcast %cst_139 : f32 to vector<14x128xf32>
    %576 = arith.select %574, %570, %575 : vector<14x128xi1>, vector<14x128xf32>
    %cst_140 = arith.constant dense<0xFF800000> : vector<14xf32>
    %577 = vector.multi_reduction <maximumf>, %576, %cst_140 [1] : vector<14x128xf32> to vector<14xf32>
    %578 = vector.shape_cast %577 : vector<14xf32> to vector<14x1xf32>
    %579 = vector.broadcast %578 : vector<14x1xf32> to vector<14x128xf32>
    %580 = arith.subf %576, %579 : vector<14x128xf32>
    %581 = math.exp %580 : vector<14x128xf32>
    %cst_141 = arith.constant dense<0.000000e+00> : vector<14xf32>
    %582 = vector.multi_reduction <add>, %581, %cst_141 [1] : vector<14x128xf32> to vector<14xf32>
    %583 = vector.shape_cast %582 : vector<14xf32> to vector<14x1xf32>
    %584 = math.log %583 : vector<14x1xf32>
    %585 = arith.addf %578, %584 : vector<14x1xf32>
    %c0_142 = arith.constant 0 : index
    %c0_143 = arith.constant 0 : index
    %586 = vector.load %arg4[%c0_142, %c0_143] : memref<14x1xi32, #tpu.memory_space<vmem>>, vector<14x1xi32>
    %587 = vector.broadcast %586 : vector<14x1xi32> to vector<14x128xi32>
    %588 = arith.cmpi eq, %572, %587 : vector<14x128xi32>
    %cst_144 = arith.constant 0.000000e+00 : f32
    %589 = vector.broadcast %cst_144 : f32 to vector<14x128xf32>
    %590 = arith.select %588, %570, %589 : vector<14x128xi1>, vector<14x128xf32>
    %cst_145 = arith.constant dense<0.000000e+00> : vector<14xf32>
    %591 = vector.multi_reduction <add>, %590, %cst_145 [1] : vector<14x128xf32> to vector<14xf32>
    %592 = vector.shape_cast %591 : vector<14xf32> to vector<14x1xf32>
    %593 = arith.subf %585, %592 : vector<14x1xf32>
    %594 = arith.mulf %593, %37 : vector<14x1xf32>
    %595 = vector.shape_cast %594 : vector<14x1xf32> to vector<1x14x1xf32>
    %cst_146 = arith.constant dense<0.000000e+00> : vector<1xf32>
    %596 = vector.multi_reduction <add>, %595, %cst_146 [1, 2] : vector<1x14x1xf32> to vector<1xf32>
    %597 = vector.shape_cast %596 : vector<1xf32> to vector<1x1x1xf32>
    %598 = vector.extract %597[0, 0, 0] : f32 from vector<1x1x1xf32>
    %599 = vector.shape_cast %37 : vector<14x1xf32> to vector<1x14x1xf32>
    %cst_147 = arith.constant dense<0.000000e+00> : vector<1xf32>
    %600 = vector.multi_reduction <add>, %599, %cst_147 [1, 2] : vector<1x14x1xf32> to vector<1xf32>
    %601 = vector.shape_cast %600 : vector<1xf32> to vector<1x1x1xf32>
    %602 = vector.extract %601[0, 0, 0] : f32 from vector<1x1x1xf32>
    %cst_148 = arith.constant 1.000000e+00 : f32
    %603 = arith.maximumf %602, %cst_148 : f32
    %604 = arith.divf %598, %603 : f32
    %cst_149 = arith.constant 1.000000e+00 : f32
    %605 = vector.broadcast %cst_149 : f32 to vector<2x16xf32>
    %606 = arith.subf %605, %561 : vector<2x16xf32>
    %607 = arith.mulf %606, %606 : vector<2x16xf32>
    %608 = vector.shape_cast %607 : vector<2x16xf32> to vector<1x2x16xf32>
    %cst_150 = arith.constant dense<0.000000e+00> : vector<1xf32>
    %609 = vector.multi_reduction <add>, %608, %cst_150 [1, 2] : vector<1x2x16xf32> to vector<1xf32>
    %610 = vector.shape_cast %609 : vector<1xf32> to vector<1x1x1xf32>
    %611 = vector.extract %610[0, 0, 0] : f32 from vector<1x1x1xf32>
    %cst_151 = arith.constant 3.200000e+01 : f32
    %612 = arith.divf %611, %cst_151 : f32
    %cst_152 = arith.constant 1.000000e+00 : f32
    %613 = arith.mulf %cst_152, %612 : f32
    %614 = arith.addf %604, %613 : f32
    %615 = vector.broadcast %614 : f32 to vector<1x1xf32>
    %c0_153 = arith.constant 0 : index
    %c0_154 = arith.constant 0 : index
    %616 = vector.load %arg20[%c0_153, %c0_154] : memref<1x1xf32, #tpu.memory_space<vmem>>, vector<1x1xf32>
    tpu.vector_store %arg20[%c0_153, %c0_154], %615 {strides = array<i32>} : memref<1x1xf32, #tpu.memory_space<vmem>>, vector<1x1xf32>,
    return
  }
}

</mosaic_0001>

<bundles_post_ra>
// kernel: tpu_custom_call.1
= control target key start
LH: loop header
LB: loop body
LE: loop exit
PB: predicated region body
PF: predicated region fallthrough
CT: control target
= control target key end

     0   :  { %s7264_s0 = inlined_call_operand.vmem [shape: f32[512,3], index: 0, kind: input, shape index: {}]   ;;  %s7265_s1 = inlined_call_operand.vmem [shape: f32[32,512], index: 1, kind: input, shape index: {}]   ;;  %s7266_s2 = inlined_call_operand.vmem [shape: f32[14,16], index: 2, kind: input, shape index: {}]   ;;  %s7267_s3 = inlined_call_operand.vmem [shape: f32[14,1], index: 3, kind: input, shape index: {}]   ;;  %s7268_s4 = inlined_call_operand.vmem [shape: s32[14,1], index: 4, kind: input, shape index: {}]   ;;  %s7269_s5 = inlined_call_operand.vmem [shape: f32[3,32], index: 5, kind: input, shape index: {}]   ;;  %s7270_s6 = inlined_call_operand.vmem [shape: f32[1,32], index: 6, kind: input, shape index: {}]   ;;  %s7271_s7 = inlined_call_operand.vmem [shape: f32[32,64], index: 7, kind: input, shape index: {}]   ;;  %s7272_s8 = inlined_call_operand.vmem [shape: f32[1,64], index: 8, kind: input, shape index: {}]   ;;  %s7273_s9 = inlined_call_operand.vmem [shape: f32[32,32], index: 9, kind: input, shape index: {}]   ;;  %s7274_s10 = inlined_call_operand.vmem [shape: f32[1,32], index: 10, kind: input, shape index: {}]   ;;  %s7275_s11 = inlined_call_operand.vmem [shape: f32[32,192], index: 11, kind: input, shape index: {}]   ;;  %s7276_s12 = inlined_call_operand.vmem [shape: f32[1,192], index: 12, kind: input, shape index: {}]   ;;  %s7277_s13 = inlined_call_operand.vmem [shape: f32[1,32], index: 13, kind: input, shape index: {}]   ;;  %s7278_s14 = inlined_call_operand.vmem [shape: f32[32,128], index: 14, kind: input, shape index: {}]   ;;  %s7279_s15 = inlined_call_operand.vmem [shape: f32[16,128], index: 15, kind: input, shape index: {}]   ;;  %s7280_s16 = inlined_call_operand.vmem [shape: f32[1,128], index: 16, kind: input, shape index: {}]   ;;  %s7281_s17 = inlined_call_operand.vmem [shape: f32[32,128], index: 17, kind: input, shape index: {}]   ;;  %s7282_s18 = inlined_call_operand.vmem [shape: f32[1,128], index: 18, kind: input, shape index: {}]   ;;  %s7283_s19 = inlined_call_operand.hbm [shape: f32[14,128], index: 19, kind: output, shape index: {0}]   ;;  %s7284_s20 = inlined_call_operand.hbm [shape: f32[1,1], index: 20, kind: output, shape index: {1}]  }
   0x1   :  { %7304 = sst [smem:[#allocation14_spill]] %s7264_s0 }
   0x2   :  { %7305 = sst [smem:[#allocation15_spill]] %s7265_s1 }
   0x3   :  { %7306 = sst [smem:[#allocation16_spill]] %s7266_s2 }
   0x4   :  { %7307 = sst [smem:[#allocation17_spill]] %s7267_s3 }
   0x5   :  { %7308 = sst [smem:[#allocation18_spill]] %s7268_s4 }
   0x6   :  { %26 = vsyncpa [#allocation4], 0  ;;  %v130_v0 = vld [vmem:[%s7269_s5] sm:$0x7]  ;;  %vm331_vm0 = vcmask 1042432   ;;  %s7309_s2 = sld [smem:[#allocation14_spill]] }
   0x7   :  { %vm138_vm1 = vcmask 23552   ;;  %4979 = vmatprep.subr.msk.mxu0 %vm331_vm0, %v130_v0 }
   0x8   :  { %4980 = vmatpush3.msk.msra.mxu0 %vm331_vm0, %v130_v0 }
   0xc   :  { %v66_v1 = vld [vmem:[%s7309_s2] sm:$0xff]  ;;  %v67_v2 = vld [vmem:[%s7309_s2 + $0x8] sm:$0xff]  ;;  %v68_v3 = vld [vmem:[%s7309_s2 + $0x10] sm:$0xff] }
   0xd   :  { %4981 = vmatprep.mubr.msk.f32.mxu0 %vm138_vm1, %v66_v1  ;;  %v69_v4 = vld [vmem:[%s7309_s2 + $0x18] sm:$0xff]  ;;  %v70_v5 = vld [vmem:[%s7309_s2 + $0x20] sm:$0xff]  ;;  %v71_v6 = vld [vmem:[%s7309_s2 + $0x28] sm:$0xff] }
   0xe   :  { %4982 = vmatmul.mubr.msk.f32.vlgmr.msra.gmra.mrb[0].mxu0 %vm138_vm1, %v67_v2  ;;  %v72_v7 = vld [vmem:[%s7309_s2 + $0x30] sm:$0xff]  ;;  %v73_v8 = vld [vmem:[%s7309_s2 + $0x38] sm:$0xff]  ;;  %v74_v9 = vld [vmem:[%s7309_s2 + $0x40] sm:$0xff] }
   0xf   :  { %4984 = vmatprep.mubr.msk.f32.mxu0 %vm138_vm1, %v68_v3  ;;  %v75_v10 = vld [vmem:[%s7309_s2 + $0x48] sm:$0xff]  ;;  %v76_v11 = vld [vmem:[%s7309_s2 + $0x50] sm:$0xff]  ;;  %v77_v12 = vld [vmem:[%s7309_s2 + $0x58] sm:$0xff] }
  0x10   :  { %v78_v13 = vld [vmem:[%s7309_s2 + $0x60] sm:$0xff] }
  0x12   :  { %4985 = vmatmul.mubr.msk.f32.gmra.mrb[2].mxu0 %vm138_vm1, %v69_v4 }
  0x13   :  { %4987 = vmatprep.mubr.msk.f32.mxu0 %vm138_vm1, %v70_v5 }
  0x16   :  { %4988 = vmatmul.mubr.msk.f32.gmra.mrb[4].mxu0 %vm138_vm1, %v71_v6 }
  0x17   :  { %4990 = vmatprep.mubr.msk.f32.mxu0 %vm138_vm1, %v72_v7 }
  0x1a   :  { %4991 = vmatmul.mubr.msk.f32.gmra.mrb[6].mxu0 %vm138_vm1, %v73_v8 }
  0x1b   :  { %4993 = vmatprep.mubr.msk.f32.mxu0 %vm138_vm1, %v74_v9 }
  0x1e   :  { %4994 = vmatmul.mubr.msk.f32.gmra.mrb[8].mxu0 %vm138_vm1, %v75_v10 }
  0x1f   :  { %4996 = vmatprep.mubr.msk.f32.mxu0 %vm138_vm1, %v76_v11 }
  0x20   :  { %27 = vsyncpa [#allocation6], 0  ;;  %v79_v14 = vld [vmem:[%s7309_s2 + $0x68] sm:$0xff]  ;;  %v80_v15 = vld [vmem:[%s7309_s2 + $0x70] sm:$0xff]  ;;  %s7310_s30 = sld [smem:[#allocation15_spill]]  ;;  %vm5639_vm2 = vmmov 0  }
  0x21   :  { %v81_v16 = vld [vmem:[%s7309_s2 + $0x78] sm:$0xff]  ;;  %v82_v17 = vld [vmem:[%s7309_s2 + $0x80] sm:$0xff]  ;;  %v83_v18 = vld [vmem:[%s7309_s2 + $0x88] sm:$0xff]  ;;  %vm970_vm3 = vcmask 261120   ;;  %vm1005_vm4 = vcmask 1041409   ;;  %s7311_s5 = sld [smem:[#allocation16_spill]] }
  0x22   :  { %4997 = vmatmul.mubr.msk.f32.gmra.mrb[10].mxu0 %vm138_vm1, %v77_v12  ;;  %v84_v19 = vld [vmem:[%s7309_s2 + $0x90] sm:$0xff]  ;;  %v85_v20 = vld [vmem:[%s7309_s2 + $0x98] sm:$0xff]  ;;  %v86_v21 = vld [vmem:[%s7309_s2 + $0xa0] sm:$0xff]  ;;  %vm1199_vm5 = vcmask 130048   ;;  %vm1465_vm6 = vcmask 130112   ;;  %vm1478_vm7 = vcmask 123904  }
  0x23   :  { %4999 = vmatprep.mubr.msk.f32.mxu0 %vm138_vm1, %v78_v13  ;;  %v87_v22 = vld [vmem:[%s7309_s2 + $0xa8] sm:$0xff]  ;;  %v88_v23 = vld [vmem:[%s7309_s2 + $0xb0] sm:$0xff]  ;;  %v89_v24 = vld [vmem:[%s7309_s2 + $0xb8] sm:$0xff]  ;;  %s5645_s28 = smov 64   ;;  %vm1691_vm8 = vcmask 523264   ;;  %s7315_s0 = sld [smem:[#allocation17_spill]] }
  0x24   :  { %v90_v25 = vld [vmem:[%s7309_s2 + $0xc0] sm:$0xff]  ;;  %v91_v26 = vld [vmem:[%s7309_s2 + $0xc8] sm:$0xff]  ;;  %v92_v27 = vld [vmem:[%s7309_s2 + $0xd0] sm:$0xff]  ;;  %vm3089_vm11 = vcmask 1047559   ;;  %vm2195_vm14 = vcmask 1043459   ;;  %vm2642_vm15 = vcmask 1045509  }
  0x25   :  { %v93_v28 = vld [vmem:[%s7309_s2 + $0xd8] sm:$0xff]  ;;  %v94_v29 = vld [vmem:[%s7309_s2 + $0xe0] sm:$0xff]  ;;  %v95_v30 = vld [vmem:[%s7309_s2 + $0xe8] sm:$0xff]  ;;  %vm3101_vm0 = vcmask 261126  }
  0x26   :  { %5000 = vmatmul.mubr.msk.f32.gmra.mrb[12].mxu0 %vm138_vm1, %v79_v14  ;;  %v96_v31 = vld [vmem:[%s7309_s2 + $0xf0] sm:$0xff]  ;;  %v97_v32 = vld [vmem:[%s7309_s2 + $0xf8] sm:$0xff]  ;;  %v98_v33 = vld [vmem:[%s7309_s2 + $0x100] sm:$0xff] }
  0x27   :  { %5002 = vmatprep.mubr.msk.f32.mxu0 %vm138_vm1, %v80_v15  ;;  %v99_v34 = vld [vmem:[%s7309_s2 + $0x108] sm:$0xff]  ;;  %v100_v35 = vld [vmem:[%s7309_s2 + $0x110] sm:$0xff]  ;;  %v101_v36 = vld [vmem:[%s7309_s2 + $0x118] sm:$0xff] }
  0x28   :  { %v102_v37 = vld [vmem:[%s7309_s2 + $0x120] sm:$0xff]  ;;  %v103_v38 = vld [vmem:[%s7309_s2 + $0x128] sm:$0xff]  ;;  %v104_v39 = vld [vmem:[%s7309_s2 + $0x130] sm:$0xff] }
  0x29   :  { %v105_v40 = vld [vmem:[%s7309_s2 + $0x138] sm:$0xff]  ;;  %v106_v41 = vld [vmem:[%s7309_s2 + $0x140] sm:$0xff]  ;;  %v107_v42 = vld [vmem:[%s7309_s2 + $0x148] sm:$0xff] }
  0x2a   :  { %5003 = vmatmul.mubr.msk.f32.gmra.mrb[14].mxu0 %vm138_vm1, %v81_v16  ;;  %v108_v43 = vld [vmem:[%s7309_s2 + $0x150] sm:$0xff]  ;;  %v109_v44 = vld [vmem:[%s7309_s2 + $0x158] sm:$0xff]  ;;  %v110_v45 = vld [vmem:[%s7309_s2 + $0x160] sm:$0xff] }
  0x2b   :  { %5005 = vmatprep.mubr.msk.f32.mxu0 %vm138_vm1, %v82_v17  ;;  %v111_v46 = vld [vmem:[%s7309_s2 + $0x168] sm:$0xff]  ;;  %v112_v47 = vld [vmem:[%s7309_s2 + $0x170] sm:$0xff]  ;;  %v113_v48 = vld [vmem:[%s7309_s2 + $0x178] sm:$0xff] }
  0x2c   :  { %v114_v49 = vld [vmem:[%s7309_s2 + $0x180] sm:$0xff]  ;;  %v115_v50 = vld [vmem:[%s7309_s2 + $0x188] sm:$0xff]  ;;  %v116_v51 = vld [vmem:[%s7309_s2 + $0x190] sm:$0xff] }
  0x2d   :  { %v117_v52 = vld [vmem:[%s7309_s2 + $0x198] sm:$0xff]  ;;  %v118_v53 = vld [vmem:[%s7309_s2 + $0x1a0] sm:$0xff]  ;;  %v119_v54 = vld [vmem:[%s7309_s2 + $0x1a8] sm:$0xff] }
  0x2e   :  { %5006 = vmatmul.mubr.msk.f32.gmra.mrb[16].mxu0 %vm138_vm1, %v83_v18  ;;  %v120_v55 = vld [vmem:[%s7309_s2 + $0x1b0] sm:$0xff]  ;;  %v121_v56 = vld [vmem:[%s7309_s2 + $0x1b8] sm:$0xff]  ;;  %v122_v57 = vld [vmem:[%s7309_s2 + $0x1c0] sm:$0xff] }
  0x2f   :  { %5008 = vmatprep.mubr.msk.f32.mxu0 %vm138_vm1, %v84_v19  ;;  %v123_v58 = vld [vmem:[%s7309_s2 + $0x1c8] sm:$0xff]  ;;  %v124_v59 = vld [vmem:[%s7309_s2 + $0x1d0] sm:$0xff]  ;;  %v125_v60 = vld [vmem:[%s7309_s2 + $0x1d8] sm:$0xff] }
  0x30   :  { %v126_v61 = vld [vmem:[%s7309_s2 + $0x1e0] sm:$0xff]  ;;  %v127_v62 = vld [vmem:[%s7309_s2 + $0x1e8] sm:$0xff]  ;;  %v128_v63 = vld [vmem:[%s7309_s2 + $0x1f0] sm:$0xff] }
  0x31   :  { %v129_v0 = vld [vmem:[%s7309_s2 + $0x1f8] sm:$0xff]  ;;  %v785_v1 = vld [vmem:[%s7310_s30 + $0x8] sm:$0xff]  ;;  %v6021_v2 = vld [vmem:[%s7270_s6] ss:$0 sm:$0xff] }
  0x32   :  { %5009 = vmatmul.mubr.msk.f32.gmra.mrb[18].mxu0 %vm138_vm1, %v85_v20  ;;  %864 = vmatprep.mubr.f32.mxu1 %v785_v1 }
  0x33   :  { %5011 = vmatprep.mubr.msk.f32.mxu0 %vm138_vm1, %v86_v21 }
  0x36   :  { %5012 = vmatmul.mubr.msk.f32.gmra.mrb[20].mxu0 %vm138_vm1, %v87_v22 }
  0x37   :  { %5014 = vmatprep.mubr.msk.f32.mxu0 %vm138_vm1, %v88_v23 }
  0x3a   :  { %5015 = vmatmul.mubr.msk.f32.gmra.mrb[22].mxu0 %vm138_vm1, %v89_v24 }
  0x3b   :  { %5017 = vmatprep.mubr.msk.f32.mxu0 %vm138_vm1, %v90_v25 }
  0x3e   :  { %5018 = vmatmul.mubr.msk.f32.gmra.mrb[24].mxu0 %vm138_vm1, %v91_v26 }
  0x3f   :  { %5020 = vmatprep.mubr.msk.f32.mxu0 %vm138_vm1, %v92_v27 }
  0x42   :  { %5021 = vmatmul.mubr.msk.f32.gmra.mrb[26].mxu0 %vm138_vm1, %v93_v28 }
  0x43   :  { %5023 = vmatprep.mubr.msk.f32.mxu0 %vm138_vm1, %v94_v29 }
  0x46   :  { %5024 = vmatmul.mubr.msk.f32.gmra.mrb[28].mxu0 %vm138_vm1, %v95_v30 }
  0x47   :  { %5026 = vmatprep.mubr.msk.f32.mxu0 %vm138_vm1, %v96_v31 }
  0x4a   :  { %5027 = vmatmul.mubr.msk.f32.gmra.mrb[30].mxu0 %vm138_vm1, %v97_v32 }
  0x4b   :  { %5029 = vmatprep.mubr.msk.f32.mxu0 %vm138_vm1, %v98_v33 }
  0x4e   :  { %5030 = vmatmul.mubr.msk.f32.gmra.mrb[32].mxu0 %vm138_vm1, %v99_v34 }
  0x4f   :  { %5032 = vmatprep.mubr.msk.f32.mxu0 %vm138_vm1, %v100_v35 }
  0x52   :  { %5033 = vmatmul.mubr.msk.f32.gmra.mrb[34].mxu0 %vm138_vm1, %v101_v36 }
  0x53   :  { %5035 = vmatprep.mubr.msk.f32.mxu0 %vm138_vm1, %v102_v37 }
  0x56   :  { %5036 = vmatmul.mubr.msk.f32.gmra.mrb[36].mxu0 %vm138_vm1, %v103_v38 }
  0x57   :  { %5038 = vmatprep.mubr.msk.f32.mxu0 %vm138_vm1, %v104_v39 }
  0x5a   :  { %5039 = vmatmul.mubr.msk.f32.gmra.mrb[38].mxu0 %vm138_vm1, %v105_v40 }
  0x5b   :  { %5041 = vmatprep.mubr.msk.f32.mxu0 %vm138_vm1, %v106_v41 }
  0x5e   :  { %5042 = vmatmul.mubr.msk.f32.gmra.mrb[40].mxu0 %vm138_vm1, %v107_v42 }
  0x5f   :  { %5044 = vmatprep.mubr.msk.f32.mxu0 %vm138_vm1, %v108_v43 }
  0x62   :  { %5045 = vmatmul.mubr.msk.f32.gmra.mrb[42].mxu0 %vm138_vm1, %v109_v44 }
  0x63   :  { %5047 = vmatprep.mubr.msk.f32.mxu0 %vm138_vm1, %v110_v45 }
  0x66   :  { %5048 = vmatmul.mubr.msk.f32.gmra.mrb[44].mxu0 %vm138_vm1, %v111_v46 }
  0x67   :  { %5050 = vmatprep.mubr.msk.f32.mxu0 %vm138_vm1, %v112_v47 }
  0x6a   :  { %5051 = vmatmul.mubr.msk.f32.gmra.mrb[46].mxu0 %vm138_vm1, %v113_v48 }
  0x6b   :  { %5053 = vmatprep.mubr.msk.f32.mxu0 %vm138_vm1, %v114_v49 }
  0x6e   :  { %5054 = vmatmul.mubr.msk.f32.gmra.mrb[48].mxu0 %vm138_vm1, %v115_v50 }
  0x6f   :  { %5056 = vmatprep.mubr.msk.f32.mxu0 %vm138_vm1, %v116_v51 }
  0x72   :  { %5057 = vmatmul.mubr.msk.f32.gmra.mrb[50].mxu0 %vm138_vm1, %v117_v52 }
  0x73   :  { %5059 = vmatprep.mubr.msk.f32.mxu0 %vm138_vm1, %v118_v53 }
  0x76   :  { %5060 = vmatmul.mubr.msk.f32.gmra.mrb[52].mxu0 %vm138_vm1, %v119_v54 }
  0x77   :  { %5062 = vmatprep.mubr.msk.f32.mxu0 %vm138_vm1, %v120_v55 }
  0x7a   :  { %5063 = vmatmul.mubr.msk.f32.gmra.mrb[54].mxu0 %vm138_vm1, %v121_v56 }
  0x7b   :  { %5065 = vmatprep.mubr.msk.f32.mxu0 %vm138_vm1, %v122_v57 }
  0x7e   :  { %5066 = vmatmul.mubr.msk.f32.gmra.mrb[56].mxu0 %vm138_vm1, %v123_v58 }
  0x7f   :  { %5068 = vmatprep.mubr.msk.f32.mxu0 %vm138_vm1, %v124_v59 }
  0x82   :  { %5069 = vmatmul.mubr.msk.f32.gmra.mrb[58].mxu0 %vm138_vm1, %v125_v60 }
  0x83   :  { %5071 = vmatprep.mubr.msk.f32.mxu0 %vm138_vm1, %v126_v61 }
  0x86   :  { %5072 = vmatmul.mubr.msk.f32.gmra.mrb[60].mxu0 %vm138_vm1, %v127_v62 }
  0x87   :  { %5074 = vmatprep.mubr.msk.f32.mxu0 %vm138_vm1, %v128_v63 }
  0x8a   :  { %5075 = vmatmul.mubr.msk.f32.gmra.mrb[62].mxu0 %vm138_vm1, %v129_v0  ;;  %vm2207_vm1 = vcmask 257026  }
  0xe1   :  { %v4983_v3 = vpop.f32.mrb[0].mxu0 }
  0xe2   :  { %v407_v4 = vadd.f32 %v4983_v3, %v6021_v2  ;;  %v401_v5 = vpop.f32.mrb[1].mxu0 }
  0xe3   :  { %v402_v6 = vadd.f32 %v6021_v2, %v401_v5 }
  0xe4   :  { %v721_v7 = vmax.f32 %v407_v4, 0.0 }
  0xe5   :  { %v720_v8 = vmax.f32 %v402_v6, 0.0  ;;  %v4986_v9 = vpop.f32.mrb[2].mxu0 }
  0xe6   :  { %v417_v10 = vadd.f32 %v4986_v9, %v6021_v2  ;;  %v411_v11 = vpop.f32.mrb[3].mxu0 }
  0xe7   :  { %v412_v12 = vadd.f32 %v6021_v2, %v411_v11  ;;  %v5199_v13 = vpack.c.bf16 %v721_v7, %v720_v8 }
  0xe8   :  { %v723_v14 = vmax.f32 %v417_v10, 0.0 }
  0xe9   :  { %v722_v15 = vmax.f32 %v412_v12, 0.0  ;;  %v4989_v16 = vpop.f32.mrb[4].mxu0 }
  0xea   :  { %v427_v17 = vadd.f32 %v4989_v16, %v6021_v2  ;;  %v421_v18 = vpop.f32.mrb[5].mxu0 }
  0xeb   :  { %v6028_v19 = vpack.c.bf16 %v723_v14, %v722_v15  ;;  %v422_v20 = vadd.f32 %v6021_v2, %v421_v18 }
  0xec   :  { %v725_v21 = vmax.f32 %v427_v17, 0.0 }
  0xed   :  { %v724_v22 = vmax.f32 %v422_v20, 0.0  ;;  %v4992_v23 = vpop.f32.mrb[6].mxu0 }
  0xee   :  { %v437_v24 = vadd.f32 %v4992_v23, %v6021_v2  ;;  %v431_v25 = vpop.f32.mrb[7].mxu0 }
  0xef   :  { %v6032_v26 = vpack.c.bf16 %v725_v21, %v724_v22  ;;  %v432_v27 = vadd.f32 %v6021_v2, %v431_v25 }
  0xf0   :  { %v727_v28 = vmax.f32 %v437_v24, 0.0 }
  0xf1   :  { %v726_v29 = vmax.f32 %v432_v27, 0.0  ;;  %v4995_v30 = vpop.f32.mrb[8].mxu0 }
  0xf2   :  { %v447_v31 = vadd.f32 %v4995_v30, %v6021_v2  ;;  %v441_v32 = vpop.f32.mrb[9].mxu0 }
  0xf3   :  { %v6036_v33 = vpack.c.bf16 %v727_v28, %v726_v29  ;;  %v442_v34 = vadd.f32 %v6021_v2, %v441_v32 }
  0xf4   :  { %v729_v35 = vmax.f32 %v447_v31, 0.0 }
  0xf5   :  { %v728_v36 = vmax.f32 %v442_v34, 0.0  ;;  %v4998_v37 = vpop.f32.mrb[10].mxu0 }
  0xf6   :  { %v457_v38 = vadd.f32 %v4998_v37, %v6021_v2  ;;  %v451_v39 = vpop.f32.mrb[11].mxu0 }
  0xf7   :  { %v6040_v40 = vpack.c.bf16 %v729_v35, %v728_v36  ;;  %v452_v41 = vadd.f32 %v6021_v2, %v451_v39 }
  0xf8   :  { %v731_v42 = vmax.f32 %v457_v38, 0.0 }
  0xf9   :  { %v730_v43 = vmax.f32 %v452_v41, 0.0  ;;  %v5001_v44 = vpop.f32.mrb[12].mxu0 }
  0xfa   :  { %v467_v45 = vadd.f32 %v5001_v44, %v6021_v2  ;;  %v461_v46 = vpop.f32.mrb[13].mxu0 }
  0xfb   :  { %v6044_v47 = vpack.c.bf16 %v731_v42, %v730_v43  ;;  %v462_v48 = vadd.f32 %v6021_v2, %v461_v46 }
  0xfc   :  { %v733_v49 = vmax.f32 %v467_v45, 0.0 }
  0xfd   :  { %v732_v50 = vmax.f32 %v462_v48, 0.0  ;;  %v5004_v51 = vpop.f32.mrb[14].mxu0 }
  0xfe   :  { %v477_v52 = vadd.f32 %v5004_v51, %v6021_v2  ;;  %v471_v53 = vpop.f32.mrb[15].mxu0 }
  0xff   :  { %v6048_v54 = vpack.c.bf16 %v733_v49, %v732_v50  ;;  %v472_v55 = vadd.f32 %v6021_v2, %v471_v53 }
 0x100   :  { %v735_v56 = vmax.f32 %v477_v52, 0.0 }
 0x101   :  { %v734_v57 = vmax.f32 %v472_v55, 0.0  ;;  %v5007_v58 = vpop.f32.mrb[16].mxu0 }
 0x102   :  { %v487_v59 = vadd.f32 %v5007_v58, %v6021_v2  ;;  %v481_v60 = vpop.f32.mrb[17].mxu0 }
 0x103   :  { %v6052_v61 = vpack.c.bf16 %v735_v56, %v734_v57  ;;  %v482_v62 = vadd.f32 %v6021_v2, %v481_v60 }
 0x104   :  { %v737_v63 = vmax.f32 %v487_v59, 0.0 }
 0x105   :  { %v736_v0 = vmax.f32 %v482_v62, 0.0  ;;  %v5010_v1 = vpop.f32.mrb[18].mxu0 }
 0x106   :  { %v497_v3 = vadd.f32 %v5010_v1, %v6021_v2  ;;  %v491_v4 = vpop.f32.mrb[19].mxu0  ;;  %v789_v1 = vld [vmem:[%s7310_s30 + $0x28] sm:$0xff] }
 0x107   :  { %v492_v5 = vadd.f32 %v6021_v2, %v491_v4  ;;  %v5197_v6 = vpack.c.bf16 %v737_v63, %v736_v0  ;;  %v784_v63 = vld [vmem:[%s7310_s30] sm:$0xff] }
 0x108   :  { %v739_v7 = vmax.f32 %v497_v3, 0.0 }
 0x109   :  { %v738_v8 = vmax.f32 %v492_v5, 0.0  ;;  %v5013_v9 = vpop.f32.mrb[20].mxu0  ;;  %5198 = vmatprep.subr.bf16.mxu1 %v5197_v6 }
 0x10a   :  { %v507_v10 = vadd.f32 %v5013_v9, %v6021_v2  ;;  %v501_v11 = vpop.f32.mrb[21].mxu0  ;;  %5200 = vmatpush3.bf16.msra.mxu1 %v5199_v13 }
 0x10b   :  { %v5201_v12 = vpack.c.bf16 %v739_v7, %v738_v8  ;;  %v502_v14 = vadd.f32 %v6021_v2, %v501_v11 }
 0x10c   :  { %v741_v15 = vmax.f32 %v507_v10, 0.0  ;;  %v793_v10 = vld [vmem:[%s7310_s30 + $0x48] sm:$0xff] }
 0x10d   :  { %v740_v16 = vmax.f32 %v502_v14, 0.0  ;;  %v5016_v17 = vpop.f32.mrb[22].mxu0  ;;  %5202 = vmatprep.subr.bf16.mxu1 %v5201_v12 }
 0x10e   :  { %v517_v18 = vadd.f32 %v5016_v17, %v6021_v2  ;;  %v511_v20 = vpop.f32.mrb[23].mxu0  ;;  %5204 = vmatpush3.bf16.msra.mxu1 %v6028_v19  ;;  %v792_v17 = vld [vmem:[%s7310_s30 + $0x40] sm:$0xff] }
 0x10f   :  { %v5205_v21 = vpack.c.bf16 %v741_v15, %v740_v16  ;;  %v512_v22 = vadd.f32 %v6021_v2, %v511_v20 }
 0x110   :  { %v743_v23 = vmax.f32 %v517_v18, 0.0 }
 0x111   :  { %v742_v24 = vmax.f32 %v512_v22, 0.0  ;;  %v5019_v25 = vpop.f32.mrb[24].mxu0  ;;  %5206 = vmatprep.subr.bf16.mxu1 %v5205_v21  ;;  %v797_v21 = vld [vmem:[%s7310_s30 + $0x68] sm:$0xff] }
 0x112   :  { %v527_v13 = vadd.f32 %v5019_v25, %v6021_v2  ;;  %v521_v27 = vpop.f32.mrb[25].mxu0  ;;  %5208 = vmatpush3.bf16.msra.mxu1 %v6032_v26 }
 0x113   :  { %v5209_v28 = vpack.c.bf16 %v743_v23, %v742_v24  ;;  %v522_v29 = vadd.f32 %v6021_v2, %v521_v27  ;;  %v796_v27 = vld [vmem:[%s7310_s30 + $0x60] sm:$0xff] }
 0x114   :  { %v745_v30 = vmax.f32 %v527_v13, 0.0 }
 0x115   :  { %v744_v31 = vmax.f32 %v522_v29, 0.0  ;;  %v5022_v32 = vpop.f32.mrb[26].mxu0  ;;  %5210 = vmatprep.subr.bf16.mxu1 %v5209_v28 }
 0x116   :  { %v537_v19 = vadd.f32 %v5022_v32, %v6021_v2  ;;  %v531_v34 = vpop.f32.mrb[27].mxu0  ;;  %5212 = vmatpush3.bf16.msra.mxu1 %v6036_v33 }
 0x117   :  { %v5213_v35 = vpack.c.bf16 %v745_v30, %v744_v31  ;;  %v532_v36 = vadd.f32 %v6021_v2, %v531_v34  ;;  %v787_v30 = vld [vmem:[%s7310_s30 + $0x18] sm:$0xff] }
 0x118   :  { %v747_v37 = vmax.f32 %v537_v19, 0.0 }
 0x119   :  { %v746_v38 = vmax.f32 %v532_v36, 0.0  ;;  %v5025_v39 = vpop.f32.mrb[28].mxu0  ;;  %5214 = vmatprep.subr.bf16.mxu1 %v5213_v35 }
 0x11a   :  { %v547_v26 = vadd.f32 %v5025_v39, %v6021_v2  ;;  %v541_v41 = vpop.f32.mrb[29].mxu0  ;;  %5216 = vmatpush3.bf16.msra.mxu1 %v6040_v40 }
 0x11b   :  { %v5217_v42 = vpack.c.bf16 %v747_v37, %v746_v38  ;;  %v542_v43 = vadd.f32 %v6021_v2, %v541_v41 }
 0x11c   :  { %v749_v44 = vmax.f32 %v547_v26, 0.0 }
 0x11d   :  { %v748_v45 = vmax.f32 %v542_v43, 0.0  ;;  %v5028_v46 = vpop.f32.mrb[30].mxu0  ;;  %5218 = vmatprep.subr.bf16.mxu1 %v5217_v42 }
 0x11e   :  { %v557_v33 = vadd.f32 %v5028_v46, %v6021_v2  ;;  %v551_v48 = vpop.f32.mrb[31].mxu0  ;;  %5220 = vmatpush3.bf16.msra.mxu1 %v6044_v47 }
 0x11f   :  { %v5221_v49 = vpack.c.bf16 %v749_v44, %v748_v45  ;;  %v552_v50 = vadd.f32 %v6021_v2, %v551_v48 }
 0x120   :  { %v751_v51 = vmax.f32 %v557_v33, 0.0 }
 0x121   :  { %v750_v52 = vmax.f32 %v552_v50, 0.0  ;;  %v5031_v53 = vpop.f32.mrb[32].mxu0  ;;  %5222 = vmatprep.subr.bf16.mxu1 %v5221_v49 }
 0x122   :  { %v567_v40 = vadd.f32 %v5031_v53, %v6021_v2  ;;  %v561_v55 = vpop.f32.mrb[33].mxu0  ;;  %5224 = vmatpush3.bf16.msra.mxu1 %v6048_v54 }
 0x123   :  { %v5225_v56 = vpack.c.bf16 %v751_v51, %v750_v52  ;;  %v562_v57 = vadd.f32 %v6021_v2, %v561_v55 }
 0x124   :  { %v753_v58 = vmax.f32 %v567_v40, 0.0 }
 0x125   :  { %v752_v59 = vmax.f32 %v562_v57, 0.0  ;;  %v5034_v60 = vpop.f32.mrb[34].mxu0  ;;  %5226 = vmatprep.subr.bf16.mxu1 %v5225_v56 }
 0x126   :  { %v577_v47 = vadd.f32 %v5034_v60, %v6021_v2  ;;  %v571_v62 = vpop.f32.mrb[35].mxu0  ;;  %5228 = vmatpush3.bf16.msra.mxu1 %v6052_v61  ;;  %v788_v61 = vld [vmem:[%s7310_s30 + $0x20] sm:$0xff] }
 0x127   :  { %v6082_v0 = vpack.c.bf16 %v753_v58, %v752_v59  ;;  %v572_v54 = vadd.f32 %v6021_v2, %v571_v62 }
 0x128   :  { %v755_v3 = vmax.f32 %v577_v47, 0.0 }
 0x129   :  { %v754_v4 = vmax.f32 %v572_v54, 0.0  ;;  %v5037_v5 = vpop.f32.mrb[36].mxu0  ;;  %865 = vmatmul.mubr.f32.vlgmr.msra.gmra.mrb[0].mxu1 %v784_v63 }
 0x12a   :  { %v587_v6 = vadd.f32 %v5037_v5, %v6021_v2  ;;  %v581_v7 = vpop.f32.mrb[37].mxu0  ;;  %869 = vmatprep.mubr.f32.mxu1 %v789_v1 }
 0x12b   :  { %v6092_v8 = vpack.c.bf16 %v755_v3, %v754_v4  ;;  %v582_v9 = vadd.f32 %v6021_v2, %v581_v7 }
 0x12c   :  { %v757_v11 = vmax.f32 %v587_v6, 0.0 }
 0x12d   :  { %v756_v12 = vmax.f32 %v582_v9, 0.0  ;;  %v5040_v14 = vpop.f32.mrb[38].mxu0  ;;  %870 = vmatmul.mubr.f32.gmra.mrb[2].mxu1 %v788_v61 }
 0x12e   :  { %v597_v15 = vadd.f32 %v5040_v14, %v6021_v2  ;;  %v591_v16 = vpop.f32.mrb[39].mxu0  ;;  %874 = vmatprep.mubr.f32.mxu1 %v793_v10 }
 0x12f   :  { %v6102_v18 = vpack.c.bf16 %v757_v11, %v756_v12  ;;  %v592_v20 = vadd.f32 %v6021_v2, %v591_v16 }
 0x130   :  { %v759_v22 = vmax.f32 %v597_v15, 0.0 }
 0x131   :  { %v758_v23 = vmax.f32 %v592_v20, 0.0  ;;  %v5043_v24 = vpop.f32.mrb[40].mxu0  ;;  %875 = vmatmul.mubr.f32.gmra.mrb[4].mxu1 %v792_v17 }
 0x132   :  { %v607_v25 = vadd.f32 %v5043_v24, %v6021_v2  ;;  %v601_v13 = vpop.f32.mrb[41].mxu0  ;;  %879 = vmatprep.mubr.f32.mxu1 %v797_v21 }
 0x133   :  { %v6112_v28 = vpack.c.bf16 %v759_v22, %v758_v23  ;;  %v602_v29 = vadd.f32 %v6021_v2, %v601_v13 }
 0x134   :  { %v761_v31 = vmax.f32 %v607_v25, 0.0 }
 0x135   :  { %v760_v32 = vmax.f32 %v602_v29, 0.0  ;;  %v5046_v19 = vpop.f32.mrb[42].mxu0  ;;  %880 = vmatmul.mubr.f32.gmra.mrb[6].mxu1 %v796_v27 }
 0x136   :  { %v617_v34 = vadd.f32 %v5046_v19, %v6021_v2  ;;  %v611_v35 = vpop.f32.mrb[43].mxu0  ;;  %949 = vmatprep.mubr.f32.mxu1 %v787_v30 }
 0x137   :  { %v6119_v36 = vpack.c.bf16 %v761_v31, %v760_v32  ;;  %v612_v37 = vadd.f32 %v6021_v2, %v611_v35 }
 0x138   :  { %v763_v38 = vmax.f32 %v617_v34, 0.0 }
 0x139   :  { %v762_v39 = vmax.f32 %v612_v37, 0.0  ;;  %v5049_v26 = vpop.f32.mrb[44].mxu0 }
 0x13a   :  { %v627_v41 = vadd.f32 %v5049_v26, %v6021_v2  ;;  %v621_v42 = vpop.f32.mrb[45].mxu0 }
 0x13b   :  { %v6123_v43 = vpack.c.bf16 %v763_v38, %v762_v39  ;;  %v622_v44 = vadd.f32 %v6021_v2, %v621_v42 }
 0x13c   :  { %v765_v45 = vmax.f32 %v627_v41, 0.0 }
 0x13d   :  { %v764_v46 = vmax.f32 %v622_v44, 0.0  ;;  %v5052_v33 = vpop.f32.mrb[46].mxu0 }
 0x13e   :  { %v637_v48 = vadd.f32 %v5052_v33, %v6021_v2  ;;  %v631_v49 = vpop.f32.mrb[47].mxu0 }
 0x13f   :  { %v6127_v50 = vpack.c.bf16 %v765_v45, %v764_v46  ;;  %v632_v51 = vadd.f32 %v6021_v2, %v631_v49  ;;  %v786_v49 = vld [vmem:[%s7310_s30 + $0x10] sm:$0xff] }
 0x140   :  { %v767_v52 = vmax.f32 %v637_v48, 0.0 }
 0x141   :  { %v766_v53 = vmax.f32 %v632_v51, 0.0  ;;  %v5055_v40 = vpop.f32.mrb[48].mxu0  ;;  %v794_v51 = vld [vmem:[%s7310_s30 + $0x50] sm:$0xff] }
 0x142   :  { %v647_v55 = vadd.f32 %v5055_v40, %v6021_v2  ;;  %v641_v56 = vpop.f32.mrb[49].mxu0  ;;  %v992_v40 = vld [vmem:[%s7271_s7] sm:$0xff] }
 0x143   :  { %v6131_v57 = vpack.c.bf16 %v767_v52, %v766_v53  ;;  %v642_v58 = vadd.f32 %v6021_v2, %v641_v56  ;;  %v799_v52 = vld [vmem:[%s7310_s30 + $0x78] sm:$0xff]  ;;  %v798_v53 = vld [vmem:[%s7310_s30 + $0x70] sm:$0xff] }
 0x144   :  { %v769_v59 = vmax.f32 %v647_v55, 0.0  ;;  %v993_v55 = vld [vmem:[%s7271_s7 + $0x8] sm:$0xff]  ;;  %v994_v56 = vld [vmem:[%s7271_s7 + $0x10] sm:$0xff] }
 0x145   :  { %v768_v60 = vmax.f32 %v642_v58, 0.0  ;;  %v5058_v47 = vpop.f32.mrb[50].mxu0  ;;  %v5262_v58 = vpack.c.bf16 %v993_v55, %v992_v40 }
 0x146   :  { %v657_v62 = vadd.f32 %v5058_v47, %v6021_v2  ;;  %v651_v63 = vpop.f32.mrb[51].mxu0  ;;  %v1079_v47 = vld [vmem:[%s7273_s9] sm:$0xff] }
 0x147   :  { %v5229_v54 = vpack.c.bf16 %v769_v59, %v768_v60  ;;  %v652_v1 = vadd.f32 %v6021_v2, %v651_v63  ;;  %v995_v59 = vld [vmem:[%s7271_s7 + $0x18] sm:$0xff]  ;;  %v7294_v60 = vmov 0.0  }
 0x148   :  { %v771_v3 = vmax.f32 %v657_v62, 0.0  ;;  %v1080_v62 = vld [vmem:[%s7273_s9 + $0x8] sm:$0xff]  ;;  %2279 = vmatprep.mubr.f32.mxu0 %v7294_v60  ;;  %v5265_v63 = vpack.c.bf16 %v995_v59, %v994_v56  ;;  %v1081_v56 = vld [vmem:[%s7273_s9 + $0x10] sm:$0xff] }
 0x149   :  { %v770_v4 = vmax.f32 %v652_v1, 0.0  ;;  %v5061_v5 = vpop.f32.mrb[52].mxu0  ;;  %5230 = vmatprep.subr.bf16.mxu1 %v5229_v54  ;;  %v6200_v54 = vpack.c.bf16 %v1080_v62, %v1079_v47  ;;  %v1282_v1 = vld [vmem:[%s7275_s11 + $0x8] sm:$0xff] }
 0x14a   :  { %v667_v6 = vadd.f32 %v5061_v5, %v6021_v2  ;;  %v661_v7 = vpop.f32.mrb[53].mxu0  ;;  %5232 = vmatpush3.bf16.msra.mxu1 %v6082_v0 }
 0x14b   :  { %v5233_v61 = vpack.c.bf16 %v771_v3, %v770_v4  ;;  %v662_v9 = vadd.f32 %v6021_v2, %v661_v7  ;;  %v1284_v3 = vld [vmem:[%s7275_s11 + $0x18] sm:$0xff]  ;;  %v1281_v4 = vld [vmem:[%s7275_s11] sm:$0xff]  ;;  %v1286_v7 = vld [vmem:[%s7275_s11 + $0x28] sm:$0xff] }
 0x14c   :  { %v773_v10 = vmax.f32 %v667_v6, 0.0  ;;  %v6212_v5 = vpack.c.bf16 %v1284_v3, %v1282_v1  ;;  %v1283_v6 = vld [vmem:[%s7275_s11 + $0x10] sm:$0xff]  ;;  %v1190_v1 = vld [vmem:[%s7279_s15] sm:$0xff]  ;;  %v1191_v3 = vld [vmem:[%s7279_s15 + $0x8] sm:$0xff] }
 0x14d   :  { %v772_v11 = vmax.f32 %v662_v9, 0.0  ;;  %v5064_v12 = vpop.f32.mrb[54].mxu0  ;;  %5234 = vmatprep.subr.bf16.mxu1 %v5233_v61  ;;  %v1288_v61 = vld [vmem:[%s7275_s11 + $0x38] sm:$0xff]  ;;  %v6223_v9 = vpack.c.bf16 %v1283_v6, %v1281_v4  ;;  %v5275_v4 = vpack.c.bf16 %v1191_v3, %v1190_v1  ;;  %v1188_v6 = vld [vmem:[%s7311_s5] sm:$0xff] }
 0x14e   :  { %v677_v14 = vadd.f32 %v5064_v12, %v6021_v2  ;;  %v671_v15 = vpop.f32.mrb[55].mxu0  ;;  %5236 = vmatpush3.bf16.msra.mxu1 %v6092_v8  ;;  %5308 = vmatprep.subr.bf16.mxu0 %v6212_v5 }
 0x14f   :  { %v5237_v16 = vpack.c.bf16 %v773_v10, %v772_v11  ;;  %v672_v17 = vadd.f32 %v6021_v2, %v671_v15  ;;  %v6225_v10 = vpack.c.bf16 %v1288_v61, %v1286_v7  ;;  %5310 = vmatpush1.bf16.msra.mxu0 %v6223_v9  ;;  %v1285_v7 = vld [vmem:[%s7275_s11 + $0x20] sm:$0xff]  ;;  %v1287_v61 = vld [vmem:[%s7275_s11 + $0x30] sm:$0xff] }
 0x150   :  { %v775_v20 = vmax.f32 %v677_v14, 0.0 }
 0x151   :  { %v774_v21 = vmax.f32 %v672_v17, 0.0  ;;  %v5067_v22 = vpop.f32.mrb[56].mxu0  ;;  %5238 = vmatprep.subr.bf16.mxu1 %v5237_v16  ;;  %5312 = vmatprep.subr.bf16.mxu0 %v6225_v10 }
 0x152   :  { %v687_v0 = vadd.f32 %v5067_v22, %v6021_v2  ;;  %v681_v23 = vpop.f32.mrb[57].mxu0  ;;  %5240 = vmatpush3.bf16.msra.mxu1 %v6102_v18 }
 0x153   :  { %v5241_v24 = vpack.c.bf16 %v775_v20, %v774_v21  ;;  %v682_v25 = vadd.f32 %v6021_v2, %v681_v23 }
 0x154   :  { %v777_v13 = vmax.f32 %v687_v0, 0.0 }
 0x155   :  { %v776_v27 = vmax.f32 %v682_v25, 0.0  ;;  %v5070_v29 = vpop.f32.mrb[58].mxu0  ;;  %5242 = vmatprep.subr.bf16.mxu1 %v5241_v24 }
 0x156   :  { %v697_v8 = vadd.f32 %v5070_v29, %v6021_v2  ;;  %v691_v30 = vpop.f32.mrb[59].mxu0  ;;  %5244 = vmatpush3.bf16.msra.mxu1 %v6112_v28 }
 0x157   :  { %v5245_v31 = vpack.c.bf16 %v777_v13, %v776_v27  ;;  %v692_v32 = vadd.f32 %v6021_v2, %v691_v30 }
 0x158   :  { %v779_v19 = vmax.f32 %v697_v8, 0.0 }
 0x159   :  { %v778_v34 = vmax.f32 %v692_v32, 0.0  ;;  %v5073_v35 = vpop.f32.mrb[60].mxu0  ;;  %5246 = vmatprep.subr.bf16.mxu1 %v5245_v31 }
 0x15a   :  { %v707_v18 = vadd.f32 %v5073_v35, %v6021_v2  ;;  %v701_v37 = vpop.f32.mrb[61].mxu0  ;;  %5248 = vmatpush3.bf16.msra.mxu1 %v6119_v36 }
 0x15b   :  { %v5249_v38 = vpack.c.bf16 %v779_v19, %v778_v34  ;;  %v702_v39 = vadd.f32 %v6021_v2, %v701_v37 }
 0x15c   :  { %v781_v26 = vmax.f32 %v707_v18, 0.0 }
 0x15d   :  { %v780_v41 = vmax.f32 %v702_v39, 0.0  ;;  %v5076_v42 = vpop.f32.mrb[62].mxu0  ;;  %5250 = vmatprep.subr.bf16.mxu1 %v5249_v38 }
 0x15e   :  { %v717_v28 = vadd.f32 %v5076_v42, %v6021_v2  ;;  %v711_v44 = vpop.f32.mrb[63].mxu0  ;;  %5252 = vmatpush3.bf16.msra.mxu1 %v6123_v43  ;;  %v791_v43 = vld [vmem:[%s7310_s30 + $0x38] sm:$0xff] }
 0x15f   :  { %v5253_v45 = vpack.c.bf16 %v781_v26, %v780_v41  ;;  %v712_v46 = vadd.f32 %v6021_v2, %v711_v44  ;;  %v790_v2 = vld [vmem:[%s7310_s30 + $0x30] sm:$0xff] }
 0x160   :  { %v783_v33 = vmax.f32 %v717_v28, 0.0 }
 0x161   :  { %v782_v48 = vmax.f32 %v712_v46, 0.0  ;;  %5254 = vmatprep.subr.bf16.mxu1 %v5253_v45 }
 0x162   :  { %5256 = vmatpush3.bf16.msra.mxu1 %v6127_v50  ;;  %v795_v50 = vld [vmem:[%s7310_s30 + $0x58] sm:$0xff] }
 0x163   :  { %v5257_v36 = vpack.c.bf16 %v783_v33, %v782_v48 }
 0x165   :  { %5258 = vmatprep.subr.bf16.mxu1 %v5257_v36 }
 0x166   :  { %5260 = vmatpush3.bf16.msra.mxu1 %v6131_v57  ;;  %v7292_v57 = vmov 0.0|0.0  }
 0x167   :  { %5261 = vmatprep.subr.bf16.mxu1 %v7292_v57 }
 0x169   :  { %950 = vmatmul.mubr.f32.vlgmr.msra.gmra.mrb[8].mxu1 %v786_v49 }
 0x16a   :  { %954 = vmatprep.mubr.f32.mxu1 %v791_v43  ;;  %5263 = vmatpush3.bf16.msra.mxu1 %v5262_v58  ;;  %v1082_v58 = vld [vmem:[%s7273_s9 + $0x18] sm:$0xff] }
 0x16b   :  { %5264 = vmatprep.subr.bf16.mxu1 %v7292_v57  ;;  %v5271_v62 = vpack.c.bf16 %v1082_v58, %v1081_v56 }
 0x16d   :  { %955 = vmatmul.mubr.f32.gmra.mrb[10].mxu1 %v790_v2 }
 0x16e   :  { %959 = vmatprep.mubr.f32.mxu1 %v795_v50  ;;  %5266 = vmatpush3.bf16.msra.mxu1 %v5265_v63 }
 0x16f   :  { %5268 = vmatprep.subr.bf16.mxu1 %v6200_v54 }
 0x171   :  { %960 = vmatmul.mubr.f32.gmra.mrb[12].mxu1 %v794_v51 }
 0x172   :  { %964 = vmatprep.mubr.f32.mxu1 %v799_v52 }
 0x175   :  { %965 = vmatmul.mubr.f32.gmra.mrb[14].mxu1 %v798_v53 }
 0x176   :  { %5085 = vmatprep.mubr.msk.f32.mxu1 %vm5639_vm2, %v7294_v60 }
 0x1fc   :  { %v4865_v11 = vpop.f32.mrb[0].mxu1 }
 0x1fd   :  { %v4866_v12 = vpop.f32.mrb[1].mxu1 }
 0x1fe   :  { %v4867_v14 = vadd.f32 %v4866_v12, %v4865_v11  ;;  %v6285_v11 = vpack.c.bf16 %v1287_v61, %v1285_v7  ;;  %v4726_v12 = vld [vmem:[%s7272_s8] ss:$0 sm:$0xff] }
 0x200   :  { %v4868_v15 = vpop.f32.mrb[2].mxu1  ;;  %5314 = vmatpush1.bf16.msra.mxu0 %v6285_v11 }
 0x201   :  { %v4869_v16 = vpop.f32.mrb[3].mxu1  ;;  %5322 = vmatprep.subr.bf16.mxu0 %v6212_v5 }
 0x202   :  { %v4870_v17 = vadd.f32 %v4869_v16, %v4868_v15 }
 0x204   :  { %v4871_v20 = vpop.f32.mrb[4].mxu1 }
 0x205   :  { %v4872_v21 = vpop.f32.mrb[5].mxu1 }
 0x206   :  { %v4873_v22 = vadd.f32 %v4872_v21, %v4871_v20 }
 0x208   :  { %v4874_v0 = vpop.f32.mrb[6].mxu1 }
 0x209   :  { %v4875_v23 = vpop.f32.mrb[7].mxu1 }
 0x20a   :  { %v4876_v24 = vadd.f32 %v4875_v23, %v4874_v0  ;;  %v6303_v0 = vld [vmem:[%s7280_s16] ss:$0 sm:$0xff] }
 0x23c   :  { %v4909_v25 = vpop.f32.mrb[8].mxu1 }
 0x23d   :  { %v4910_v13 = vpop.f32.mrb[9].mxu1 }
 0x23e   :  { %v4911_v27 = vadd.f32 %v4910_v13, %v4909_v25  ;;  %v1297_v13 = vlaneseq }
 0x240   :  { %v6230_v29 = vadd.f32 %v4911_v27, %v4867_v14  ;;  %v4912_v8 = vpop.f32.mrb[10].mxu1  ;;  %v6310_v27 = vshrl.u32 %v1297_v13, 7  ;;  %v6366_v7 = vand.u32 127, %v1297_v13 }
 0x241   :  { %v4913_v30 = vpop.f32.mrb[11].mxu1 }
 0x242   :  { %v4914_v31 = vadd.f32 %v4913_v30, %v4912_v8  ;;  %v971_v18 = vsel %vm970_vm3, %v6230_v29, 0.0  ;;  %v5641_v8 = vmov 1966171168   ;;  %7312 = vst [vmem:[#allocation9_spill] sm:$0xff] %v6366_v7  ;;  %v1460_v61 = vadd.s32 4294967288, %v6366_v7 }
 0x243   :  { %v1389_v30 = vunpack.c.l.s4 %v5641_v8 }
 0x244   :  { %v6232_v32 = vadd.f32 %v4914_v31, %v4870_v17  ;;  %v4915_v19 = vpop.f32.mrb[12].mxu1  ;;  %v6313_v31 = vsub.s32 0, %v6310_v27 }
 0x245   :  { %v4916_v34 = vpop.f32.mrb[13].mxu1 }
 0x246   :  { %v4917_v35 = vadd.f32 %v4916_v34, %v4915_v19  ;;  %v972_v37 = vsel %vm970_vm3, %v6232_v32, 0.0  ;;  %v6318_v19 = vld [vmem:[%s7276_s12] sm:$0x3]  ;;  %v1390_v34 = vunpack.c.0.s8 %v1389_v30 }
 0x247   :  { %v973_v38 = vadd.f32 %v972_v37, %v971_v18 }
 0x248   :  { %v6238_v39 = vadd.f32 %v4917_v35, %v4873_v22  ;;  %v4918_v26 = vpop.f32.mrb[14].mxu1  ;;  %v6322_v35 = vrot.slane %v6318_v19, %v6313_v31  ;;  %v6325_v18 = vsub.s32 %v1390_v34, %v6310_v27 }
 0x249   :  { %v4919_v41 = vpop.f32.mrb[15].mxu1  ;;  %v974_v42 = vrot.slane %v973_v38, 4 }
 0x24a   :  { %v4920_v28 = vadd.f32 %v4919_v41, %v4918_v26  ;;  %v980_v33 = vsel %vm970_vm3, %v6238_v39, 0.0 }
 0x24b   :  { %v975_v44 = vadd.f32 %v974_v42, %v973_v38  ;;  %v4728_v42 = vld [vmem:[%s7274_s10] ss:$0 sm:$0xff] }
 0x24c   :  { %v6240_v45 = vadd.f32 %v4920_v28, %v4876_v24 }
 0x24d   :  { %v976_v46 = vrot.slane %v975_v44, 2 }
 0x24e   :  { %v981_v48 = vsel %vm970_vm3, %v6240_v45, 0.0 }
 0x24f   :  { %v982_v36 = vadd.f32 %v981_v48, %v980_v33  ;;  %v977_v49 = vadd.f32 %v976_v46, %v975_v44 }
 0x251   :  { %v983_v43 = vrot.slane %v982_v36, 4  ;;  %v978_v50 = vrot.slane %v977_v49, 1 }
 0x253   :  { %v984_v2 = vadd.f32 %v983_v43, %v982_v36  ;;  %v979_v53 = vadd.f32 %v978_v50, %v977_v49 }
 0x255   :  { %v985_v51 = vrot.slane %v984_v2, 2  ;;  %v990_v59 = vmul.f32 0.0625, %v979_v53 }
 0x257   :  { %v986_v52 = vadd.f32 %v985_v51, %v984_v2 }
 0x259   :  { %v987_v40 = vrot.slane %v986_v52, 1 }
 0x25b   :  { %v988_v55 = vadd.f32 %v987_v40, %v986_v52  ;;  %v6354_v52 = vld [vmem:[%s7277_s13] ss:$0 sm:$0xff] }
 0x25d   :  { %v991_v47 = vmul.f32 0.0625, %v988_v55 }
 0x25f   :  { %v1006_v63 = vsel %vm1005_vm4, %v991_v47, %v990_v59 }
 0x260   :  { %5086 = vmatmul.mubr.msk.f32.vlgmr.msra.gmra.mrb[16].mxu1 %vm970_vm3, %v1006_v63 }
 0x261   :  { %5270 = vmatpush3.bf16.msra.mxu1 %v6200_v54  ;;  %5096 = vmatprep.mubr.msk.f32.mxu1 %vm970_vm3, %v6230_v29  ;;  %v1189_v54 = vld [vmem:[%s7311_s5 + $0x8] sm:$0x3f]  ;;  %s5643_s5 = smov 32  }
 0x262   :  { %5272 = vmatprep.subr.bf16.mxu1 %v5271_v62 }
 0x265   :  { %5274 = vmatpush3.bf16.msra.mxu1 %v5271_v62 }
 0x266   :  { %5276 = vmatprep.subr.bf16.mxu1 %v5275_v4 }
 0x268   :  { %5097 = vmatmul.mubr.msk.f32.vlgmr.msra.gmra.mrb[18].mxu1 %vm970_vm3, %v6232_v32 }
 0x269   :  { %5099 = vmatprep.mubr.msk.f32.mxu1 %vm970_vm3, %v6238_v39  ;;  %5278 = vmatpush3.bf16.msra.mxu1 %v5275_v4 }
 0x26a   :  { %5280 = vmatprep.subr.bf16.mxu1 %v6212_v5 }
 0x26c   :  { %5100 = vmatmul.mubr.msk.f32.gmra.mrb[20].mxu1 %vm970_vm3, %v6240_v45 }
 0x26d   :  { %5106 = vmatprep.mubr.msk.f32.mxu1 %vm1199_vm5, %v1188_v6 }
 0x270   :  { %5107 = vmatmul.mubr.msk.f32.vlgmr.msra.gmra.mrb[22].mxu1 %vm1199_vm5, %v1189_v54  ;;  %vm2654_vm5 = vcmask 259076  }
 0x271   :  { %5282 = vmatpush1.bf16.msra.mxu1 %v6223_v9  ;;  %1374 = vmatprep.mubr.f32.mxu1 %v7294_v60 }
 0x272   :  { %5284 = vmatprep.subr.bf16.mxu1 %v6225_v10 }
 0x275   :  { %5286 = vmatpush1.bf16.msra.mxu1 %v6285_v11 }
 0x276   :  { %5287 = vmatprep.subr.bf16.mxu1 %v7292_v57 }
 0x333   :  { %v1075_v14 = vpop.f32.mrb[16].mxu1 }
 0x334   :  { %v6294_v15 = vadd.f32 %v4726_v12, %v1075_v14  ;;  %v5087_v16 = vpop.f32.mrb[17].mxu1  ;;  %v6370_v14 = vsub.s32 %v1460_v61, %v6310_v27 }
 0x336   :  { %4736 = vmatmul.mubr.msk.f32.vlgmr.msra.gmra.mrb[24].mxu1 %vm970_vm3, %v6294_v15 }
 0x337   :  { %5117 = vmatprep.mubr.msk.f32.mxu1 %vm5639_vm2, %v7294_v60 }
 0x33b   :  { %v5098_v17 = vpop.f32.mrb[18].mxu1 }
 0x33c   :  { %v1168_v20 = vpop.f32.mrb[19].mxu1  ;;  %v6338_v46 = vadd.f32 %v5098_v17, %v4728_v42  ;;  %v6374_v17 = vsub.s32 %v6366_v7, %v6310_v27 }
 0x33d   :  { %v6340_v33 = vadd.f32 %v4728_v42, %v1168_v20 }
 0x33f   :  { %v5101_v21 = vpop.f32.mrb[20].mxu1 }
 0x340   :  { %v1178_v22 = vpop.f32.mrb[21].mxu1  ;;  %v6344_v49 = vadd.f32 %v5101_v21, %v4728_v42 }
 0x341   :  { %v6346_v43 = vadd.f32 %v4728_v42, %v1178_v22  ;;  %v7290_v42 = vmov 0  }
 0x342   :  { %5407 = vset.pattern.permute.xlu0 %v7290_v42  ;;  %5406 = vset.pattern.permute.xlu1 %v7290_v42 }
 0x343   :  { %v5108_v23 = vpop.f32.mrb[22].mxu1 }
 0x344   :  { %v6306_v24 = vadd.f32 %v5108_v23, %v6303_v0  ;;  %v6308_v25 = vpop.f32.mrb[23].mxu1 }
 0x409   :  { %v1376_v37 = vpop.f32.mrb[24].mxu1 }
 0x40a   :  { %v6328_v38 = vadd.f32 %v1376_v37, %v6322_v35  ;;  %v6330_v26 = vpop.f32.mrb[25].mxu1 }
 0x40c   :  { %v1394_v41 = vrot.slane %v6328_v38, %v6325_v18 }
 0x40e   :  { %v1395_v28 = vcombine.high %v1394_v41, %v1394_v41  ;;  %v1402_v44 = vrot.slane %v1394_v41, %v6325_v18 }
 0x410   :  { %v1413_v48 = vrot.slane %v1402_v44, %v6313_v31  ;;  %v1409_v36 = vrot.slane %v1395_v28, %v6325_v18  ;;  %v6387_v28 = vsub.s32 1, %v6310_v27 }
 0x412   :  { %v1420_v2 = vadd.f32 %v1413_v48, %v6340_v33  ;;  %v1417_v50 = vrot.slane %v1409_v36, %v6313_v31  ;;  %v1421_v51 = vadd.f32 %v1413_v48, %v6338_v46 }
 0x414   :  { %v1424_v53 = vmax.f32 %v1420_v2, 0.0  ;;  %v1422_v40 = vadd.f32 %v1417_v50, %v6346_v43  ;;  %v1425_v55 = vmax.f32 %v1421_v51, 0.0  ;;  %v1423_v56 = vadd.f32 %v1417_v50, %v6344_v49 }
 0x416   :  { %v1434_v58 = vmul.f32 %v6354_v52, %v1424_v53  ;;  %v1426_v59 = vmax.f32 %v1422_v40, 0.0  ;;  %v1427_v47 = vmax.f32 %v1423_v56, 0.0  ;;  %v1435_v1 = vmul.f32 %v6354_v52, %v1425_v55 }
 0x418   :  { %v1438_v62 = vsel %vm970_vm3, %v1434_v58, 0.0  ;;  %v1436_v63 = vmul.f32 %v6354_v52, %v1426_v59  ;;  %v1437_v4 = vmul.f32 %v6354_v52, %v1427_v47  ;;  %v1441_v6 = vsel %vm970_vm3, %v1435_v1, 0.0 }
 0x419   :  { %1439 = vadd.xlane.f32.xlu0 %v1438_v62 }
 0x41a   :  { %v1444_v3 = vsel %vm970_vm3, %v1436_v63, 0.0  ;;  %v1447_v54 = vsel %vm970_vm3, %v1437_v4, 0.0 }
 0x41b   :  { %1445 = vadd.xlane.f32.xlu1 %v1444_v3 }
 0x41d   :  { %1442 = vadd.xlane.f32.xlu0 %v1441_v6 }
 0x41f   :  { %1448 = vadd.xlane.f32.xlu1 %v1447_v54 }
 0x4a6   :  { %v1440_v12 = vpop.xlane.xlu0 %1439 }
 0x4a7   :  { %v1459_v23 = vrot.slane %v1440_v12, %v6374_v17 }
 0x4a8   :  { %v1446_v16 = vpop.xlane.xlu1 %1445 }
 0x4a9   :  { %v1470_v13 = vrot.slane %v1446_v16, %v6374_v17 }
 0x4aa   :  { %v1443_v20 = vpop.xlane.xlu0 %1442 }
 0x4ab   :  { %v1464_v21 = vrot.slane %v1443_v20, %v6370_v14 }
 0x4ac   :  { %v1449_v22 = vpop.xlane.xlu1 %1448 }
 0x4ad   :  { %v1474_v8 = vrot.slane %v1449_v22, %v6370_v14  ;;  %v1466_v30 = vsel %vm1465_vm6, %v1464_v21, %v1459_v23 }
 0x4af   :  { %v1475_v34 = vsel %vm1465_vm6, %v1474_v8, %v1470_v13 }
 0x4b0   :  { %v1476_v37 = vsel %vm1005_vm4, %v1475_v34, %v1466_v30 }
 0x4b1   :  { %v1479_v41 = vsel %vm1478_vm7, %v1476_v37, -inf }
 0x4b2   :  { %1480 = vmax.xlane.f32.xlu0 %v1479_v41 }
 0x53f   :  { %v1481_v44 = vpop.xlane.xlu0 %1480 }
 0x540   :  { %v1486_v48 = vrot.slane %v1481_v44, %v6313_v31  ;;  %v1490_v36 = vrot.slane %v1481_v44, %v6387_v28 }
 0x542   :  { %v1493_v2 = vsub.f32 %v1440_v12, %v1486_v48  ;;  %v1494_v50 = vsub.f32 %v1443_v20, %v1486_v48  ;;  %v1495_v51 = vsub.f32 %v1446_v16, %v1490_v36  ;;  %v1496_v55 = vsub.f32 %v1449_v22, %v1490_v36 }
 0x544   :  { %v1497_v53 = vmul.f32 1.442695, %v1493_v2  ;;  %v1499_v40 = vmul.f32 1.442695, %v1494_v50  ;;  %v1501_v56 = vmul.f32 1.442695, %v1495_v51 }
 0x545   :  { %v1503_v58 = vmul.f32 1.442695, %v1496_v55 }
 0x546   :  { %5408 = vpow2.f32 %v1497_v53 }
 0x547   :  { %5410 = vpow2.f32 %v1499_v40 }
 0x548   :  { %5412 = vpow2.f32 %v1501_v56 }
 0x549   :  { %5414 = vpow2.f32 %v1503_v58 }
 0x550   :  { %v5409_v59 = vpop.eup %5408 }
 0x551   :  { %v5411_v27 = vpop.eup %5410  ;;  %1510 = vperm.xlu1 %5406, %v5409_v59  }
 0x552   :  { %1513 = vperm.xlu0 %5407, %v5411_v27   ;;  %v5413_v47 = vpop.eup %5412 }
 0x553   :  { %v5415_v62 = vpop.eup %5414 }
 0x555   :  { %1516 = vperm.xlu1 %5406, %v5413_v47  }
 0x559   :  { %1519 = vperm.xlu1 %5406, %v5415_v62  }
 0x5d0   :  { %v1511_v63 = vpop.permute.xlu1 %1510 }
 0x5d1   :  { %v1514_v1 = vpop.permute.xlu0 %1513  ;;  %v1524_v6 = vrot.slane %v1511_v63, %v6374_v17 }
 0x5d2   :  { %v1528_v4 = vrot.slane %v1514_v1, %v6370_v14 }
 0x5d4   :  { %v1517_v3 = vpop.permute.xlu1 %1516  ;;  %v1529_v16 = vsel %vm1465_vm6, %v1528_v4, %v1524_v6 }
 0x5d5   :  { %v1533_v61 = vrot.slane %v1517_v3, %v6374_v17 }
 0x5d8   :  { %v1520_v54 = vpop.permute.xlu1 %1519 }
 0x5d9   :  { %v1537_v12 = vrot.slane %v1520_v54, %v6370_v14 }
 0x5db   :  { %v1538_v20 = vsel %vm1465_vm6, %v1537_v12, %v1533_v61 }
 0x5dc   :  { %v1539_v21 = vsel %vm1005_vm4, %v1538_v20, %v1529_v16 }
 0x5dd   :  { %v1541_v22 = vsel %vm1478_vm7, %v1539_v21, 0.0 }
 0x5de   :  { %1542 = vadd.xlane.f32.xlu1 %v1541_v22 }
 0x66b   :  { %v1543_v23 = vpop.xlane.xlu1 %1542 }
 0x66c   :  { %v1548_v13 = vrot.slane %v1543_v23, %v6313_v31  ;;  %v1552_v8 = vrot.slane %v1543_v23, %v6387_v28 }
 0x66e   :  { %5416 = vrcp.f32 %v1548_v13  ;;  %v1290_v13 = vld [vmem:[%s7278_s14] sm:$0xff] }
 0x66f   :  { %5418 = vrcp.f32 %v1552_v8  ;;  %v1291_v8 = vld [vmem:[%s7278_s14 + $0x8] sm:$0xff] }
 0x678   :  { %v5417_v30 = vpop.eup %5416 }
 0x679   :  { %v1556_v34 = vmul.f32 %v5417_v30, %v5409_v59  ;;  %v1557_v37 = vmul.f32 %v5417_v30, %v5411_v27  ;;  %v5419_v41 = vpop.eup %5418  ;;  %v1292_v30 = vld [vmem:[%s7278_s14 + $0x10] sm:$0xff] }
 0x67a   :  { %v1559_v44 = vmul.f32 %v5419_v41, %v5413_v47  ;;  %v1560_v48 = vmul.f32 %v5419_v41, %v5415_v62 }
 0x67b   :  { %1563 = vperm.xlu0 %5407, %v1556_v34   ;;  %v6430_v34 = vpack.c.bf16 %v1291_v8, %v1290_v13 }
 0x67d   :  { %5289 = vmatpush3.bf16.msra.mxu1 %v6430_v34 }
 0x67e   :  { %5290 = vmatprep.subr.bf16.mxu1 %v7292_v57 }
 0x67f   :  { %1568 = vperm.xlu0 %5407, %v1557_v37   ;;  %v1293_v37 = vld [vmem:[%s7278_s14 + $0x18] sm:$0xff]  ;;  %s5644_s14 = smov 96  }
 0x683   :  { %1573 = vperm.xlu0 %5407, %v1559_v44   ;;  %v6438_v44 = vpack.c.bf16 %v1293_v37, %v1292_v30 }
 0x685   :  { %5292 = vmatpush3.bf16.msra.mxu1 %v6438_v44 }
 0x686   :  { %5294 = vmatprep.subr.bf16.mxu1 %v6212_v5 }
 0x687   :  { %1578 = vperm.xlu0 %5407, %v1560_v48   ;;  %v4737_v48 = vmul.f32 -1.442695, %v6328_v38 }
 0x689   :  { %5420 = vpow2.f32 %v4737_v48 }
 0x6fa   :  { %v6401_v36 = vpop.permute.xlu0 %1563 }
 0x6fb   :  { %7313 = vst [vmem:[#allocation10_spill] sm:$0xff] %v6401_v36  ;;  %v1581_v2 = vmul.f32 %v6401_v36, %v6230_v29 }
 0x6fd   :  { %v1585_v53 = vsel %vm970_vm3, %v1581_v2, 0.0  ;;  %v5421_v2 = vpop.eup %5420 }
 0x6fe   :  { %v6405_v50 = vpop.permute.xlu0 %1568 }
 0x6ff   :  { %v1582_v51 = vmul.f32 %v6405_v50, %v6232_v32 }
 0x701   :  { %v1586_v40 = vsel %vm970_vm3, %v1582_v51, 0.0  ;;  %v1384_v51 = vadd.f32 1.0, %v5421_v2 }
 0x702   :  { %v1587_v55 = vadd.f32 %v1586_v40, %v1585_v53  ;;  %v6411_v56 = vpop.permute.xlu0 %1573 }
 0x703   :  { %7314 = vst [vmem:[#allocation11_spill] sm:$0xff] %v6411_v56  ;;  %v1583_v59 = vmul.f32 %v6411_v56, %v6238_v39  ;;  %5422 = vrcp.f32 %v1384_v51 }
 0x704   :  { %v1588_v58 = vrot.slane %v1587_v55, 4 }
 0x705   :  { %v1594_v63 = vsel %vm970_vm3, %v1583_v59, 0.0 }
 0x706   :  { %v1589_v27 = vadd.f32 %v1588_v58, %v1587_v55  ;;  %v6415_v47 = vpop.permute.xlu0 %1578  ;;  %v6447_v58 = vrot.slane %v6318_v19, %v6387_v28 }
 0x707   :  { %v1584_v62 = vmul.f32 %v6415_v47, %v6240_v45 }
 0x708   :  { %v1590_v4 = vrot.slane %v1589_v27, 2  ;;  %v1379_v59 = vadd.f32 %v6330_v26, %v6447_v58 }
 0x709   :  { %v1595_v1 = vsel %vm970_vm3, %v1584_v62, 0.0 }
 0x70a   :  { %v1596_v3 = vadd.f32 %v1595_v1, %v1594_v63  ;;  %v1591_v61 = vadd.f32 %v1590_v4, %v1589_v27 }
 0x70c   :  { %v1597_v6 = vrot.slane %v1596_v3, 4  ;;  %v1592_v16 = vrot.slane %v1591_v61, 1 }
 0x70d   :  { %v5423_v53 = vpop.eup %5422 }
 0x70e   :  { %v1598_v54 = vadd.f32 %v1597_v6, %v1596_v3  ;;  %v1593_v22 = vadd.f32 %v1592_v16, %v1591_v61  ;;  %v1294_v6 = vld [vmem:[%s7315_s0] sm:$0xff] }
 0x70f   :  { %vm1719_vm9 = vcmp.gt.f32.partialorder %v1294_v6, 0.5 }
 0x710   :  { %v1599_v12 = vrot.slane %v1598_v54, 2 }
 0x712   :  { %v1600_v20 = vadd.f32 %v1599_v12, %v1598_v54 }
 0x714   :  { %v1601_v21 = vrot.slane %v1600_v20, 1 }
 0x716   :  { %v1602_v23 = vadd.f32 %v1601_v21, %v1600_v20 }
 0x718   :  { %v1605_v41 = vsel %vm1005_vm4, %v1602_v23, %v1593_v22 }
 0x719   :  { %1606 = vrot.lane.b32.xlu1 %v1605_v41, %s5643_s5 }
 0x78b   :  { %v1607_v40 = vpop.permute.xlu1 %1606 }
 0x78c   :  { %v1609_v55 = vmul.f32 %v5423_v53, %v1607_v40 }
 0x78e   :  { %1611 = vrot.lane.b32.xlu0 %v1609_v55, %s5644_s14 }
 0x792   :  { %1687 = vrot.lane.b32.xlu0 %v6328_v38, %s5645_s28  ;;  %v6462_v38 = vadd.f32 %v6303_v0, %v6308_v25  ;;  %v1720_v0 = vsel %vm1719_vm9, 1, %v7290_v42  ;;  %vm4582_vm9 = vcmask 5120  }
 0x796   :  { %1689 = vrot.lane.b32.xlu0 %v1379_v59, %s5645_s28 }
 0x800   :  { %v1612_v27 = vpop.permute.xlu0 %1611 }
 0x801   :  { %5118 = vmatmul.mubr.msk.f32.vlgmr.msra.gmra.mrb[26].mxu1 %vm970_vm3, %v1612_v27 }
 0x802   :  { %5296 = vmatpush1.bf16.msra.mxu1 %v6223_v9  ;;  %1832 = vmatprep.mubr.f32.mxu1 %v7294_v60 }
 0x803   :  { %5298 = vmatprep.subr.bf16.mxu1 %v6225_v10 }
 0x804   :  { %v1688_v19 = vpop.permute.xlu0 %1687 }
 0x806   :  { %5300 = vmatpush1.bf16.msra.mxu1 %v6285_v11 }
 0x807   :  { %5301 = vmatprep.subr.bf16.mxu1 %v7292_v57 }
 0x808   :  { %v1690_v26 = vpop.permute.xlu0 %1689 }
 0x809   :  { %v1692_v3 = vsel %vm1691_vm8, %v1688_v19, %v1690_v26 }
 0x8d4   :  { %v1681_v62 = vpop.f32.mrb[26].mxu1 }
 0x8d5   :  { %v1685_v63 = vadd.f32 %v1681_v62, %v6462_v38  ;;  %v5119_v1 = vpop.f32.mrb[27].mxu1 }
 0x8d7   :  { %v1694_v4 = vadd.f32 %v1692_v3, %v1685_v63 }
 0x8d9   :  { %5424 = vtanh.f32 %v1694_v4  ;;  %v4740_v25 = vmul.f32 -1.442695, %v1694_v4 }
 0x8db   :  { %5426 = vpow2.f32 %v4740_v25 }
 0x8e3   :  { %v5425_v54 = vpop.eup %5424 }
 0x8e4   :  { %1704 = vrot.lane.b32.xlu0 %v5425_v54, %s5645_s28 }
 0x8e5   :  { %v5427_v61 = vpop.eup %5426 }
 0x8e6   :  { %v1698_v12 = vadd.f32 1.0, %v5427_v61 }
 0x8e8   :  { %1722 = vperm.xlu0 %5407, %v1720_v0   ;;  %5428 = vrcp.f32 %v1698_v12 }
 0x8ec   :  { %1725 = vrot.lane.b32.xlu0 %v6294_v15, %s5644_s14 }
 0x8f2   :  { %v5429_v16 = vpop.eup %5428 }
 0x8f3   :  { %v1702_v22 = vmul.f32 %v5429_v16, %v6294_v15 }
 0x956   :  { %v1705_v20 = vpop.permute.xlu0 %1704 }
 0x957   :  { %v1707_v21 = vmul.f32 %v5429_v16, %v1705_v20 }
 0x959   :  { %1709 = vrot.lane.b32.xlu1 %v1707_v21, %s5643_s5 }
 0x967   :  { %v6479_v30 = vpop.permute.xlu0 %1722 }
 0x968   :  { %vm1724_vm10 = vcmp.eq.s32.totalorder %v6479_v30, 1 }
 0x96b   :  { %v1726_v48 = vpop.permute.xlu0 %1725 }
 0x9cb   :  { %v1710_v23 = vpop.permute.xlu1 %1709 }
 0x9cc   :  { %v6475_v13 = vadd.f32 %v1710_v23, %v1702_v22 }
 0x9ce   :  { %5430 = vtanh.f32 %v6475_v13 }
 0x9d8   :  { %v5431_v8 = vpop.eup %5430 }
 0x9d9   :  { %1715 = vrot.lane.b32.xlu1 %v5431_v8, %s5645_s28 }
 0xa4b   :  { %v1716_v37 = vpop.permute.xlu1 %1715 }
 0xa4c   :  { %v6481_v41 = vmul.f32 %v5429_v16, %v1716_v37 }
 0xa4e   :  { %v6487_v2 = vsel %vm1724_vm10, %v6481_v41, %v1726_v48 }
 0xa4f   :  { %1764 = vrot.lane.b32.xlu1 %v6487_v2, %s5643_s5 }
 0xac1   :  { %v1765_v51 = vpop.permute.xlu1 %1764 }
 0xac2   :  { %4741 = vmatmul.mubr.msk.f32.vlgmr.msra.gmra.mrb[28].mxu1 %vm970_vm3, %v1765_v51 }
 0xac3   :  { %5303 = vmatpush3.bf16.msra.mxu1 %v6430_v34  ;;  %5128 = vmatprep.mubr.msk.f32.mxu1 %vm5639_vm2, %v7294_v60 }
 0xac4   :  { %5304 = vmatprep.subr.bf16.mxu1 %v7292_v57 }
 0xac7   :  { %5306 = vmatpush3.bf16.msra.mxu1 %v6438_v44 }
 0xac8   :  { %5315 = vmatprep.subr.bf16.mxu1 %v7292_v57 }
 0xb95   :  { %v1834_v53 = vpop.f32.mrb[28].mxu1 }
 0xb96   :  { %v6499_v40 = vadd.f32 %v1834_v53, %v6322_v35  ;;  %v6501_v55 = vpop.f32.mrb[29].mxu1 }
 0xb98   :  { %v1852_v59 = vrot.slane %v6499_v40, %v6325_v18 }
 0xb9a   :  { %v1853_v27 = vcombine.high %v1852_v59, %v1852_v59  ;;  %v1860_v19 = vrot.slane %v1852_v59, %v6325_v18 }
 0xb9c   :  { %v1871_v26 = vrot.slane %v1860_v19, %v6313_v31  ;;  %v1867_v62 = vrot.slane %v1853_v27, %v6325_v18 }
 0xb9e   :  { %v1879_v63 = vadd.f32 %v1871_v26, %v6338_v46  ;;  %v1878_v1 = vadd.f32 %v1871_v26, %v6340_v33  ;;  %v1875_v3 = vrot.slane %v1867_v62, %v6313_v31 }
 0xba0   :  { %v1883_v4 = vmax.f32 %v1879_v63, 0.0  ;;  %v1882_v6 = vmax.f32 %v1878_v1, 0.0  ;;  %v1880_v54 = vadd.f32 %v1875_v3, %v6346_v43  ;;  %v1881_v0 = vadd.f32 %v1875_v3, %v6344_v49 }
 0xba2   :  { %v1887_v25 = vmul.f32 %v6354_v52, %v1883_v4  ;;  %v1886_v61 = vmul.f32 %v6354_v52, %v1882_v6  ;;  %v1884_v12 = vmax.f32 %v1880_v54, 0.0  ;;  %v1885_v22 = vmax.f32 %v1881_v0, 0.0 }
 0xba4   :  { %v1893_v16 = vsel %vm970_vm3, %v1887_v25, 0.0  ;;  %v1890_v20 = vsel %vm970_vm3, %v1886_v61, 0.0  ;;  %v1888_v21 = vmul.f32 %v6354_v52, %v1884_v12  ;;  %v1889_v8 = vmul.f32 %v6354_v52, %v1885_v22 }
 0xba5   :  { %1894 = vadd.xlane.f32.xlu1 %v1893_v16  ;;  %1891 = vadd.xlane.f32.xlu0 %v1890_v20 }
 0xba6   :  { %v1896_v23 = vsel %vm970_vm3, %v1888_v21, 0.0  ;;  %v1899_v37 = vsel %vm970_vm3, %v1889_v8, 0.0 }
 0xba9   :  { %1897 = vadd.xlane.f32.xlu0 %v1896_v23 }
 0xbad   :  { %1900 = vadd.xlane.f32.xlu0 %v1899_v37 }
 0xc32   :  { %v1892_v48 = vpop.xlane.xlu0 %1891  ;;  %v1895_v51 = vpop.xlane.xlu1 %1894 }
 0xc33   :  { %v1913_v59 = vrot.slane %v1895_v51, %v6370_v14  ;;  %v1909_v27 = vrot.slane %v1892_v48, %v6374_v17 }
 0xc35   :  { %v1914_v63 = vsel %vm1465_vm6, %v1913_v59, %v1909_v27 }
 0xc36   :  { %v1898_v53 = vpop.xlane.xlu0 %1897 }
 0xc37   :  { %v1918_v26 = vrot.slane %v1898_v53, %v6374_v17 }
 0xc3a   :  { %v1901_v19 = vpop.xlane.xlu0 %1900 }
 0xc3b   :  { %v1922_v62 = vrot.slane %v1901_v19, %v6370_v14 }
 0xc3d   :  { %v1923_v1 = vsel %vm1465_vm6, %v1922_v62, %v1918_v26 }
 0xc3e   :  { %v1924_v3 = vsel %vm1005_vm4, %v1923_v1, %v1914_v63 }
 0xc3f   :  { %v1926_v4 = vsel %vm1478_vm7, %v1924_v3, -inf }
 0xc40   :  { %1927 = vmax.xlane.f32.xlu1 %v1926_v4 }
 0xccd   :  { %v1928_v6 = vpop.xlane.xlu1 %1927 }
 0xcce   :  { %v1933_v54 = vrot.slane %v1928_v6, %v6313_v31  ;;  %v1937_v0 = vrot.slane %v1928_v6, %v6387_v28 }
 0xcd0   :  { %v1940_v25 = vsub.f32 %v1892_v48, %v1933_v54  ;;  %v1941_v61 = vsub.f32 %v1895_v51, %v1933_v54  ;;  %v1943_v12 = vsub.f32 %v1901_v19, %v1937_v0  ;;  %v1942_v16 = vsub.f32 %v1898_v53, %v1937_v0 }
 0xcd2   :  { %v1944_v20 = vmul.f32 1.442695, %v1940_v25  ;;  %v1946_v21 = vmul.f32 1.442695, %v1941_v61  ;;  %v1950_v22 = vmul.f32 1.442695, %v1943_v12 }
 0xcd3   :  { %v1948_v23 = vmul.f32 1.442695, %v1942_v16 }
 0xcd4   :  { %5432 = vpow2.f32 %v1944_v20 }
 0xcd5   :  { %5434 = vpow2.f32 %v1946_v21 }
 0xcd6   :  { %5436 = vpow2.f32 %v1950_v22 }
 0xcd7   :  { %5438 = vpow2.f32 %v1948_v23 }
 0xcde   :  { %v5433_v8 = vpop.eup %5432 }
 0xcdf   :  { %v5435_v37 = vpop.eup %5434  ;;  %1957 = vperm.xlu0 %5407, %v5433_v8  }
 0xce0   :  { %1960 = vperm.xlu1 %5406, %v5435_v37   ;;  %v5437_v59 = vpop.eup %5436 }
 0xce1   :  { %v5439_v27 = vpop.eup %5438 }
 0xce3   :  { %1966 = vperm.xlu0 %5407, %v5437_v59  }
 0xce4   :  { %1963 = vperm.xlu1 %5406, %v5439_v27  }
 0xd5e   :  { %v1958_v48 = vpop.permute.xlu0 %1957 }
 0xd5f   :  { %v1961_v51 = vpop.permute.xlu1 %1960  ;;  %v1971_v19 = vrot.slane %v1958_v48, %v6374_v17 }
 0xd60   :  { %v1975_v53 = vrot.slane %v1961_v51, %v6370_v14 }
 0xd62   :  { %v1967_v26 = vpop.permute.xlu0 %1966  ;;  %v1976_v3 = vsel %vm1465_vm6, %v1975_v53, %v1971_v19 }
 0xd63   :  { %v1964_v62 = vpop.permute.xlu1 %1963  ;;  %v1984_v63 = vrot.slane %v1967_v26, %v6370_v14 }
 0xd64   :  { %v1980_v1 = vrot.slane %v1964_v62, %v6374_v17 }
 0xd66   :  { %v1985_v4 = vsel %vm1465_vm6, %v1984_v63, %v1980_v1 }
 0xd67   :  { %v1986_v6 = vsel %vm1005_vm4, %v1985_v4, %v1976_v3 }
 0xd68   :  { %v1988_v54 = vsel %vm1478_vm7, %v1986_v6, 0.0 }
 0xd69   :  { %1989 = vadd.xlane.f32.xlu1 %v1988_v54 }
 0xdf6   :  { %v1990_v0 = vpop.xlane.xlu1 %1989 }
 0xdf7   :  { %v1995_v25 = vrot.slane %v1990_v0, %v6313_v31  ;;  %v1999_v61 = vrot.slane %v1990_v0, %v6387_v28 }
 0xdf9   :  { %5440 = vrcp.f32 %v1995_v25 }
 0xdfa   :  { %5442 = vrcp.f32 %v1999_v61 }
 0xe03   :  { %v5441_v12 = vpop.eup %5440 }
 0xe04   :  { %v2003_v16 = vmul.f32 %v5441_v12, %v5433_v8  ;;  %v2004_v20 = vmul.f32 %v5441_v12, %v5435_v37  ;;  %v5443_v21 = vpop.eup %5442 }
 0xe05   :  { %v2006_v22 = vmul.f32 %v5443_v21, %v5439_v27  ;;  %v2007_v23 = vmul.f32 %v5443_v21, %v5437_v59 }
 0xe06   :  { %2010 = vperm.xlu0 %5407, %v2003_v16  }
 0xe0a   :  { %2015 = vperm.xlu0 %5407, %v2004_v20  }
 0xe0e   :  { %2020 = vperm.xlu0 %5407, %v2006_v22  }
 0xe12   :  { %2025 = vperm.xlu0 %5407, %v2007_v23  }
 0xe85   :  { %v6541_v48 = vpop.permute.xlu0 %2010 }
 0xe86   :  { %7316 = vst [vmem:[#allocation12_spill] sm:$0xff] %v6541_v48  ;;  %v2028_v51 = vmul.f32 %v6541_v48, %v6230_v29 }
 0xe88   :  { %v2032_v8 = vsel %vm970_vm3, %v2028_v51, 0.0 }
 0xe89   :  { %v6545_v53 = vpop.permute.xlu0 %2015 }
 0xe8a   :  { %v2029_v19 = vmul.f32 %v6545_v53, %v6232_v32 }
 0xe8c   :  { %v2033_v37 = vsel %vm970_vm3, %v2029_v19, 0.0 }
 0xe8d   :  { %v2034_v26 = vadd.f32 %v2033_v37, %v2032_v8  ;;  %v6551_v62 = vpop.permute.xlu0 %2020  ;;  %v4742_v8 = vmul.f32 -1.442695, %v6499_v40 }
 0xe8e   :  { %v2030_v59 = vmul.f32 %v6551_v62, %v6238_v39 }
 0xe8f   :  { %v2035_v27 = vrot.slane %v2034_v26, 4  ;;  %5444 = vpow2.f32 %v4742_v8 }
 0xe90   :  { %v2041_v4 = vsel %vm970_vm3, %v2030_v59, 0.0 }
 0xe91   :  { %v2036_v63 = vadd.f32 %v2035_v27, %v2034_v26  ;;  %v6555_v1 = vpop.permute.xlu0 %2025 }
 0xe92   :  { %v2031_v3 = vmul.f32 %v6555_v1, %v6240_v45 }
 0xe93   :  { %v2037_v0 = vrot.slane %v2036_v63, 2 }
 0xe94   :  { %v2042_v6 = vsel %vm970_vm3, %v2031_v3, 0.0 }
 0xe95   :  { %v2043_v54 = vadd.f32 %v2042_v6, %v2041_v4  ;;  %v2038_v12 = vadd.f32 %v2037_v0, %v2036_v63  ;;  %v1837_v63 = vadd.f32 %v6501_v55, %v6447_v58  ;;  %v2137_v4 = vrot.slane %v6499_v40, 6 }
 0xe97   :  { %v2044_v25 = vrot.slane %v2043_v54, 4  ;;  %v2039_v20 = vrot.slane %v2038_v12, 1  ;;  %v2138_v6 = vrot.slane %v1837_v63, 6 }
 0xe99   :  { %v2045_v61 = vadd.f32 %v2044_v25, %v2043_v54  ;;  %v2040_v23 = vadd.f32 %v2039_v20, %v2038_v12  ;;  %v5445_v37 = vpop.eup %5444 }
 0xe9a   :  { %v1842_v26 = vadd.f32 1.0, %v5445_v37 }
 0xe9b   :  { %v2046_v16 = vrot.slane %v2045_v61, 2 }
 0xe9c   :  { %5446 = vrcp.f32 %v1842_v26  ;;  %v6585_v26 = vsel %vm1724_vm10, %v6475_v13, %v6294_v15 }
 0xe9d   :  { %v2047_v21 = vadd.f32 %v2046_v16, %v2045_v61 }
 0xe9f   :  { %v2048_v22 = vrot.slane %v2047_v21, 1 }
 0xea1   :  { %v2049_v51 = vadd.f32 %v2048_v22, %v2047_v21 }
 0xea3   :  { %v2052_v19 = vsel %vm1005_vm4, %v2049_v51, %v2040_v23 }
 0xea4   :  { %2053 = vrot.lane.b32.xlu0 %v2052_v19, %s5643_s5 }
 0xea6   :  { %v5447_v27 = vpop.eup %5446 }
 0xf16   :  { %v2054_v59 = vpop.permute.xlu0 %2053 }
 0xf17   :  { %v2056_v3 = vmul.f32 %v5447_v27, %v2054_v59  ;;  %v2154_v27 = vrot.slane %v6585_v26, 6 }
 0xf19   :  { %2058 = vrot.lane.b32.xlu0 %v2056_v3, %s5644_s14 }
 0xf1d   :  { %2139 = vrot.lane.b32.xlu0 %v2137_v4, %s5645_s28 }
 0xf21   :  { %2141 = vrot.lane.b32.xlu0 %v2138_v6, %s5645_s28 }
 0xf8b   :  { %v2059_v54 = vpop.permute.xlu0 %2058 }
 0xf8c   :  { %5129 = vmatmul.mubr.msk.f32.vlgmr.msra.gmra.mrb[30].mxu1 %vm970_vm3, %v2059_v54  ;;  %v2173_v54 = vrot.slane %v6487_v2, 6 }
 0xf8d   :  { %5317 = vmatpush3.bf16.msra.mxu1 %v6430_v34  ;;  %5139 = vmatprep.mubr.msk.f32.mxu1 %vm5639_vm2, %v7294_v60 }
 0xf8e   :  { %5318 = vmatprep.subr.bf16.mxu1 %v7292_v57 }
 0xf8f   :  { %v2140_v40 = vpop.permute.xlu0 %2139 }
 0xf91   :  { %5320 = vmatpush3.bf16.msra.mxu1 %v6438_v44 }
 0xf92   :  { %5329 = vmatprep.subr.bf16.mxu1 %v7292_v57 }
 0xf93   :  { %v2142_v0 = vpop.permute.xlu0 %2141 }
 0xf94   :  { %v2143_v16 = vsel %vm1691_vm8, %v2140_v40, %v2142_v0 }
0x105f   :  { %v2128_v55 = vpop.f32.mrb[30].mxu1 }
0x1060   :  { %v2133_v25 = vrot.slane %v2128_v55, 6  ;;  %v5130_v61 = vpop.f32.mrb[31].mxu1 }
0x1062   :  { %v2135_v12 = vadd.f32 %v2133_v25, %v6462_v38 }
0x1064   :  { %v2145_v20 = vadd.f32 %v2143_v16, %v2135_v12 }
0x1066   :  { %5448 = vtanh.f32 %v2145_v20  ;;  %v4744_v22 = vmul.f32 -1.442695, %v2145_v20 }
0x1068   :  { %5450 = vpow2.f32 %v4744_v22 }
0x1070   :  { %v5449_v21 = vpop.eup %5448 }
0x1071   :  { %2158 = vrot.lane.b32.xlu0 %v5449_v21, %s5645_s28 }
0x1072   :  { %v5451_v23 = vpop.eup %5450 }
0x1073   :  { %v2149_v51 = vadd.f32 1.0, %v5451_v23 }
0x1075   :  { %5452 = vrcp.f32 %v2149_v51 }
0x107f   :  { %v5453_v19 = vpop.eup %5452 }
0x1080   :  { %v2156_v59 = vmul.f32 %v5453_v19, %v2154_v27 }
0x10e3   :  { %v2159_v8 = vpop.permute.xlu0 %2158 }
0x10e4   :  { %v2161_v37 = vmul.f32 %v5453_v19, %v2159_v8 }
0x10e6   :  { %2163 = vrot.lane.b32.xlu1 %v2161_v37, %s5643_s5 }
0x1158   :  { %v2164_v3 = vpop.permute.xlu1 %2163 }
0x1159   :  { %v6590_v63 = vadd.f32 %v2164_v3, %v2156_v59 }
0x115b   :  { %5454 = vtanh.f32 %v6590_v63 }
0x1165   :  { %v5455_v4 = vpop.eup %5454 }
0x1166   :  { %2169 = vrot.lane.b32.xlu0 %v5455_v4, %s5645_s28 }
0x11d8   :  { %v2170_v6 = vpop.permute.xlu0 %2169 }
0x11d9   :  { %v6595_v40 = vmul.f32 %v5453_v19, %v2170_v6 }
0x11db   :  { %v6600_v15 = vsel %vm1724_vm10, %v6595_v40, %v2173_v54 }
0x11dc   :  { %v2210_v13 = vrot.slane %v6600_v15, 2  ;;  %v2620_v26 = vrot.slane %v6600_v15, 6 }
0x11de   :  { %2211 = vrot.lane.b32.xlu0 %v2210_v13, %s5643_s5 }
0x1250   :  { %v2212_v55 = vpop.permute.xlu0 %2211 }
0x1251   :  { %4745 = vmatmul.mubr.msk.f32.vlgmr.msra.gmra.mrb[64].mxu0 %vm970_vm3, %v2212_v55 }
0x1252   :  { %5324 = vmatpush1.bf16.msra.mxu0 %v6223_v9  ;;  %2726 = vmatprep.mubr.f32.mxu0 %v7294_v60 }
0x1253   :  { %5326 = vmatprep.subr.bf16.mxu0 %v6225_v10 }
0x1256   :  { %5328 = vmatpush1.bf16.msra.mxu0 %v6285_v11 }
0x1257   :  { %5336 = vmatprep.subr.bf16.mxu0 %v6212_v5 }
0x1324   :  { %v2281_v2 = vpop.f32.mrb[64].mxu0 }
0x1325   :  { %v6611_v0 = vadd.f32 %v2281_v2, %v6322_v35  ;;  %v6613_v25 = vpop.f32.mrb[65].mxu0 }
0x1327   :  { %v2299_v61 = vrot.slane %v6611_v0, %v6325_v18 }
0x1329   :  { %v2300_v12 = vcombine.high %v2299_v61, %v2299_v61  ;;  %v2307_v16 = vrot.slane %v2299_v61, %v6325_v18 }
0x132b   :  { %v2318_v20 = vrot.slane %v2307_v16, %v6313_v31  ;;  %v2314_v21 = vrot.slane %v2300_v12, %v6325_v18 }
0x132d   :  { %v2326_v22 = vadd.f32 %v2318_v20, %v6338_v46  ;;  %v2325_v23 = vadd.f32 %v2318_v20, %v6340_v33  ;;  %v2322_v51 = vrot.slane %v2314_v21, %v6313_v31 }
0x132f   :  { %v2330_v19 = vmax.f32 %v2326_v22, 0.0  ;;  %v2329_v8 = vmax.f32 %v2325_v23, 0.0  ;;  %v2327_v37 = vadd.f32 %v2322_v51, %v6346_v43  ;;  %v2328_v59 = vadd.f32 %v2322_v51, %v6344_v49 }
0x1331   :  { %v2334_v3 = vmul.f32 %v6354_v52, %v2330_v19  ;;  %v2333_v4 = vmul.f32 %v6354_v52, %v2329_v8  ;;  %v2331_v6 = vmax.f32 %v2327_v37, 0.0  ;;  %v2332_v2 = vmax.f32 %v2328_v59, 0.0 }
0x1333   :  { %v2340_v54 = vsel %vm970_vm3, %v2334_v3, 0.0  ;;  %v2337_v13 = vsel %vm970_vm3, %v2333_v4, 0.0  ;;  %v2335_v55 = vmul.f32 %v6354_v52, %v2331_v6  ;;  %v2336_v12 = vmul.f32 %v6354_v52, %v2332_v2 }
0x1334   :  { %2341 = vadd.xlane.f32.xlu1 %v2340_v54  ;;  %2338 = vadd.xlane.f32.xlu0 %v2337_v13 }
0x1335   :  { %v2343_v61 = vsel %vm970_vm3, %v2335_v55, 0.0  ;;  %v2346_v16 = vsel %vm970_vm3, %v2336_v12, 0.0 }
0x1338   :  { %2344 = vadd.xlane.f32.xlu0 %v2343_v61 }
0x133c   :  { %2347 = vadd.xlane.f32.xlu0 %v2346_v16 }
0x13c1   :  { %v2339_v20 = vpop.xlane.xlu0 %2338  ;;  %v2342_v21 = vpop.xlane.xlu1 %2341 }
0x13c2   :  { %v2360_v23 = vrot.slane %v2342_v21, %v6370_v14  ;;  %v2356_v51 = vrot.slane %v2339_v20, %v6374_v17 }
0x13c4   :  { %v2361_v59 = vsel %vm1465_vm6, %v2360_v23, %v2356_v51 }
0x13c5   :  { %v2345_v22 = vpop.xlane.xlu0 %2344 }
0x13c6   :  { %v2365_v8 = vrot.slane %v2345_v22, %v6374_v17 }
0x13c9   :  { %v2348_v19 = vpop.xlane.xlu0 %2347 }
0x13ca   :  { %v2369_v37 = vrot.slane %v2348_v19, %v6370_v14 }
0x13cc   :  { %v2370_v52 = vsel %vm1465_vm6, %v2369_v37, %v2365_v8 }
0x13cd   :  { %v2371_v3 = vsel %vm1005_vm4, %v2370_v52, %v2361_v59 }
0x13ce   :  { %v2373_v4 = vsel %vm1478_vm7, %v2371_v3, -inf }
0x13cf   :  { %2374 = vmax.xlane.f32.xlu0 %v2373_v4 }
0x145c   :  { %v2375_v6 = vpop.xlane.xlu0 %2374 }
0x145d   :  { %v2380_v54 = vrot.slane %v2375_v6, %v6313_v31  ;;  %v2384_v13 = vrot.slane %v2375_v6, %v6387_v28 }
0x145f   :  { %v2387_v55 = vsub.f32 %v2339_v20, %v2380_v54  ;;  %v2388_v2 = vsub.f32 %v2342_v21, %v2380_v54  ;;  %v2389_v61 = vsub.f32 %v2345_v22, %v2384_v13  ;;  %v2390_v42 = vsub.f32 %v2348_v19, %v2384_v13 }
0x1461   :  { %v2391_v12 = vmul.f32 1.442695, %v2387_v55  ;;  %v2393_v16 = vmul.f32 1.442695, %v2388_v2  ;;  %v2395_v23 = vmul.f32 1.442695, %v2389_v61  ;;  %v2284_v61 = vadd.f32 %v6613_v25, %v6447_v58 }
0x1462   :  { %v2397_v51 = vmul.f32 1.442695, %v2390_v42 }
0x1463   :  { %5456 = vpow2.f32 %v2391_v12  ;;  %v2585_v12 = vrot.slane %v2284_v61, 4 }
0x1464   :  { %5458 = vpow2.f32 %v2393_v16 }
0x1465   :  { %5460 = vpow2.f32 %v2395_v23 }
0x1466   :  { %5462 = vpow2.f32 %v2397_v51 }
0x146d   :  { %v5457_v8 = vpop.eup %5456 }
0x146e   :  { %v5459_v37 = vpop.eup %5458  ;;  %2404 = vperm.xlu0 %5407, %v5457_v8  }
0x146f   :  { %2407 = vperm.xlu1 %5406, %v5459_v37   ;;  %v5461_v59 = vpop.eup %5460 }
0x1470   :  { %v5463_v52 = vpop.eup %5462 }
0x1473   :  { %2410 = vperm.xlu1 %5406, %v5461_v59  }
0x1477   :  { %2413 = vperm.xlu1 %5406, %v5463_v52  }
0x14ed   :  { %v2405_v21 = vpop.permute.xlu0 %2404 }
0x14ee   :  { %v2408_v20 = vpop.permute.xlu1 %2407  ;;  %v2418_v19 = vrot.slane %v2405_v21, %v6374_v17 }
0x14ef   :  { %v2422_v3 = vrot.slane %v2408_v20, %v6370_v14 }
0x14f1   :  { %v2423_v54 = vsel %vm1465_vm6, %v2422_v3, %v2418_v19 }
0x14f2   :  { %v2411_v22 = vpop.permute.xlu1 %2410 }
0x14f3   :  { %v2427_v6 = vrot.slane %v2411_v22, %v6374_v17 }
0x14f6   :  { %v2414_v4 = vpop.permute.xlu1 %2413 }
0x14f7   :  { %v2431_v42 = vrot.slane %v2414_v4, %v6370_v14 }
0x14f9   :  { %v2432_v13 = vsel %vm1465_vm6, %v2431_v42, %v2427_v6 }
0x14fa   :  { %v2433_v55 = vsel %vm1005_vm4, %v2432_v13, %v2423_v54 }
0x14fb   :  { %v2435_v2 = vsel %vm1478_vm7, %v2433_v55, 0.0 }
0x14fc   :  { %2436 = vadd.xlane.f32.xlu0 %v2435_v2 }
0x1512   :  { %2588 = vrot.lane.b32.xlu0 %v2585_v12, %s5645_s28 }
0x1589   :  { %v2437_v16 = vpop.xlane.xlu0 %2436 }
0x158a   :  { %v2442_v23 = vrot.slane %v2437_v16, %v6313_v31  ;;  %v2446_v51 = vrot.slane %v2437_v16, %v6387_v28 }
0x158c   :  { %5464 = vrcp.f32 %v2442_v23 }
0x158d   :  { %5466 = vrcp.f32 %v2446_v51 }
0x1596   :  { %v5465_v20 = vpop.eup %5464 }
0x1597   :  { %v2450_v21 = vmul.f32 %v5465_v20, %v5457_v8  ;;  %v2451_v22 = vmul.f32 %v5465_v20, %v5459_v37  ;;  %v5467_v3 = vpop.eup %5466 }
0x1598   :  { %v2453_v19 = vmul.f32 %v5467_v3, %v5461_v59  ;;  %v2454_v4 = vmul.f32 %v5467_v3, %v5463_v52 }
0x1599   :  { %2457 = vperm.xlu1 %5406, %v2450_v21  }
0x159d   :  { %2462 = vperm.xlu1 %5406, %v2451_v22  }
0x15a1   :  { %2467 = vperm.xlu1 %5406, %v2453_v19  }
0x15a5   :  { %2472 = vperm.xlu1 %5406, %v2454_v4  }
0x1618   :  { %v6656_v25 = vpop.permute.xlu1 %2457 }
0x1619   :  { %7317 = vst [vmem:[#allocation13_spill] sm:$0xff] %v6656_v25  ;;  %v2475_v6 = vmul.f32 %v6656_v25, %v6230_v29 }
0x161b   :  { %v2479_v8 = vsel %vm970_vm3, %v2475_v6, 0.0 }
0x161c   :  { %v6660_v42 = vpop.permute.xlu1 %2462 }
0x161d   :  { %v2476_v54 = vmul.f32 %v6660_v42, %v6232_v32 }
0x161f   :  { %v2480_v37 = vsel %vm970_vm3, %v2476_v54, 0.0 }
0x1620   :  { %v2481_v13 = vadd.f32 %v2480_v37, %v2479_v8  ;;  %v6666_v55 = vpop.permute.xlu1 %2467 }
0x1621   :  { %v2477_v52 = vmul.f32 %v6666_v55, %v6238_v39 }
0x1622   :  { %v2482_v59 = vrot.slane %v2481_v13, 4 }
0x1623   :  { %v2488_v16 = vsel %vm970_vm3, %v2477_v52, 0.0 }
0x1624   :  { %v2483_v2 = vadd.f32 %v2482_v59, %v2481_v13  ;;  %v6670_v61 = vpop.permute.xlu1 %2472  ;;  %v4746_v59 = vmul.f32 -1.442695, %v6611_v0 }
0x1625   :  { %v2478_v12 = vmul.f32 %v6670_v61, %v6240_v45 }
0x1626   :  { %v2484_v20 = vrot.slane %v2483_v2, 2  ;;  %5468 = vpow2.f32 %v4746_v59 }
0x1627   :  { %v2489_v23 = vsel %vm970_vm3, %v2478_v12, 0.0 }
0x1628   :  { %v2490_v51 = vadd.f32 %v2489_v23, %v2488_v16  ;;  %v2485_v3 = vadd.f32 %v2484_v20, %v2483_v2  ;;  %v2584_v2 = vrot.slane %v6611_v0, 4 }
0x162a   :  { %v2491_v21 = vrot.slane %v2490_v51, 4  ;;  %v2486_v4 = vrot.slane %v2485_v3, 1 }
0x162c   :  { %v2492_v22 = vadd.f32 %v2491_v21, %v2490_v51  ;;  %v2487_v8 = vadd.f32 %v2486_v4, %v2485_v3 }
0x162e   :  { %v2493_v19 = vrot.slane %v2492_v22, 2 }
0x1630   :  { %v2494_v6 = vadd.f32 %v2493_v19, %v2492_v22  ;;  %v5469_v52 = vpop.eup %5468  ;;  %v2589_v19 = vpop.permute.xlu0 %2588 }
0x1631   :  { %v2289_v12 = vadd.f32 1.0, %v5469_v52 }
0x1632   :  { %v2495_v54 = vrot.slane %v2494_v6, 1 }
0x1633   :  { %5470 = vrcp.f32 %v2289_v12 }
0x1634   :  { %v2496_v37 = vadd.f32 %v2495_v54, %v2494_v6 }
0x1636   :  { %v2499_v13 = vsel %vm1005_vm4, %v2496_v37, %v2487_v8 }
0x1637   :  { %2500 = vrot.lane.b32.xlu1 %v2499_v13, %s5643_s5 }
0x163d   :  { %v5471_v16 = vpop.eup %5470 }
0x16a9   :  { %v2501_v23 = vpop.permute.xlu1 %2500 }
0x16aa   :  { %v2503_v51 = vmul.f32 %v5471_v16, %v2501_v23  ;;  %v6698_v23 = vsel %vm1724_vm10, %v6590_v63, %v2154_v27 }
0x16ac   :  { %2505 = vrot.lane.b32.xlu1 %v2503_v51, %s5644_s14  ;;  %v7291_v51 = vrot.slane %v6698_v23, 6 }
0x16b0   :  { %2586 = vrot.lane.b32.xlu1 %v2584_v2, %s5645_s28 }
0x171e   :  { %v2506_v20 = vpop.permute.xlu1 %2505 }
0x171f   :  { %5140 = vmatmul.mubr.msk.f32.vlgmr.msra.gmra.mrb[32].mxu1 %vm970_vm3, %v2506_v20 }
0x1720   :  { %5331 = vmatpush3.bf16.msra.mxu1 %v6430_v34  ;;  %5150 = vmatprep.mubr.msk.f32.mxu1 %vm5639_vm2, %v7294_v60 }
0x1721   :  { %5332 = vmatprep.subr.bf16.mxu1 %v7292_v57 }
0x1722   :  { %v2587_v22 = vpop.permute.xlu1 %2586 }
0x1723   :  { %v2590_v6 = vsel %vm1691_vm8, %v2587_v22, %v2589_v19 }
0x1724   :  { %5334 = vmatpush3.bf16.msra.mxu1 %v6438_v44 }
0x1725   :  { %5343 = vmatprep.subr.bf16.mxu1 %v7292_v57 }
0x17f2   :  { %v2575_v21 = vpop.f32.mrb[32].mxu1 }
0x17f3   :  { %v2580_v3 = vrot.slane %v2575_v21, 4  ;;  %v5141_v0 = vpop.f32.mrb[33].mxu1 }
0x17f5   :  { %v2582_v4 = vadd.f32 %v2580_v3, %v6462_v38 }
0x17f7   :  { %v2592_v54 = vadd.f32 %v2590_v6, %v2582_v4 }
0x17f9   :  { %5472 = vtanh.f32 %v2592_v54  ;;  %v4748_v37 = vmul.f32 -1.442695, %v2592_v54 }
0x17fb   :  { %5474 = vpow2.f32 %v4748_v37 }
0x1803   :  { %v5473_v8 = vpop.eup %5472 }
0x1804   :  { %2605 = vrot.lane.b32.xlu1 %v5473_v8, %s5645_s28 }
0x1805   :  { %v5475_v13 = vpop.eup %5474 }
0x1806   :  { %v2596_v59 = vadd.f32 1.0, %v5475_v13 }
0x1808   :  { %5476 = vrcp.f32 %v2596_v59 }
0x1812   :  { %v5477_v52 = vpop.eup %5476 }
0x1813   :  { %v2603_v2 = vmul.f32 %v5477_v52, %v7291_v51 }
0x1876   :  { %v2606_v12 = vpop.permute.xlu1 %2605 }
0x1877   :  { %v2608_v16 = vmul.f32 %v5477_v52, %v2606_v12 }
0x1879   :  { %2610 = vrot.lane.b32.xlu1 %v2608_v16, %s5643_s5 }
0x18eb   :  { %v2611_v20 = vpop.permute.xlu1 %2610 }
0x18ec   :  { %v6703_v21 = vadd.f32 %v2611_v20, %v2603_v2 }
0x18ee   :  { %5478 = vtanh.f32 %v6703_v21 }
0x18f8   :  { %v5479_v22 = vpop.eup %5478 }
0x18f9   :  { %2616 = vrot.lane.b32.xlu1 %v5479_v22, %s5645_s28 }
0x196b   :  { %v2617_v3 = vpop.permute.xlu1 %2616 }
0x196c   :  { %v6708_v0 = vmul.f32 %v5477_v52, %v2617_v3 }
0x196e   :  { %v6713_v27 = vsel %vm1724_vm10, %v6708_v0, %v2620_v26  ;;  %v6741_v26 = vld [vmem:[%s7277_s13] ss:$0 sm:$0xff] }
0x196f   :  { %v2657_v63 = vrot.slane %v6713_v27, 4 }
0x1971   :  { %2658 = vrot.lane.b32.xlu1 %v2657_v63, %s5643_s5 }
0x19e3   :  { %v2659_v19 = vpop.permute.xlu1 %2658 }
0x19e4   :  { %4749 = vmatmul.mubr.msk.f32.vlgmr.msra.gmra.mrb[66].mxu0 %vm970_vm3, %v2659_v19 }
0x19e5   :  { %5338 = vmatpush1.bf16.msra.mxu0 %v6223_v9  ;;  %3173 = vmatprep.mubr.f32.mxu0 %v7294_v60 }
0x19e6   :  { %5340 = vmatprep.subr.bf16.mxu0 %v6225_v10 }
0x19e9   :  { %5342 = vmatpush1.bf16.msra.mxu0 %v6285_v11 }
0x19ea   :  { %5350 = vmatprep.subr.bf16.mxu0 %v6212_v5 }
0x1ab7   :  { %v2728_v15 = vpop.f32.mrb[66].mxu0 }
0x1ab8   :  { %v6724_v4 = vadd.f32 %v2728_v15, %v6322_v35  ;;  %v6726_v6 = vpop.f32.mrb[67].mxu0 }
0x1aba   :  { %v2746_v54 = vrot.slane %v6724_v4, %v6325_v18 }
0x1abc   :  { %v2747_v8 = vcombine.high %v2746_v54, %v2746_v54  ;;  %v2754_v37 = vrot.slane %v2746_v54, %v6325_v18 }
0x1abe   :  { %v2765_v13 = vrot.slane %v2754_v37, %v6313_v31  ;;  %v2761_v59 = vrot.slane %v2747_v8, %v6325_v18 }
0x1ac0   :  { %v2773_v52 = vadd.f32 %v2765_v13, %v6338_v46  ;;  %v2772_v12 = vadd.f32 %v2765_v13, %v6340_v33  ;;  %v2769_v16 = vrot.slane %v2761_v59, %v6313_v31 }
0x1ac2   :  { %v2777_v2 = vmax.f32 %v2773_v52, 0.0  ;;  %v2776_v20 = vmax.f32 %v2772_v12, 0.0  ;;  %v2775_v22 = vadd.f32 %v2769_v16, %v6344_v49  ;;  %v2774_v3 = vadd.f32 %v2769_v16, %v6346_v43 }
0x1ac4   :  { %v2781_v63 = vmul.f32 %v6741_v26, %v2777_v2  ;;  %v2780_v19 = vmul.f32 %v6741_v26, %v2776_v20  ;;  %v2779_v15 = vmax.f32 %v2775_v22, 0.0  ;;  %v2778_v54 = vmax.f32 %v2774_v3, 0.0 }
0x1ac6   :  { %v2787_v8 = vsel %vm970_vm3, %v2781_v63, 0.0  ;;  %v2784_v37 = vsel %vm970_vm3, %v2780_v19, 0.0  ;;  %v2783_v13 = vmul.f32 %v6741_v26, %v2779_v15  ;;  %v2782_v59 = vmul.f32 %v6741_v26, %v2778_v54 }
0x1ac7   :  { %2788 = vadd.xlane.f32.xlu0 %v2787_v8  ;;  %2785 = vadd.xlane.f32.xlu1 %v2784_v37 }
0x1ac8   :  { %v2793_v52 = vsel %vm970_vm3, %v2783_v13, 0.0  ;;  %v2790_v12 = vsel %vm970_vm3, %v2782_v59, 0.0 }
0x1acb   :  { %2794 = vadd.xlane.f32.xlu0 %v2793_v52  ;;  %2791 = vadd.xlane.f32.xlu1 %v2790_v12 }
0x1b54   :  { %v2789_v16 = vpop.xlane.xlu0 %2788  ;;  %v2786_v2 = vpop.xlane.xlu1 %2785 }
0x1b55   :  { %v2807_v20 = vrot.slane %v2789_v16, %v6370_v14  ;;  %v2803_v22 = vrot.slane %v2786_v2, %v6374_v17 }
0x1b57   :  { %v2808_v54 = vsel %vm1465_vm6, %v2807_v20, %v2803_v22 }
0x1b58   :  { %v2795_v3 = vpop.xlane.xlu0 %2794  ;;  %v2792_v63 = vpop.xlane.xlu1 %2791 }
0x1b59   :  { %v2816_v19 = vrot.slane %v2795_v3, %v6370_v14  ;;  %v2812_v15 = vrot.slane %v2792_v63, %v6374_v17 }
0x1b5b   :  { %v2817_v8 = vsel %vm1465_vm6, %v2816_v19, %v2812_v15 }
0x1b5c   :  { %v2818_v37 = vsel %vm1005_vm4, %v2817_v8, %v2808_v54 }
0x1b5d   :  { %v2820_v13 = vsel %vm1478_vm7, %v2818_v37, -inf }
0x1b5e   :  { %2821 = vmax.xlane.f32.xlu1 %v2820_v13 }
0x1beb   :  { %v2822_v59 = vpop.xlane.xlu1 %2821 }
0x1bec   :  { %v2827_v52 = vrot.slane %v2822_v59, %v6313_v31  ;;  %v2831_v12 = vrot.slane %v2822_v59, %v6387_v28 }
0x1bee   :  { %v2834_v51 = vsub.f32 %v2786_v2, %v2827_v52  ;;  %v2835_v57 = vsub.f32 %v2789_v16, %v2827_v52  ;;  %v2837_v60 = vsub.f32 %v2795_v3, %v2831_v12  ;;  %v2836_v7 = vsub.f32 %v2792_v63, %v2831_v12 }
0x1bf0   :  { %v2838_v36 = vmul.f32 1.442695, %v2834_v51  ;;  %v2840_v25 = vmul.f32 1.442695, %v2835_v57  ;;  %v2844_v20 = vmul.f32 1.442695, %v2837_v60 }
0x1bf1   :  { %v2842_v22 = vmul.f32 1.442695, %v2836_v7 }
0x1bf2   :  { %5480 = vpow2.f32 %v2838_v36 }
0x1bf3   :  { %5482 = vpow2.f32 %v2840_v25 }
0x1bf4   :  { %5484 = vpow2.f32 %v2844_v20 }
0x1bf5   :  { %5486 = vpow2.f32 %v2842_v22 }
0x1bfc   :  { %v5481_v19 = vpop.eup %5480 }
0x1bfd   :  { %v5483_v15 = vpop.eup %5482  ;;  %2851 = vperm.xlu0 %5407, %v5481_v19  }
0x1bfe   :  { %2854 = vperm.xlu1 %5406, %v5483_v15   ;;  %v5485_v54 = vpop.eup %5484 }
0x1bff   :  { %v5487_v8 = vpop.eup %5486 }
0x1c01   :  { %2860 = vperm.xlu0 %5407, %v5485_v54  }
0x1c02   :  { %2857 = vperm.xlu1 %5406, %v5487_v8  }
0x1c7c   :  { %v2852_v2 = vpop.permute.xlu0 %2851 }
0x1c7d   :  { %v2855_v16 = vpop.permute.xlu1 %2854  ;;  %v2865_v57 = vrot.slane %v2852_v2, %v6374_v17 }
0x1c7e   :  { %v2869_v3 = vrot.slane %v2855_v16, %v6370_v14 }
0x1c80   :  { %v2861_v36 = vpop.permute.xlu0 %2860  ;;  %v2870_v51 = vsel %vm1465_vm6, %v2869_v3, %v2865_v57 }
0x1c81   :  { %v2858_v60 = vpop.permute.xlu1 %2857  ;;  %v2878_v7 = vrot.slane %v2861_v36, %v6370_v14 }
0x1c82   :  { %v2874_v25 = vrot.slane %v2858_v60, %v6374_v17 }
0x1c84   :  { %v2879_v63 = vsel %vm1465_vm6, %v2878_v7, %v2874_v25 }
0x1c85   :  { %v2880_v37 = vsel %vm1005_vm4, %v2879_v63, %v2870_v51 }
0x1c86   :  { %v2882_v13 = vsel %vm1478_vm7, %v2880_v37, 0.0 }
0x1c87   :  { %2883 = vadd.xlane.f32.xlu1 %v2882_v13 }
0x1d14   :  { %v2884_v59 = vpop.xlane.xlu1 %2883 }
0x1d15   :  { %v2889_v52 = vrot.slane %v2884_v59, %v6313_v31  ;;  %v2893_v12 = vrot.slane %v2884_v59, %v6387_v28 }
0x1d17   :  { %5488 = vrcp.f32 %v2889_v52 }
0x1d18   :  { %5490 = vrcp.f32 %v2893_v12 }
0x1d21   :  { %v5489_v20 = vpop.eup %5488 }
0x1d22   :  { %v2897_v22 = vmul.f32 %v5489_v20, %v5481_v19  ;;  %v2898_v2 = vmul.f32 %v5489_v20, %v5483_v15  ;;  %v5491_v16 = vpop.eup %5490 }
0x1d23   :  { %v2900_v3 = vmul.f32 %v5491_v16, %v5487_v8  ;;  %v2901_v57 = vmul.f32 %v5491_v16, %v5485_v54 }
0x1d24   :  { %2904 = vperm.xlu0 %5407, %v2897_v22  }
0x1d28   :  { %2909 = vperm.xlu0 %5407, %v2898_v2  }
0x1d2c   :  { %2914 = vperm.xlu0 %5407, %v2900_v3  }
0x1d30   :  { %2919 = vperm.xlu0 %5407, %v2901_v57  }
0x1da3   :  { %v2905_v36 = vpop.permute.xlu0 %2904 }
0x1da4   :  { %v2922_v60 = vmul.f32 %v2905_v36, %v6230_v29  ;;  %v3074_v52 = vrot.slane %v2905_v36, %v6374_v17 }
0x1da6   :  { %v2926_v51 = vsel %vm970_vm3, %v2922_v60, 0.0 }
0x1da7   :  { %v2910_v7 = vpop.permute.xlu0 %2909 }
0x1da8   :  { %v2923_v25 = vmul.f32 %v2910_v7, %v6232_v32  ;;  %v3078_v15 = vrot.slane %v2910_v7, %v6370_v14 }
0x1daa   :  { %v2927_v63 = vsel %vm970_vm3, %v2923_v25, 0.0  ;;  %v3079_v2 = vsel %vm1465_vm6, %v3078_v15, %v3074_v52 }
0x1dab   :  { %v2928_v37 = vadd.f32 %v2927_v63, %v2926_v51  ;;  %v2915_v19 = vpop.permute.xlu0 %2914 }
0x1dac   :  { %v2924_v8 = vmul.f32 %v2915_v19, %v6238_v39  ;;  %v3083_v12 = vrot.slane %v2915_v19, %v6374_v17 }
0x1dad   :  { %v2929_v13 = vrot.slane %v2928_v37, 4 }
0x1dae   :  { %v2935_v16 = vsel %vm970_vm3, %v2924_v8, 0.0  ;;  %v4750_v8 = vmul.f32 -1.442695, %v6724_v4 }
0x1daf   :  { %v2930_v59 = vadd.f32 %v2929_v13, %v2928_v37  ;;  %v2920_v54 = vpop.permute.xlu0 %2919 }
0x1db0   :  { %v2925_v20 = vmul.f32 %v2920_v54, %v6240_v45  ;;  %v3087_v22 = vrot.slane %v2920_v54, %v6370_v14  ;;  %5492 = vpow2.f32 %v4750_v8 }
0x1db1   :  { %v2931_v60 = vrot.slane %v2930_v59, 2 }
0x1db2   :  { %v2936_v3 = vsel %vm970_vm3, %v2925_v20, 0.0  ;;  %v3088_v57 = vsel %vm1465_vm6, %v3087_v22, %v3083_v12 }
0x1db3   :  { %v2937_v7 = vadd.f32 %v2936_v3, %v2935_v16  ;;  %v6785_v25 = vsel %vm3089_vm11, %v3088_v57, %v3079_v2  ;;  %v2932_v63 = vadd.f32 %v2931_v60, %v2930_v59  ;;  %v2731_v59 = vadd.f32 %v6726_v6, %v6447_v58 }
0x1db4   :  { %v7318_v3 = vmov 0.0   ;;  %v7319_v57 = vmov 0.0|0.0  }
0x1db5   :  { %v2938_v51 = vrot.slane %v2937_v7, 4  ;;  %v2933_v19 = vrot.slane %v2932_v63, 1 }
0x1db7   :  { %v2939_v36 = vadd.f32 %v2938_v51, %v2937_v7  ;;  %v2934_v54 = vadd.f32 %v2933_v19, %v2932_v63 }
0x1db9   :  { %v2940_v37 = vrot.slane %v2939_v36, 2 }
0x1dba   :  { %v5493_v52 = vpop.eup %5492 }
0x1dbb   :  { %v2941_v13 = vadd.f32 %v2940_v37, %v2939_v36  ;;  %v2736_v12 = vadd.f32 1.0, %v5493_v52 }
0x1dbd   :  { %v2942_v48 = vrot.slane %v2941_v13, 1  ;;  %5494 = vrcp.f32 %v2736_v12 }
0x1dbf   :  { %v2943_v56 = vadd.f32 %v2942_v48, %v2941_v13  ;;  %v3031_v48 = vrot.slane %v6724_v4, 2 }
0x1dc1   :  { %v2946_v15 = vsel %vm1005_vm4, %v2943_v56, %v2934_v54  ;;  %v3032_v56 = vrot.slane %v2731_v59, 2 }
0x1dc2   :  { %2947 = vrot.lane.b32.xlu0 %v2946_v15, %s5643_s5 }
0x1dc7   :  { %v5495_v20 = vpop.eup %5494 }
0x1e34   :  { %v2948_v22 = vpop.permute.xlu0 %2947 }
0x1e35   :  { %v2950_v2 = vmul.f32 %v5495_v20, %v2948_v22  ;;  %v7320_v20 = vrot.slane %v6698_v23, 6  ;;  %v3067_v23 = vrot.slane %v6713_v27, 6 }
0x1e37   :  { %2952 = vrot.lane.b32.xlu0 %v2950_v2, %s5644_s14 }
0x1e3b   :  { %3033 = vrot.lane.b32.xlu0 %v3031_v48, %s5645_s28 }
0x1e3f   :  { %3035 = vrot.lane.b32.xlu0 %v3032_v56, %s5645_s28 }
0x1ea9   :  { %v2953_v16 = vpop.permute.xlu0 %2952 }
0x1eaa   :  { %5151 = vmatmul.mubr.msk.f32.vlgmr.msra.gmra.mrb[34].mxu1 %vm970_vm3, %v2953_v16 }
0x1eab   :  { %5345 = vmatpush3.bf16.msra.mxu1 %v6430_v34  ;;  %5161 = vmatprep.mubr.msk.f32.mxu1 %vm5639_vm2, %v7318_v3 }
0x1eac   :  { %5346 = vmatprep.subr.bf16.mxu1 %v7319_v57 }
0x1ead   :  { %v3034_v4 = vpop.permute.xlu0 %3033 }
0x1eaf   :  { %5348 = vmatpush3.bf16.msra.mxu1 %v6438_v44 }
0x1eb0   :  { %5357 = vmatprep.subr.bf16.mxu1 %v7319_v57 }
0x1eb1   :  { %v3036_v60 = vpop.permute.xlu0 %3035 }
0x1eb2   :  { %v3037_v63 = vsel %vm1691_vm8, %v3034_v4, %v3036_v60 }
0x1f7d   :  { %v3022_v6 = vpop.f32.mrb[34].mxu1 }
0x1f7e   :  { %v3027_v7 = vrot.slane %v3022_v6, 2  ;;  %v5152_v51 = vpop.f32.mrb[35].mxu1 }
0x1f80   :  { %v3029_v36 = vadd.f32 %v3027_v7, %v6462_v38  ;;  %v6812_v38 = vsel %vm1724_vm10, %v6703_v21, %v7320_v20 }
0x1f81   :  { %v7303_v22 = vrot.slane %v6812_v38, 6 }
0x1f82   :  { %v3039_v37 = vadd.f32 %v3037_v63, %v3029_v36 }
0x1f84   :  { %5496 = vtanh.f32 %v3039_v37  ;;  %v4752_v13 = vmul.f32 -1.442695, %v3039_v37 }
0x1f86   :  { %5498 = vpow2.f32 %v4752_v13 }
0x1f8e   :  { %v5497_v19 = vpop.eup %5496 }
0x1f8f   :  { %3052 = vrot.lane.b32.xlu0 %v5497_v19, %s5645_s28 }
0x1f90   :  { %v5499_v54 = vpop.eup %5498 }
0x1f91   :  { %v3043_v15 = vadd.f32 1.0, %v5499_v54 }
0x1f93   :  { %5500 = vrcp.f32 %v3043_v15 }
0x1f9d   :  { %v5501_v8 = vpop.eup %5500 }
0x1f9e   :  { %v3050_v2 = vmul.f32 %v5501_v8, %v7303_v22 }
0x2001   :  { %v3053_v52 = vpop.permute.xlu0 %3052 }
0x2002   :  { %v3055_v12 = vmul.f32 %v5501_v8, %v3053_v52 }
0x2004   :  { %3057 = vrot.lane.b32.xlu1 %v3055_v12, %s5643_s5 }
0x2076   :  { %v3058_v59 = vpop.permute.xlu1 %3057 }
0x2077   :  { %v6817_v48 = vadd.f32 %v3058_v59, %v3050_v2 }
0x2079   :  { %5502 = vtanh.f32 %v6817_v48 }
0x2083   :  { %v5503_v56 = vpop.eup %5502 }
0x2084   :  { %3063 = vrot.lane.b32.xlu0 %v5503_v56, %s5645_s28 }
0x20f6   :  { %v3064_v16 = vpop.permute.xlu0 %3063 }
0x20f7   :  { %v6822_v4 = vmul.f32 %v5501_v8, %v3064_v16 }
0x20f9   :  { %v6827_v21 = vsel %vm1724_vm10, %v6822_v4, %v3067_v23 }
0x20fa   :  { %v7302_v6 = vrot.slane %v6827_v21, 6  ;;  %v7323_v30 = vrot.slane %v6827_v21, 6 }
0x20fc   :  { %3105 = vrot.lane.b32.xlu0 %v7302_v6, %s5643_s5 }
0x216e   :  { %v3106_v60 = vpop.permute.xlu0 %3105 }
0x216f   :  { %4753 = vmatmul.mubr.msk.f32.vlgmr.msra.gmra.mrb[68].mxu0 %vm970_vm3, %v3106_v60 }
0x2170   :  { %5352 = vmatpush1.bf16.msra.mxu0 %v6223_v9  ;;  %3619 = vmatprep.mubr.f32.mxu0 %v7318_v3 }
0x2171   :  { %5354 = vmatprep.subr.bf16.mxu0 %v6225_v10 }
0x2174   :  { %5356 = vmatpush1.bf16.msra.mxu0 %v6285_v11 }
0x2175   :  { %5364 = vmatprep.subr.bf16.mxu0 %v6212_v5 }
0x2242   :  { %v3175_v27 = vpop.f32.mrb[68].mxu0 }
0x2243   :  { %v6840_v7 = vadd.f32 %v3175_v27, %v6322_v35  ;;  %v6842_v51 = vpop.f32.mrb[69].mxu0 }
0x2245   :  { %v3193_v36 = vrot.slane %v6840_v7, %v6325_v18 }
0x2247   :  { %v3194_v63 = vcombine.high %v3193_v36, %v3193_v36  ;;  %v3201_v37 = vrot.slane %v3193_v36, %v6325_v18 }
0x2249   :  { %v3208_v19 = vrot.slane %v3194_v63, %v6325_v18  ;;  %v3212_v13 = vrot.slane %v3201_v37, %v6313_v31 }
0x224b   :  { %v3220_v54 = vadd.f32 %v3212_v13, %v6338_v46  ;;  %v3219_v5 = vadd.f32 %v3212_v13, %v6340_v33  ;;  %v3216_v15 = vrot.slane %v3208_v19, %v6313_v31 }
0x224d   :  { %v3224_v8 = vmax.f32 %v3220_v54, 0.0  ;;  %v3223_v52 = vmax.f32 %v3219_v5, 0.0  ;;  %v3221_v12 = vadd.f32 %v3216_v15, %v6346_v43  ;;  %v3222_v20 = vadd.f32 %v3216_v15, %v6344_v49 }
0x224f   :  { %v3228_v2 = vmul.f32 %v6741_v26, %v3224_v8  ;;  %v3227_v59 = vmul.f32 %v6741_v26, %v3223_v52  ;;  %v3225_v56 = vmax.f32 %v3221_v12, 0.0  ;;  %v3226_v27 = vmax.f32 %v3222_v20, 0.0 }
0x2251   :  { %v3234_v16 = vsel %vm970_vm3, %v3228_v2, 0.0  ;;  %v3231_v23 = vsel %vm970_vm3, %v3227_v59, 0.0  ;;  %v3229_v60 = vmul.f32 %v6741_v26, %v3225_v56  ;;  %v3230_v63 = vmul.f32 %v6741_v26, %v3226_v27 }
0x2252   :  { %3235 = vadd.xlane.f32.xlu1 %v3234_v16  ;;  %3232 = vadd.xlane.f32.xlu0 %v3231_v23 }
0x2253   :  { %v3237_v36 = vsel %vm970_vm3, %v3229_v60, 0.0  ;;  %v3240_v37 = vsel %vm970_vm3, %v3230_v63, 0.0 }
0x2256   :  { %3238 = vadd.xlane.f32.xlu0 %v3237_v36 }
0x225a   :  { %3241 = vadd.xlane.f32.xlu0 %v3240_v37 }
0x22df   :  { %v3233_v19 = vpop.xlane.xlu0 %3232  ;;  %v3236_v13 = vpop.xlane.xlu1 %3235 }
0x22e0   :  { %v3254_v5 = vrot.slane %v3236_v13, %v6370_v14  ;;  %v3250_v15 = vrot.slane %v3233_v19, %v6374_v17 }
0x22e2   :  { %v3255_v20 = vsel %vm1465_vm6, %v3254_v5, %v3250_v15 }
0x22e3   :  { %v3239_v54 = vpop.xlane.xlu0 %3238 }
0x22e4   :  { %v3259_v52 = vrot.slane %v3239_v54, %v6374_v17 }
0x22e7   :  { %v3242_v8 = vpop.xlane.xlu0 %3241 }
0x22e8   :  { %v3263_v12 = vrot.slane %v3242_v8, %v6370_v14 }
0x22ea   :  { %v3264_v2 = vsel %vm1465_vm6, %v3263_v12, %v3259_v52 }
0x22eb   :  { %v3265_v59 = vsel %vm1005_vm4, %v3264_v2, %v3255_v20 }
0x22ec   :  { %v3267_v56 = vsel %vm1478_vm7, %v3265_v59, -inf }
0x22ed   :  { %3268 = vmax.xlane.f32.xlu0 %v3267_v56 }
0x237a   :  { %v3269_v16 = vpop.xlane.xlu0 %3268 }
0x237b   :  { %v3274_v23 = vrot.slane %v3269_v16, %v6313_v31  ;;  %v3278_v60 = vrot.slane %v3269_v16, %v6387_v28 }
0x237d   :  { %v3281_v27 = vsub.f32 %v3233_v19, %v3274_v23  ;;  %v3282_v36 = vsub.f32 %v3236_v13, %v3274_v23  ;;  %v3283_v63 = vsub.f32 %v3239_v54, %v3278_v60  ;;  %v3284_v22 = vsub.f32 %v3242_v8, %v3278_v60 }
0x237f   :  { %v3285_v37 = vmul.f32 1.442695, %v3281_v27  ;;  %v3287_v6 = vmul.f32 1.442695, %v3282_v36  ;;  %v3289_v5 = vmul.f32 1.442695, %v3283_v63  ;;  %v3178_v36 = vadd.f32 %v6842_v51, %v6447_v58 }
0x2380   :  { %v3291_v15 = vmul.f32 1.442695, %v3284_v22 }
0x2381   :  { %5504 = vpow2.f32 %v3285_v37 }
0x2382   :  { %5506 = vpow2.f32 %v3287_v6 }
0x2383   :  { %5508 = vpow2.f32 %v3289_v5 }
0x2384   :  { %5510 = vpow2.f32 %v3291_v15 }
0x238b   :  { %v5505_v52 = vpop.eup %5504 }
0x238c   :  { %v5507_v12 = vpop.eup %5506  ;;  %3298 = vperm.xlu0 %5407, %v5505_v52  }
0x238d   :  { %3301 = vperm.xlu1 %5406, %v5507_v12   ;;  %v5509_v20 = vpop.eup %5508 }
0x238e   :  { %v5511_v2 = vpop.eup %5510 }
0x2391   :  { %3304 = vperm.xlu1 %5406, %v5509_v20  }
0x2395   :  { %3307 = vperm.xlu1 %5406, %v5511_v2  }
0x240b   :  { %v3299_v13 = vpop.permute.xlu0 %3298 }
0x240c   :  { %v3302_v19 = vpop.permute.xlu1 %3301  ;;  %v3312_v8 = vrot.slane %v3299_v13, %v6374_v17 }
0x240d   :  { %v3316_v59 = vrot.slane %v3302_v19, %v6370_v14 }
0x240f   :  { %v3317_v16 = vsel %vm1465_vm6, %v3316_v59, %v3312_v8 }
0x2410   :  { %v3305_v54 = vpop.permute.xlu1 %3304 }
0x2411   :  { %v3321_v56 = vrot.slane %v3305_v54, %v6374_v17 }
0x2414   :  { %v3308_v6 = vpop.permute.xlu1 %3307 }
0x2415   :  { %v3325_v22 = vrot.slane %v3308_v6, %v6370_v14 }
0x2417   :  { %v3326_v23 = vsel %vm1465_vm6, %v3325_v22, %v3321_v56 }
0x2418   :  { %v3327_v60 = vsel %vm1005_vm4, %v3326_v23, %v3317_v16 }
0x2419   :  { %v3329_v27 = vsel %vm1478_vm7, %v3327_v60, 0.0 }
0x241a   :  { %3330 = vadd.xlane.f32.xlu0 %v3329_v27 }
0x2430   :  { %3477 = vrot.lane.b32.xlu0 %v3178_v36, %s5645_s28 }
0x24a7   :  { %v3331_v63 = vpop.xlane.xlu0 %3330 }
0x24a8   :  { %v3336_v37 = vrot.slane %v3331_v63, %v6313_v31  ;;  %v3340_v5 = vrot.slane %v3331_v63, %v6387_v28 }
0x24aa   :  { %5512 = vrcp.f32 %v3336_v37 }
0x24ab   :  { %5514 = vrcp.f32 %v3340_v5 }
0x24b4   :  { %v5513_v15 = vpop.eup %5512 }
0x24b5   :  { %v3344_v19 = vmul.f32 %v5513_v15, %v5505_v52  ;;  %v3345_v13 = vmul.f32 %v5513_v15, %v5507_v12  ;;  %v5515_v54 = vpop.eup %5514 }
0x24b6   :  { %v3347_v59 = vmul.f32 %v5515_v54, %v5509_v20  ;;  %v3348_v8 = vmul.f32 %v5515_v54, %v5511_v2 }
0x24b7   :  { %3351 = vperm.xlu1 %5406, %v3344_v19  }
0x24bb   :  { %3356 = vperm.xlu1 %5406, %v3345_v13  }
0x24bf   :  { %3361 = vperm.xlu1 %5406, %v3347_v59  }
0x24c3   :  { %3366 = vperm.xlu1 %5406, %v3348_v8  }
0x2536   :  { %v3352_v51 = vpop.permute.xlu1 %3351 }
0x2537   :  { %v3369_v6 = vmul.f32 %v3352_v51, %v6230_v29  ;;  %v3526_v22 = vrot.slane %v3352_v51, %v6374_v17 }
0x2539   :  { %v3373_v52 = vsel %vm970_vm3, %v3369_v6, 0.0 }
0x253a   :  { %v3357_v56 = vpop.permute.xlu1 %3356 }
0x253b   :  { %v3370_v16 = vmul.f32 %v3357_v56, %v6232_v32  ;;  %v3530_v23 = vrot.slane %v3357_v56, %v6370_v14 }
0x253d   :  { %v3374_v12 = vsel %vm970_vm3, %v3370_v16, 0.0  ;;  %v3531_v60 = vsel %vm1465_vm6, %v3530_v23, %v3526_v22 }
0x253e   :  { %v3375_v20 = vadd.f32 %v3374_v12, %v3373_v52  ;;  %v3362_v27 = vpop.permute.xlu1 %3361 }
0x253f   :  { %v3371_v36 = vmul.f32 %v3362_v27, %v6238_v39  ;;  %v3535_v5 = vrot.slane %v3362_v27, %v6374_v17 }
0x2540   :  { %v3376_v2 = vrot.slane %v3375_v20, 4 }
0x2541   :  { %v3382_v13 = vsel %vm970_vm3, %v3371_v36, 0.0 }
0x2542   :  { %v3377_v63 = vadd.f32 %v3376_v2, %v3375_v20  ;;  %v3367_v37 = vpop.permute.xlu1 %3366 }
0x2543   :  { %v3372_v15 = vmul.f32 %v3367_v37, %v6240_v45  ;;  %v3539_v19 = vrot.slane %v3367_v37, %v6370_v14  ;;  %v4754_v37 = vmul.f32 -1.442695, %v6840_v7 }
0x2544   :  { %v3378_v8 = vrot.slane %v3377_v63, 2 }
0x2545   :  { %v3383_v54 = vsel %vm970_vm3, %v3372_v15, 0.0  ;;  %v3540_v59 = vsel %vm1465_vm6, %v3539_v19, %v3535_v5  ;;  %5516 = vpow2.f32 %v4754_v37  ;;  %v7321_v37 = vmov 0  }
0x2546   :  { %v3384_v51 = vadd.f32 %v3383_v54, %v3382_v13  ;;  %v6900_v6 = vsel %vm1005_vm4, %v3540_v59, %v3531_v60  ;;  %v3379_v16 = vadd.f32 %v3378_v8, %v3377_v63  ;;  %v3478_v8 = vpop.permute.xlu0 %3477 }
0x2548   :  { %v3385_v56 = vrot.slane %v3384_v51, 4  ;;  %v3380_v52 = vrot.slane %v3379_v16, 1 }
0x254a   :  { %v3386_v22 = vadd.f32 %v3385_v56, %v3384_v51  ;;  %v3381_v27 = vadd.f32 %v3380_v52, %v3379_v16 }
0x254c   :  { %v3387_v23 = vrot.slane %v3386_v22, 2 }
0x254e   :  { %v3388_v12 = vadd.f32 %v3387_v23, %v3386_v22 }
0x254f   :  { %v5517_v5 = vpop.eup %5516 }
0x2550   :  { %v3389_v20 = vrot.slane %v3388_v12, 1  ;;  %v3183_v15 = vadd.f32 1.0, %v5517_v5 }
0x2552   :  { %v3390_v2 = vadd.f32 %v3389_v20, %v3388_v12  ;;  %5518 = vrcp.f32 %v3183_v15  ;;  %v6921_v20 = vld [vmem:[%s7315_s0 + $0x8] sm:$0x3f]  ;;  %v7322_v15 = vrot.slane %v6812_v38, 6 }
0x2553   :  { %vm3509_vm12 = vcmp.gt.f32.partialorder %v6921_v20, 0.5 }
0x2554   :  { %v3393_v36 = vsel %vm1005_vm4, %v3390_v2, %v3381_v27  ;;  %v3510_v5 = vsel %vm3509_vm12, 1, %v7321_v37 }
0x2555   :  { %3394 = vrot.lane.b32.xlu1 %v3393_v36, %s5643_s5 }
0x255c   :  { %v5519_v60 = vpop.eup %5518 }
0x25c7   :  { %v3395_v19 = vpop.permute.xlu1 %3394 }
0x25c8   :  { %v3397_v13 = vmul.f32 %v5519_v60, %v3395_v19  ;;  %v6931_v60 = vsel %vm1724_vm10, %v6817_v48, %v7322_v15  ;;  %vm4580_vm10 = vcmask 7168  }
0x25c9   :  { %v3490_v19 = vrot.slane %v6931_v60, 6 }
0x25ca   :  { %3399 = vrot.lane.b32.xlu1 %v3397_v13, %s5644_s14 }
0x25ce   :  { %3475 = vrot.lane.b32.xlu1 %v6840_v7, %s5645_s28 }
0x263c   :  { %v3400_v63 = vpop.permute.xlu1 %3399 }
0x263d   :  { %5162 = vmatmul.mubr.msk.f32.vlgmr.msra.gmra.mrb[36].mxu1 %vm970_vm3, %v3400_v63 }
0x263e   :  { %5359 = vmatpush3.bf16.msra.mxu1 %v6430_v34  ;;  %5172 = vmatprep.mubr.msk.f32.mxu1 %vm5639_vm2, %v7318_v3 }
0x263f   :  { %5360 = vmatprep.subr.bf16.mxu1 %v7319_v57 }
0x2640   :  { %v3476_v54 = vpop.permute.xlu1 %3475 }
0x2641   :  { %v3479_v56 = vsel %vm1691_vm8, %v3476_v54, %v3478_v8 }
0x2642   :  { %5362 = vmatpush3.bf16.msra.mxu1 %v6438_v44 }
0x2643   :  { %5371 = vmatprep.subr.bf16.mxu1 %v7319_v57 }
0x2710   :  { %v3469_v59 = vpop.f32.mrb[36].mxu1 }
0x2711   :  { %v3473_v51 = vadd.f32 %v3469_v59, %v6306_v24  ;;  %v5163_v7 = vpop.f32.mrb[37].mxu1 }
0x2713   :  { %v3481_v22 = vadd.f32 %v3479_v56, %v3473_v51 }
0x2715   :  { %5520 = vtanh.f32 %v3481_v22  ;;  %v4756_v23 = vmul.f32 -1.442695, %v3481_v22 }
0x2717   :  { %5522 = vpow2.f32 %v4756_v23 }
0x271f   :  { %v5521_v16 = vpop.eup %5520 }
0x2720   :  { %3494 = vrot.lane.b32.xlu1 %v5521_v16, %s5645_s28 }
0x2721   :  { %v5523_v52 = vpop.eup %5522 }
0x2722   :  { %v3485_v12 = vadd.f32 1.0, %v5523_v52 }
0x2724   :  { %5524 = vrcp.f32 %v3485_v12 }
0x272e   :  { %v5525_v27 = vpop.eup %5524 }
0x272f   :  { %v3492_v13 = vmul.f32 %v5525_v27, %v3490_v19 }
0x2792   :  { %v3495_v2 = vpop.permute.xlu1 %3494 }
0x2793   :  { %v3497_v36 = vmul.f32 %v5525_v27, %v3495_v2 }
0x2795   :  { %3499 = vrot.lane.b32.xlu1 %v3497_v36, %s5643_s5 }
0x2799   :  { %3512 = vperm.xlu1 %5406, %v3510_v5  }
0x2807   :  { %v3500_v63 = vpop.permute.xlu1 %3499 }
0x2808   :  { %v6936_v54 = vadd.f32 %v3500_v63, %v3492_v13 }
0x280a   :  { %5526 = vtanh.f32 %v6936_v54 }
0x2814   :  { %v5527_v59 = vpop.eup %5526 }
0x2815   :  { %3505 = vrot.lane.b32.xlu1 %v5527_v59, %s5645_s28 }
0x2818   :  { %v6940_v8 = vpop.permute.xlu1 %3512 }
0x2819   :  { %vm3514_vm13 = vcmp.eq.s32.totalorder %v6940_v8, 1  ;;  %v4438_v8 = vld [vmem:[%s7281_s17 + $0x8] sm:$0xff] }
0x2887   :  { %v3506_v38 = vpop.permute.xlu1 %3505 }
0x2888   :  { %v6942_v51 = vmul.f32 %v5525_v27, %v3506_v38 }
0x288a   :  { %v6950_v48 = vsel %vm3514_vm13, %v6942_v51, %v7323_v30 }
0x288b   :  { %3551 = vrot.lane.b32.xlu1 %v6950_v48, %s5643_s5  ;;  %v3960_v60 = vrot.slane %v6950_v48, 6 }
0x28fd   :  { %v3552_v7 = vpop.permute.xlu1 %3551 }
0x28fe   :  { %4757 = vmatmul.mubr.msk.f32.vlgmr.msra.gmra.mrb[70].mxu0 %vm970_vm3, %v3552_v7 }
0x28ff   :  { %5366 = vmatpush1.bf16.msra.mxu0 %v6223_v9  ;;  %4064 = vmatprep.mubr.f32.mxu0 %v7318_v3 }
0x2900   :  { %5368 = vmatprep.subr.bf16.mxu0 %v6225_v10 }
0x2903   :  { %5370 = vmatpush1.bf16.msra.mxu0 %v6285_v11 }
0x29d1   :  { %v3621_v21 = vpop.f32.mrb[70].mxu0 }
0x29d2   :  { %v6960_v56 = vadd.f32 %v3621_v21, %v6322_v35  ;;  %v6962_v22 = vpop.f32.mrb[71].mxu0 }
0x29d4   :  { %v3639_v16 = vrot.slane %v6960_v56, %v6325_v18 }
0x29d6   :  { %v3640_v23 = vcombine.high %v3639_v16, %v3639_v16  ;;  %v3647_v52 = vrot.slane %v3639_v16, %v6325_v18 }
0x29d8   :  { %v3654_v9 = vrot.slane %v3640_v23, %v6325_v18  ;;  %v3658_v12 = vrot.slane %v3647_v52, %v6313_v31 }
0x29da   :  { %v3666_v10 = vadd.f32 %v3658_v12, %v6338_v46  ;;  %v3665_v11 = vadd.f32 %v3658_v12, %v6340_v33  ;;  %v3662_v27 = vrot.slane %v3654_v9, %v6313_v31 }
0x29dc   :  { %v3670_v2 = vmax.f32 %v3666_v10, 0.0  ;;  %v3669_v36 = vmax.f32 %v3665_v11, 0.0  ;;  %v3668_v37 = vadd.f32 %v3662_v27, %v6344_v49  ;;  %v3667_v5 = vadd.f32 %v3662_v27, %v6346_v43 }
0x29de   :  { %v3674_v15 = vmul.f32 %v6741_v26, %v3670_v2  ;;  %v3673_v13 = vmul.f32 %v6741_v26, %v3669_v36  ;;  %v3672_v63 = vmax.f32 %v3668_v37, 0.0  ;;  %v3671_v59 = vmax.f32 %v3667_v5, 0.0 }
0x29e0   :  { %v3680_v38 = vsel %vm970_vm3, %v3674_v15, 0.0  ;;  %v3677_v30 = vsel %vm970_vm3, %v3673_v13, 0.0  ;;  %v3676_v7 = vmul.f32 %v6741_v26, %v3672_v63  ;;  %v3675_v21 = vmul.f32 %v6741_v26, %v3671_v59 }
0x29e1   :  { %3681 = vadd.xlane.f32.xlu0 %v3680_v38  ;;  %3678 = vadd.xlane.f32.xlu1 %v3677_v30 }
0x29e2   :  { %v3686_v16 = vsel %vm970_vm3, %v3676_v7, 0.0  ;;  %v3683_v23 = vsel %vm970_vm3, %v3675_v21, 0.0 }
0x29e5   :  { %3687 = vadd.xlane.f32.xlu1 %v3686_v16  ;;  %3684 = vadd.xlane.f32.xlu0 %v3683_v23 }
0x2a6e   :  { %v3682_v52 = vpop.xlane.xlu0 %3681  ;;  %v3679_v9 = vpop.xlane.xlu1 %3678 }
0x2a6f   :  { %v3700_v12 = vrot.slane %v3682_v52, %v6370_v14  ;;  %v3696_v10 = vrot.slane %v3679_v9, %v6374_v17 }
0x2a71   :  { %v3701_v36 = vsel %vm1465_vm6, %v3700_v12, %v3696_v10 }
0x2a72   :  { %v3688_v11 = vpop.xlane.xlu1 %3687  ;;  %v3685_v27 = vpop.xlane.xlu0 %3684 }
0x2a73   :  { %v3709_v2 = vrot.slane %v3688_v11, %v6370_v14  ;;  %v3705_v26 = vrot.slane %v3685_v27, %v6374_v17 }
0x2a75   :  { %v3710_v37 = vsel %vm1465_vm6, %v3709_v2, %v3705_v26 }
0x2a76   :  { %v3711_v5 = vsel %vm1005_vm4, %v3710_v37, %v3701_v36 }
0x2a77   :  { %v3713_v15 = vsel %vm1478_vm7, %v3711_v5, -inf }
0x2a78   :  { %3714 = vmax.xlane.f32.xlu0 %v3713_v15 }
0x2b05   :  { %v3715_v13 = vpop.xlane.xlu0 %3714 }
0x2b06   :  { %v3720_v63 = vrot.slane %v3715_v13, %v6313_v31  ;;  %v3724_v59 = vrot.slane %v3715_v13, %v6387_v28 }
0x2b08   :  { %v3727_v38 = vsub.f32 %v3679_v9, %v3720_v63  ;;  %v3728_v30 = vsub.f32 %v3682_v52, %v3720_v63  ;;  %v3729_v7 = vsub.f32 %v3685_v27, %v3724_v59  ;;  %v3730_v23 = vsub.f32 %v3688_v11, %v3724_v59 }
0x2b0a   :  { %v3731_v21 = vmul.f32 1.442695, %v3727_v38  ;;  %v3733_v16 = vmul.f32 1.442695, %v3728_v30  ;;  %v3735_v12 = vmul.f32 1.442695, %v3729_v7 }
0x2b0b   :  { %v3737_v10 = vmul.f32 1.442695, %v3730_v23 }
0x2b0c   :  { %5528 = vpow2.f32 %v3731_v21 }
0x2b0d   :  { %5530 = vpow2.f32 %v3733_v16 }
0x2b0e   :  { %5532 = vpow2.f32 %v3735_v12 }
0x2b0f   :  { %5534 = vpow2.f32 %v3737_v10 }
0x2b16   :  { %v5529_v2 = vpop.eup %5528 }
0x2b17   :  { %v5531_v26 = vpop.eup %5530  ;;  %3744 = vperm.xlu1 %5406, %v5529_v2  }
0x2b18   :  { %3747 = vperm.xlu0 %5407, %v5531_v26   ;;  %v5533_v36 = vpop.eup %5532 }
0x2b19   :  { %v5535_v37 = vpop.eup %5534 }
0x2b1b   :  { %3750 = vperm.xlu1 %5406, %v5533_v36  }
0x2b1f   :  { %3753 = vperm.xlu1 %5406, %v5535_v37  }
0x2b96   :  { %v3745_v9 = vpop.permute.xlu1 %3744 }
0x2b97   :  { %v3748_v52 = vpop.permute.xlu0 %3747  ;;  %v3758_v11 = vrot.slane %v3745_v9, %v6374_v17 }
0x2b98   :  { %v3762_v5 = vrot.slane %v3748_v52, %v6370_v14 }
0x2b9a   :  { %v3751_v27 = vpop.permute.xlu1 %3750  ;;  %v3763_v59 = vsel %vm1465_vm6, %v3762_v5, %v3758_v11 }
0x2b9b   :  { %v3767_v13 = vrot.slane %v3751_v27, %v6374_v17 }
0x2b9e   :  { %v3754_v15 = vpop.permute.xlu1 %3753 }
0x2b9f   :  { %v3771_v63 = vrot.slane %v3754_v15, %v6370_v14 }
0x2ba1   :  { %v3772_v38 = vsel %vm1465_vm6, %v3771_v63, %v3767_v13 }
0x2ba2   :  { %v3773_v30 = vsel %vm1005_vm4, %v3772_v38, %v3763_v59 }
0x2ba3   :  { %v3775_v7 = vsel %vm1478_vm7, %v3773_v30, 0.0 }
0x2ba4   :  { %3776 = vadd.xlane.f32.xlu0 %v3775_v7 }
0x2c31   :  { %v3777_v21 = vpop.xlane.xlu0 %3776 }
0x2c32   :  { %v3782_v16 = vrot.slane %v3777_v21, %v6313_v31  ;;  %v3786_v23 = vrot.slane %v3777_v21, %v6387_v28 }
0x2c34   :  { %5536 = vrcp.f32 %v3782_v16 }
0x2c35   :  { %5538 = vrcp.f32 %v3786_v23 }
0x2c3e   :  { %v5537_v12 = vpop.eup %5536 }
0x2c3f   :  { %v3790_v10 = vmul.f32 %v5537_v12, %v5529_v2  ;;  %v3791_v9 = vmul.f32 %v5537_v12, %v5531_v26  ;;  %v5539_v52 = vpop.eup %5538 }
0x2c40   :  { %v3793_v27 = vmul.f32 %v5539_v52, %v5533_v36  ;;  %v3794_v5 = vmul.f32 %v5539_v52, %v5535_v37 }
0x2c41   :  { %3797 = vperm.xlu1 %5406, %v3790_v10  }
0x2c45   :  { %3802 = vperm.xlu1 %5406, %v3791_v9  }
0x2c49   :  { %3807 = vperm.xlu1 %5406, %v3793_v27  }
0x2c4d   :  { %3812 = vperm.xlu1 %5406, %v3794_v5  }
0x2cc0   :  { %v3798_v11 = vpop.permute.xlu1 %3797 }
0x2cc1   :  { %v3815_v15 = vmul.f32 %v3798_v11, %v6230_v29  ;;  %v3967_v63 = vrot.slane %v3798_v11, %v6374_v17 }
0x2cc3   :  { %v3819_v2 = vsel %vm970_vm3, %v3815_v15, 0.0 }
0x2cc4   :  { %v3803_v13 = vpop.permute.xlu1 %3802 }
0x2cc5   :  { %v3816_v59 = vmul.f32 %v3803_v13, %v6232_v32  ;;  %v3971_v38 = vrot.slane %v3803_v13, %v6370_v14 }
0x2cc7   :  { %v3820_v26 = vsel %vm970_vm3, %v3816_v59, 0.0  ;;  %v3972_v30 = vsel %vm1465_vm6, %v3971_v38, %v3967_v63 }
0x2cc8   :  { %v3821_v36 = vadd.f32 %v3820_v26, %v3819_v2  ;;  %v3808_v7 = vpop.permute.xlu1 %3807 }
0x2cc9   :  { %v3817_v21 = vmul.f32 %v3808_v7, %v6238_v39  ;;  %v3976_v12 = vrot.slane %v3808_v7, %v6374_v17 }
0x2cca   :  { %v3822_v37 = vrot.slane %v3821_v36, 4 }
0x2ccb   :  { %v3828_v52 = vsel %vm970_vm3, %v3817_v21, 0.0 }
0x2ccc   :  { %v3823_v16 = vadd.f32 %v3822_v37, %v3821_v36  ;;  %v3813_v23 = vpop.permute.xlu1 %3812 }
0x2ccd   :  { %v3818_v10 = vmul.f32 %v3813_v23, %v6240_v45  ;;  %v3980_v9 = vrot.slane %v3813_v23, %v6370_v14 }
0x2cce   :  { %v3824_v11 = vrot.slane %v3823_v16, 2 }
0x2ccf   :  { %v3829_v27 = vsel %vm970_vm3, %v3818_v10, 0.0  ;;  %v3981_v5 = vsel %vm1465_vm6, %v3980_v9, %v3976_v12  ;;  %v4758_v12 = vmul.f32 -1.442695, %v6960_v56 }
0x2cd0   :  { %v3830_v15 = vadd.f32 %v3829_v27, %v3828_v52  ;;  %v7017_v13 = vsel %vm2195_vm14, %v3981_v5, %v3972_v30  ;;  %v3825_v59 = vadd.f32 %v3824_v11, %v3823_v16  ;;  %v3924_v27 = vrot.slane %v6960_v56, 6 }
0x2cd1   :  { %5540 = vpow2.f32 %v4758_v12  ;;  %v3624_v5 = vadd.f32 %v6962_v22, %v6447_v58 }
0x2cd2   :  { %v3831_v63 = vrot.slane %v3830_v15, 4  ;;  %v3826_v36 = vrot.slane %v3825_v59, 1 }
0x2cd3   :  { %v3925_v11 = vrot.slane %v3624_v5, 6 }
0x2cd4   :  { %v3832_v38 = vadd.f32 %v3831_v63, %v3830_v15  ;;  %v3827_v37 = vadd.f32 %v3826_v36, %v3825_v59 }
0x2cd6   :  { %v3833_v2 = vrot.slane %v3832_v38, 2 }
0x2cd8   :  { %v3834_v26 = vadd.f32 %v3833_v2, %v3832_v38 }
0x2cda   :  { %v3835_v7 = vrot.slane %v3834_v26, 1 }
0x2cdb   :  { %v5541_v10 = vpop.eup %5540 }
0x2cdc   :  { %v3836_v23 = vadd.f32 %v3835_v7, %v3834_v26  ;;  %v3629_v9 = vadd.f32 1.0, %v5541_v10 }
0x2cde   :  { %v3839_v21 = vsel %vm1005_vm4, %v3836_v23, %v3827_v37  ;;  %5542 = vrcp.f32 %v3629_v9 }
0x2cdf   :  { %3840 = vrot.lane.b32.xlu1 %v3839_v21, %s5643_s5  ;;  %v7043_v21 = vsel %vm3514_vm13, %v6936_v54, %v3490_v19 }
0x2ce0   :  { %v3941_v12 = vrot.slane %v7043_v21, 6 }
0x2ce8   :  { %v5543_v30 = vpop.eup %5542 }
0x2d51   :  { %v3841_v52 = vpop.permute.xlu1 %3840 }
0x2d52   :  { %v3843_v16 = vmul.f32 %v5543_v30, %v3841_v52 }
0x2d54   :  { %3845 = vrot.lane.b32.xlu1 %v3843_v16, %s5644_s14 }
0x2d58   :  { %3926 = vrot.lane.b32.xlu1 %v3924_v27, %s5645_s28 }
0x2d5c   :  { %3928 = vrot.lane.b32.xlu1 %v3925_v11, %s5645_s28 }
0x2dc6   :  { %v3846_v15 = vpop.permute.xlu1 %3845 }
0x2dc7   :  { %5173 = vmatmul.mubr.msk.f32.vlgmr.msra.gmra.mrb[38].mxu1 %vm970_vm3, %v3846_v15 }
0x2dc8   :  { %5373 = vmatpush3.bf16.msra.mxu1 %v6430_v34  ;;  %5183 = vmatprep.mubr.msk.f32.mxu1 %vm5639_vm2, %v7318_v3  ;;  %vm1761_vm2 = vcmask 254976  }
0x2dc9   :  { %5374 = vmatprep.subr.bf16.mxu1 %v7319_v57 }
0x2dca   :  { %v3927_v56 = vpop.permute.xlu1 %3926 }
0x2dcc   :  { %5376 = vmatpush3.bf16.msra.mxu1 %v6438_v44 }
0x2dce   :  { %v3929_v22 = vpop.permute.xlu1 %3928 }
0x2dcf   :  { %v3930_v26 = vsel %vm1691_vm8, %v3927_v56, %v3929_v22 }
0x2e9a   :  { %v3915_v63 = vpop.f32.mrb[38].mxu1 }
0x2e9b   :  { %v3920_v59 = vrot.slane %v3915_v63, 6  ;;  %v5174_v38 = vpop.f32.mrb[39].mxu1 }
0x2e9d   :  { %v3922_v2 = vadd.f32 %v3920_v59, %v6306_v24 }
0x2e9f   :  { %v3932_v36 = vadd.f32 %v3930_v26, %v3922_v2 }
0x2ea1   :  { %5544 = vtanh.f32 %v3932_v36  ;;  %v4760_v34 = vmul.f32 -1.442695, %v3932_v36 }
0x2ea3   :  { %5546 = vpow2.f32 %v4760_v34 }
0x2eab   :  { %v5545_v7 = vpop.eup %5544 }
0x2eac   :  { %3945 = vrot.lane.b32.xlu0 %v5545_v7, %s5645_s28 }
0x2ead   :  { %v5547_v3 = vpop.eup %5546 }
0x2eae   :  { %v3936_v57 = vadd.f32 1.0, %v5547_v3 }
0x2eb0   :  { %5548 = vrcp.f32 %v3936_v57  ;;  %v5587_v57 = vld [vmem:[%s7277_s13] ss:$0 sm:$0xff] }
0x2eba   :  { %v5549_v44 = vpop.eup %5548 }
0x2ebb   :  { %v3943_v10 = vmul.f32 %v5549_v44, %v3941_v12 }
0x2f1e   :  { %v3946_v37 = vpop.permute.xlu0 %3945 }
0x2f1f   :  { %v3948_v23 = vmul.f32 %v5549_v44, %v3946_v37 }
0x2f21   :  { %3950 = vrot.lane.b32.xlu1 %v3948_v23, %s5643_s5 }
0x2f93   :  { %v3951_v9 = vpop.permute.xlu1 %3950 }
0x2f94   :  { %v7048_v30 = vadd.f32 %v3951_v9, %v3943_v10 }
0x2f96   :  { %5550 = vtanh.f32 %v7048_v30 }
0x2fa0   :  { %v5551_v52 = vpop.eup %5550 }
0x2fa1   :  { %3956 = vrot.lane.b32.xlu1 %v5551_v52, %s5645_s28 }
0x3013   :  { %v3957_v16 = vpop.permute.xlu1 %3956 }
0x3014   :  { %v7053_v27 = vmul.f32 %v5549_v44, %v3957_v16 }
0x3016   :  { %v3962_v19 = vsel %vm3514_vm13, %v7053_v27, %v3960_v60 }
0x3017   :  { %v3995_v54 = vrot.slane %v3962_v19, 2 }
0x3019   :  { %3996 = vrot.lane.b32.xlu1 %v3995_v54, %s5643_s5 }
0x308b   :  { %v3997_v5 = vpop.permute.xlu1 %3996 }
0x308c   :  { %4761 = vmatmul.mubr.msk.f32.vlgmr.msra.gmra.mrb[72].mxu0 %vm970_vm3, %v3997_v5 }
0x315f   :  { %v4066_v11 = vpop.f32.mrb[72].mxu0 }
0x3160   :  { %v7061_v15 = vadd.f32 %v4066_v11, %v6322_v35  ;;  %v7063_v56 = vpop.f32.mrb[73].mxu0 }
0x3162   :  { %v4084_v48 = vrot.slane %v7061_v15, %v6325_v18 }
0x3164   :  { %v4085_v63 = vcombine.high %v4084_v48, %v4084_v48  ;;  %v4092_v22 = vrot.slane %v4084_v48, %v6325_v18 }
0x3166   :  { %v4099_v59 = vrot.slane %v4085_v63, %v6325_v18  ;;  %v4103_v38 = vrot.slane %v4092_v22, %v6313_v31 }
0x3168   :  { %v4111_v2 = vadd.f32 %v4103_v38, %v6338_v46  ;;  %v4110_v26 = vadd.f32 %v4103_v38, %v6340_v33  ;;  %v4107_v36 = vrot.slane %v4099_v59, %v6313_v31 }
0x316a   :  { %v4115_v35 = vmax.f32 %v4111_v2, 0.0  ;;  %v4114_v7 = vmax.f32 %v4110_v26, 0.0  ;;  %v4113_v34 = vadd.f32 %v4107_v36, %v6344_v49  ;;  %v4112_v3 = vadd.f32 %v4107_v36, %v6346_v43 }
0x316c   :  { %v4119_v44 = vmul.f32 %v5587_v57, %v4115_v35  ;;  %v4118_v18 = vmul.f32 %v5587_v57, %v4114_v7  ;;  %v4117_v37 = vmax.f32 %v4113_v34, 0.0  ;;  %v4116_v23 = vmax.f32 %v4112_v3, 0.0 }
0x316e   :  { %v4125_v46 = vsel %vm970_vm3, %v4119_v44, 0.0  ;;  %v4122_v33 = vsel %vm970_vm3, %v4118_v18, 0.0  ;;  %v4121_v10 = vmul.f32 %v5587_v57, %v4117_v37  ;;  %v4120_v9 = vmul.f32 %v5587_v57, %v4116_v23 }
0x316f   :  { %4126 = vadd.xlane.f32.xlu0 %v4125_v46  ;;  %4123 = vadd.xlane.f32.xlu1 %v4122_v33 }
0x3170   :  { %v4131_v49 = vsel %vm970_vm3, %v4121_v10, 0.0  ;;  %v4128_v43 = vsel %vm970_vm3, %v4120_v9, 0.0 }
0x3173   :  { %4132 = vadd.xlane.f32.xlu0 %v4131_v49  ;;  %4129 = vadd.xlane.f32.xlu1 %v4128_v43 }
0x31fc   :  { %v4127_v52 = vpop.xlane.xlu0 %4126  ;;  %v4124_v16 = vpop.xlane.xlu1 %4123 }
0x31fd   :  { %v4145_v60 = vrot.slane %v4127_v52, %v6370_v14  ;;  %v4141_v19 = vrot.slane %v4124_v16, %v6374_v17 }
0x31ff   :  { %v4146_v63 = vsel %vm1465_vm6, %v4145_v60, %v4141_v19 }
0x3200   :  { %v4133_v54 = vpop.xlane.xlu0 %4132  ;;  %v4130_v5 = vpop.xlane.xlu1 %4129 }
0x3201   :  { %v4154_v11 = vrot.slane %v4133_v54, %v6370_v14  ;;  %v4150_v48 = vrot.slane %v4130_v5, %v6374_v17 }
0x3203   :  { %v4155_v22 = vsel %vm1465_vm6, %v4154_v11, %v4150_v48 }
0x3204   :  { %v4156_v59 = vsel %vm1005_vm4, %v4155_v22, %v4146_v63 }
0x3205   :  { %v4158_v38 = vsel %vm1478_vm7, %v4156_v59, -inf }
0x3206   :  { %4159 = vmax.xlane.f32.xlu1 %v4158_v38 }
0x3293   :  { %v4160_v2 = vpop.xlane.xlu1 %4159 }
0x3294   :  { %v4165_v26 = vrot.slane %v4160_v2, %v6313_v31  ;;  %v4169_v36 = vrot.slane %v4160_v2, %v6387_v28 }
0x3296   :  { %v4172_v35 = vsub.f32 %v4124_v16, %v4165_v26  ;;  %v4173_v7 = vsub.f32 %v4127_v52, %v4165_v26  ;;  %v4175_v34 = vsub.f32 %v4133_v54, %v4169_v36  ;;  %v4174_v3 = vsub.f32 %v4130_v5, %v4169_v36 }
0x3298   :  { %v4176_v57 = vmul.f32 1.442695, %v4172_v35  ;;  %v4178_v44 = vmul.f32 1.442695, %v4173_v7  ;;  %v4182_v18 = vmul.f32 1.442695, %v4175_v34 }
0x3299   :  { %v4180_v37 = vmul.f32 1.442695, %v4174_v3 }
0x329a   :  { %5552 = vpow2.f32 %v4176_v57 }
0x329b   :  { %5554 = vpow2.f32 %v4178_v44 }
0x329c   :  { %5556 = vpow2.f32 %v4182_v18 }
0x329d   :  { %5558 = vpow2.f32 %v4180_v37 }
0x32a4   :  { %v5553_v23 = vpop.eup %5552 }
0x32a5   :  { %v5555_v46 = vpop.eup %5554  ;;  %4189 = vperm.xlu0 %5407, %v5553_v23  }
0x32a6   :  { %4192 = vperm.xlu1 %5406, %v5555_v46   ;;  %v5557_v33 = vpop.eup %5556 }
0x32a7   :  { %v5559_v10 = vpop.eup %5558 }
0x32a9   :  { %4198 = vperm.xlu0 %5407, %v5557_v33  }
0x32aa   :  { %4195 = vperm.xlu1 %5406, %v5559_v10  }
0x3324   :  { %v4190_v9 = vpop.permute.xlu0 %4189 }
0x3325   :  { %v4193_v49 = vpop.permute.xlu1 %4192  ;;  %v4203_v52 = vrot.slane %v4190_v9, %v6374_v17 }
0x3326   :  { %v4207_v43 = vrot.slane %v4193_v49, %v6370_v14 }
0x3328   :  { %v4199_v16 = vpop.permute.xlu0 %4198  ;;  %v4208_v5 = vsel %vm1465_vm6, %v4207_v43, %v4203_v52 }
0x3329   :  { %v4196_v60 = vpop.permute.xlu1 %4195  ;;  %v4216_v19 = vrot.slane %v4199_v16, %v6370_v14 }
0x332a   :  { %v4212_v54 = vrot.slane %v4196_v60, %v6374_v17 }
0x332c   :  { %v4217_v11 = vsel %vm1465_vm6, %v4216_v19, %v4212_v54 }
0x332d   :  { %v4218_v48 = vsel %vm1005_vm4, %v4217_v11, %v4208_v5 }
0x332e   :  { %v4220_v63 = vsel %vm1478_vm7, %v4218_v48, 0.0 }
0x332f   :  { %4221 = vadd.xlane.f32.xlu1 %v4220_v63 }
0x33bc   :  { %v4222_v22 = vpop.xlane.xlu1 %4221 }
0x33bd   :  { %v4227_v59 = vrot.slane %v4222_v22, %v6313_v31  ;;  %v4231_v38 = vrot.slane %v4222_v22, %v6387_v28 }
0x33bf   :  { %5560 = vrcp.f32 %v4227_v59 }
0x33c0   :  { %5562 = vrcp.f32 %v4231_v38 }
0x33c9   :  { %v5561_v2 = vpop.eup %5560 }
0x33ca   :  { %v4235_v26 = vmul.f32 %v5561_v2, %v5553_v23  ;;  %v4236_v36 = vmul.f32 %v5561_v2, %v5555_v46  ;;  %v5563_v35 = vpop.eup %5562 }
0x33cb   :  { %v4238_v7 = vmul.f32 %v5563_v35, %v5559_v10  ;;  %v4239_v34 = vmul.f32 %v5563_v35, %v5557_v33 }
0x33cc   :  { %4242 = vperm.xlu0 %5407, %v4235_v26  }
0x33d0   :  { %4247 = vperm.xlu0 %5407, %v4236_v36  }
0x33d4   :  { %4252 = vperm.xlu0 %5407, %v4238_v7   ;;  %v4762_v7 = vmul.f32 -1.442695, %v7061_v15 }
0x33d6   :  { %5564 = vpow2.f32 %v4762_v7  ;;  %v2640_v7 = vrot.slane %v6670_v61, %v6370_v14  ;;  %v7324_v61 = vld [vmem:[#allocation11_spill] sm:$0xff] }
0x33d8   :  { %4257 = vperm.xlu0 %5407, %v4239_v34  }
0x33e0   :  { %v5565_v34 = vpop.eup %5564 }
0x344b   :  { %v4243_v3 = vpop.permute.xlu0 %4242 }
0x344c   :  { %v4260_v57 = vmul.f32 %v4243_v3, %v6230_v29  ;;  %v4408_v31 = vrot.slane %v4243_v3, %v6374_v17  ;;  %v4074_v3 = vadd.f32 1.0, %v5565_v34  ;;  %v1751_v34 = vrot.slane %v6415_v47, %v6370_v14  ;;  %v7325_v47 = vld [vmem:[#allocation12_spill] sm:$0xff] }
0x344e   :  { %v4264_v37 = vsel %vm970_vm3, %v4260_v57, 0.0  ;;  %5566 = vrcp.f32 %v4074_v3  ;;  %v2184_v3 = vrot.slane %v6545_v53, %v6370_v14 }
0x344f   :  { %v4248_v44 = vpop.permute.xlu0 %4247 }
0x3450   :  { %v4261_v18 = vmul.f32 %v4248_v44, %v6232_v32  ;;  %v4412_v28 = vrot.slane %v4248_v44, %v6370_v14 }
0x3452   :  { %v4265_v23 = vsel %vm970_vm3, %v4261_v18, 0.0  ;;  %v4413_v46 = vsel %vm1465_vm6, %v4412_v28, %v4408_v31  ;;  %v4369_v18 = vrot.slane %v7061_v15, 4  ;;  %v4069_v28 = vadd.f32 %v7063_v56, %v6447_v58 }
0x3453   :  { %v4266_v10 = vadd.f32 %v4265_v23, %v4264_v37  ;;  %v4253_v9 = vpop.permute.xlu0 %4252 }
0x3454   :  { %v4262_v49 = vmul.f32 %v4253_v9, %v6238_v39  ;;  %v4417_v52 = vrot.slane %v4253_v9, %v6374_v17  ;;  %v4370_v37 = vrot.slane %v4069_v28, 4  ;;  %v2180_v28 = vrot.slane %v7325_v47, %v6374_v17  ;;  %v5589_v47 = vld [vmem:[%s7315_s0 + $0x8] sm:$0x3f] }
0x3455   :  { %v4267_v33 = vrot.slane %v4266_v10, 4 }
0x3456   :  { %v4273_v60 = vsel %vm970_vm3, %v4262_v49, 0.0 }
0x3457   :  { %v4268_v43 = vadd.f32 %v4267_v33, %v4266_v10  ;;  %v4258_v29 = vpop.permute.xlu0 %4257 }
0x3458   :  { %v4263_v16 = vmul.f32 %v4258_v29, %v6240_v45  ;;  %v4421_v32 = vrot.slane %v4258_v29, %v6370_v14  ;;  %v5567_v57 = vpop.eup %5566 }
0x3459   :  { %v4269_v5 = vrot.slane %v4268_v43, 2 }
0x345a   :  { %v4274_v19 = vsel %vm970_vm3, %v4263_v16, 0.0  ;;  %v4422_v54 = vsel %vm1465_vm6, %v4421_v32, %v4417_v52 }
0x345b   :  { %v4275_v11 = vadd.f32 %v4274_v19, %v4273_v60  ;;  %v7117_v48 = vsel %vm2642_vm15, %v4422_v54, %v4413_v46  ;;  %v4270_v63 = vadd.f32 %v4269_v5, %v4268_v43 }
0x345d   :  { %v4276_v39 = vrot.slane %v4275_v11, 4  ;;  %v4271_v45 = vrot.slane %v4270_v63, 1 }
0x345f   :  { %v4277_v22 = vadd.f32 %v4276_v39, %v4275_v11  ;;  %v4272_v26 = vadd.f32 %v4271_v45, %v4270_v63 }
0x3461   :  { %v4278_v59 = vrot.slane %v4277_v22, 2 }
0x3463   :  { %v4279_v38 = vadd.f32 %v4278_v59, %v4277_v22  ;;  %v7169_v22 = vld [vmem:[%s7315_s0] sm:$0xff] }
0x3465   :  { %v4280_v2 = vrot.slane %v4279_v38, 1 }
0x3467   :  { %v4281_v36 = vadd.f32 %v4280_v2, %v4279_v38 }
0x3469   :  { %v4284_v35 = vsel %vm1005_vm4, %v4281_v36, %v4272_v26 }
0x346a   :  { %4285 = vrot.lane.b32.xlu0 %v4284_v35, %s5643_s5  ;;  %v2193_v35 = vrot.slane %v6555_v1, %v6370_v14  ;;  %v1742_v1 = vrot.slane %v6405_v50, %v6370_v14 }
0x34dc   :  { %v4286_v44 = vpop.permute.xlu0 %4285 }
0x34dd   :  { %v4288_v31 = vmul.f32 %v5567_v57, %v4286_v44  ;;  %v2189_v57 = vrot.slane %v6551_v62, %v6374_v17  ;;  %v2631_v44 = vrot.slane %v6660_v42, %v6370_v14  ;;  %v7327_v42 = vld [vmem:[#allocation10_spill] sm:$0xff]  ;;  %v2185_v14 = vsel %vm1465_vm6, %v2184_v3, %v2180_v28 }
0x34de   :  { %v4595_v28 = vsel %vm4582_vm9, %v5589_v47, 0.0 }
0x34df   :  { %4290 = vrot.lane.b32.xlu0 %v4288_v31, %s5644_s14  ;;  %v2636_v31 = vrot.slane %v6666_v55, %v6374_v17  ;;  %v2194_v53 = vsel %vm1465_vm6, %v2193_v35, %v2189_v57 }
0x34e3   :  { %4371 = vrot.lane.b32.xlu0 %v4369_v18, %s5645_s28  ;;  %v1747_v18 = vrot.slane %v7324_v61, %v6374_v17 }
0x34e5   :  { %v1752_v55 = vsel %vm1465_vm6, %v1751_v34, %v1747_v18  ;;  %v4594_v18 = vsel %vm4580_vm10, %v7169_v22, 0.0 }
0x34e7   :  { %4373 = vrot.lane.b32.xlu0 %v4370_v37, %s5645_s28  ;;  %v7326_v37 = vld [vmem:[#allocation13_spill] sm:$0xff] }
0x34e8   :  { %v2627_v62 = vrot.slane %v7326_v37, %v6374_v17 }
0x34ea   :  { %v2632_v50 = vsel %vm1465_vm6, %v2631_v44, %v2627_v62 }
0x3551   :  { %v4291_v23 = vpop.permute.xlu0 %4290 }
0x3552   :  { %5184 = vmatmul.mubr.msk.f32.vlgmr.msra.gmra.mrb[40].mxu1 %vm970_vm3, %v4291_v23  ;;  %v2641_v23 = vsel %vm1465_vm6, %v2640_v7, %v2636_v31 }
0x3555   :  { %v4372_v46 = vpop.permute.xlu0 %4371 }
0x3559   :  { %v4374_v9 = vpop.permute.xlu0 %4373 }
0x355a   :  { %v4375_v15 = vsel %vm1691_vm8, %v4372_v46, %v4374_v9  ;;  %v1738_v46 = vrot.slane %v7327_v42, %v6374_v17  ;;  %v2643_v9 = vsel %vm2642_vm15, %v2641_v23, %v2632_v50 }
0x3625   :  { %v4360_v10 = vpop.f32.mrb[40].mxu1 }
0x3626   :  { %v4365_v33 = vrot.slane %v4360_v10, 4  ;;  %v5185_v49 = vpop.f32.mrb[41].mxu1  ;;  %v2196_v10 = vsel %vm2195_vm14, %v2194_v53, %v2185_v14  ;;  %v4596_v53 = vadd.f32 %v4595_v28, %v4594_v18 }
0x3627   :  { %v1743_v49 = vsel %vm1465_vm6, %v1742_v1, %v1738_v46 }
0x3628   :  { %v4367_v43 = vadd.f32 %v4365_v33, %v6306_v24  ;;  %v3963_v24 = vsel %vm3514_vm13, %v7048_v30, %v3941_v12 }
0x3629   :  { %v4386_v54 = vrot.slane %v3963_v24, 6 }
0x362a   :  { %v4377_v29 = vadd.f32 %v4375_v15, %v4367_v43 }
0x362c   :  { %5568 = vtanh.f32 %v4377_v29  ;;  %v4764_v56 = vmul.f32 -1.442695, %v4377_v29  ;;  %v1753_v29 = vsel %vm1005_vm4, %v1752_v55, %v1743_v49  ;;  %vm4538_vm4 = vcmask 1045504  }
0x362e   :  { %5570 = vpow2.f32 %v4764_v56 }
0x3636   :  { %v5569_v58 = vpop.eup %5568 }
0x3637   :  { %4390 = vrot.lane.b32.xlu0 %v5569_v58, %s5645_s28 }
0x3638   :  { %v5571_v52 = vpop.eup %5570 }
0x3639   :  { %v4381_v16 = vadd.f32 1.0, %v5571_v52 }
0x363b   :  { %5572 = vrcp.f32 %v4381_v16 }
0x3645   :  { %v5573_v32 = vpop.eup %5572 }
0x3646   :  { %v4388_v5 = vmul.f32 %v5573_v32, %v4386_v54 }
0x36a9   :  { %v4391_v60 = vpop.permute.xlu0 %4390 }
0x36aa   :  { %v4393_v19 = vmul.f32 %v5573_v32, %v4391_v60 }
0x36ac   :  { %4395 = vrot.lane.b32.xlu1 %v4393_v19, %s5643_s5 }
0x36b0   :  { %3098 = vrot.lane.b32.xlu1 %v6822_v4, %s5643_s5 }
0x36b4   :  { %3990 = vrot.lane.b32.xlu1 %v7053_v27, %s5643_s5 }
0x36b8   :  { %3520 = vperm.xlu1 %5406, %v6921_v20   ;;  %v4437_v20 = vld [vmem:[%s7281_s17] sm:$0xff] }
0x36b9   :  { %v5377_v21 = vpack.c.bf16 %v4438_v8, %v4437_v20 }
0x36bb   :  { %5378 = vmatprep.subr.bf16.mxu0 %v5377_v21 }
0x36bc   :  { %5380 = vmatpush3.bf16.msra.mxu0 %v5377_v21 }
0x371e   :  { %v4396_v11 = vpop.permute.xlu1 %4395 }
0x371f   :  { %v4398_v39 = vadd.f32 %v4396_v11, %v4388_v5 }
0x3721   :  { %5574 = vtanh.f32 %v4398_v39 }
0x3722   :  { %v3099_v63 = vpop.permute.xlu1 %3098 }
0x3723   :  { %3102 = vst.msk [vmem:[#allocation2] sm:$0xc0] %vm3101_vm0, %v3099_v63 }
0x3726   :  { %v3991_v4 = vpop.permute.xlu1 %3990 }
0x3727   :  { %3993 = vst.msk [vmem:[#allocation2 + $0x8] sm:$0xc] %vm2207_vm1, %v3991_v4 }
0x372b   :  { %v5575_v27 = vpop.eup %5574 }
0x372c   :  { %4401 = vrot.lane.b32.xlu0 %v5575_v27, %s5645_s28  ;;  %s5646_s28 = smov [#allocation3]  }
0x372d   :  { %s4635_s4 = sshll.u32 %s5646_s28, 4  ;;  %s4636_s4 = int_to_ptr.vmem [resolvable:$true] %s4635_s4 }
0x372e   :  { %s5590_s29 = scalar_lea.vmem %s4636_s4, 256  ;;  %p5595_p1 = scmp.lt.s32.totalorder %s4636_s4, %s4636_s4 }
0x372f   :  { %p5591_p0 = scmp.ne.s32.totalorder %s4636_s4, %s5590_s29  ;;  %p5596_p2 = scmp.lt.s32.totalorder %s5590_s29, %s5590_s29 }
0x3730   :  { %1758 = vrot.lane.b32.xlu0 %v6481_v41, %s5643_s5  ;;  %v4439_v41 = vld [vmem:[%s7281_s17 + $0x10] sm:$0xff] }
0x3731   :  { %p5597_p3 = por %p5596_p2, %p5595_p1 }
0x3733   :  { %p5598_p4 = pnand %p5597_p3, %p5591_p0 }
0x3734   :  { %2204 = vrot.lane.b32.xlu0 %v6595_v40, %s5643_s5  ;;  %v4440_v40 = vld [vmem:[%s7281_s17 + $0x18] sm:$0xff] }
0x3737   :  { %v3521_v52 = vpop.permute.xlu1 %3520 }
0x3738   :  { %2651 = vrot.lane.b32.xlu0 %v6708_v0, %s5643_s5  ;;  %v5381_v0 = vpack.c.bf16 %v4440_v40, %v4439_v41  ;;  %v3984_v60 = vmul.f32 %v7017_v13, %v3521_v52  ;;  %v3543_v54 = vmul.f32 %v6900_v6, %v3521_v52  ;;  %v4425_v5 = vmul.f32 %v7117_v48, %v3521_v52  ;;  %v7328_v40 = vld [vmem:[#allocation9_spill] sm:$0xff] }
0x373a   :  { %5382 = vmatprep.subr.bf16.mxu0 %v5381_v0  ;;  %v3986_v39 = vrot.slane %v3984_v60, 2  ;;  %v4427_v4 = vrot.slane %v4425_v5, 4 }
0x373b   :  { %5384 = vmatpush3.bf16.msra.mxu0 %v5381_v0 }
0x373c   :  { %3546 = vrot.lane.b32.xlu0 %v6942_v51, %s5643_s5 }
0x379e   :  { %v4402_v51 = vpop.permute.xlu0 %4401 }
0x379f   :  { %v4404_v12 = vmul.f32 %v5573_v32, %v4402_v51 }
0x37a1   :  { %4431 = vrot.lane.b32.xlu0 %v4404_v12, %s5643_s5 }
0x37a2   :  { %v1759_v30 = vpop.permute.xlu0 %1758 }
0x37a3   :  { %1762 = vst.msk [vmem:[#allocation2] sm:$0x3] %vm1761_vm2, %v1759_v30 }
0x37a5   :  { %1732 = vperm.xlu0 %5407, %v7169_v22  }
0x37a6   :  { %v2205_v59 = vpop.permute.xlu0 %2204 }
0x37a7   :  { %2208 = vst.msk [vmem:[#allocation2] sm:$0xc] %vm2207_vm1, %v2205_v59 }
0x37aa   :  { %v2652_v38 = vpop.permute.xlu0 %2651 }
0x37ab   :  { %2655 = vst.msk [vmem:[#allocation2] sm:$0x30] %vm2654_vm5, %v2652_v38 }
0x37ae   :  { %v3547_v45 = vpop.permute.xlu0 %3546 }
0x37af   :  { %3549 = vst.msk [vmem:[#allocation2 + $0x8] sm:$0x3] %vm1761_vm2, %v3547_v45 }
0x37b2   :  { %v4435_v2 = vld [vmem:[#allocation2] sm:$0xff] }
0x37b3   :  { %5194 = vmatprep.mubr.msk.f32.mxu0 %vm970_vm3, %v4435_v2 }
0x3813   :  { %v4432_v26 = vpop.permute.xlu0 %4431 }
0x3814   :  { %4434 = vst.msk [vmem:[#allocation2 + $0x8] sm:$0x30] %vm2654_vm5, %v4432_v26 }
0x381b   :  { %v4436_v36 = vld [vmem:[#allocation2 + $0x8] sm:$0x3f] }
0x381c   :  { %5195 = vmatmul.mubr.msk.f32.vlgmr.msra.gmra.mrb[74].mxu0 %vm970_vm3, %v4436_v36  ;;  %vm4533_vm3 = vcmp.lt.s32.totalorder %v7328_v40, 24 }
0x3824   :  { %v1733_v33 = vpop.permute.xlu0 %1732 }
0x3825   :  { %v2198_v43 = vmul.f32 %v2196_v10, %v1733_v33  ;;  %v2645_v15 = vmul.f32 %v2643_v9, %v1733_v33  ;;  %v1755_v58 = vmul.f32 %v1753_v29, %v1733_v33  ;;  %v3092_v17 = vmul.f32 %v6785_v25, %v1733_v33  ;;  %v4765_v25 = vld [vmem:[%s7282_s18] ss:$0 sm:$0xff]  ;;  %s7329_s18 = sld [smem:[#allocation18_spill]] }
0x3827   :  { %v2200_v56 = vrot.slane %v2198_v43, 2  ;;  %v2647_v32 = vrot.slane %v2645_v15, 4  ;;  %v3094_v24 = vrot.slane %v3092_v17, 6 }
0x3829   :  { %v2202_v16 = vadd.f32 %v2200_v56, %v1755_v58 }
0x382b   :  { %v2649_v19 = vadd.f32 %v2647_v32, %v2202_v16  ;;  %v4559_v30 = vld [vmem:[%s7329_s18] sm:$0xff]  ;;  %v4560_v59 = vld [vmem:[%s7329_s18 + $0x8] sm:$0x3f] }
0x382d   :  { %v3096_v11 = vadd.f32 %v3094_v24, %v2649_v19 }
0x382f   :  { %v3544_v63 = vadd.f32 %v3543_v54, %v3096_v11 }
0x3831   :  { %v3988_v27 = vadd.f32 %v3986_v39, %v3544_v63 }
0x3833   :  { %v7212_v20 = vadd.f32 %v4427_v4, %v3988_v27 }
0x3835   :  { %v4611_v29 = vsub.f32 1.0, %v7212_v20 }
0x38ef   :  { %v5196_v8 = vpop.f32.mrb[74].mxu0 }
0x38f0   :  { %v4526_v21 = vadd.f32 %v5196_v8, %v4765_v25  ;;  %v4520_v13 = vpop.f32.mrb[75].mxu0 }
0x38f1   :  { %v4521_v41 = vadd.f32 %v4765_v25, %v4520_v13 }
0x38f2   :  { %v4530_v6 = vmul.f32 %v4526_v21, %v3521_v52  ;;  %v4612_v52 = vmul.f32 %v4611_v29, %v4611_v29 }
0x38f3   :  { %v4529_v48 = vmul.f32 %v4521_v41, %v1733_v33 }
0x38f4   :  { %4532 = vst [vmem:[#allocation3 + $0x8] sm:$0x3f] %v4530_v6  ;;  %v4535_v0 = vsel %vm4533_vm3, %v4530_v6, -1e+30  ;;  %v4613_v16 = vsel %vm1478_vm7, %v4612_v52, 0.0 }
0x38f5   :  { %4531 = vst [vmem:[#allocation3] sm:$0xff] %v4529_v48  ;;  %v4539_v51 = vsel %vm4538_vm4, %v4535_v0, -inf  ;;  %v4534_v12 = vsel %vm4533_vm3, %v4529_v48, -1e+30 }
0x38f6   :  { %4540 = vmax.xlane.f32.xlu1 %v4539_v51  ;;  %4536 = vmax.xlane.f32.xlu0 %v4534_v12 }
0x3907   :  { %4562 = vperm.xlu1 %5406, %v4559_v30  }
0x390c   :  { %4565 = vperm.xlu0 %5407, %v4560_v59  }
0x3983   :  { %v4541_v38 = vpop.xlane.xlu1 %4540  ;;  %v4537_v45 = vpop.xlane.xlu0 %4536 }
0x3984   :  { %v4543_v2 = vsub.f32 %v4535_v0, %v4541_v38  ;;  %v4542_v26 = vsub.f32 %v4534_v12, %v4537_v45 }
0x3986   :  { %v4546_v36 = vmul.f32 1.442695, %v4543_v2  ;;  %v4544_v35 = vmul.f32 1.442695, %v4542_v26 }
0x3987   :  { %v4563_v34 = vpop.permute.xlu1 %4562 }
0x3988   :  { %5576 = vpow2.f32 %v4546_v36  ;;  %vm4567_vm8 = vcmp.eq.s32.totalorder %v7328_v40, %v4563_v34 }
0x3989   :  { %5578 = vpow2.f32 %v4544_v35  ;;  %v4569_v1 = vsel %vm4567_vm8, %v4529_v48, 0.0 }
0x398b   :  { %v4566_v7 = vpop.permute.xlu0 %4565 }
0x398c   :  { %vm4568_vm6 = vcmp.eq.s32.totalorder %v7328_v40, %v4566_v7 }
0x398d   :  { %v4570_v31 = vsel %vm4568_vm6, %v4530_v6, 0.0 }
0x398e   :  { %v4573_v61 = vsel %vm4538_vm4, %v4570_v31, 0.0 }
0x3992   :  { %v5577_v3 = vpop.eup %5576 }
0x3993   :  { %v5579_v57 = vpop.eup %5578  ;;  %v4550_v44 = vsel %vm4538_vm4, %v5577_v3, 0.0 }
0x3994   :  { %4548 = vadd.xlane.f32.xlu1 %v5579_v57  ;;  %4551 = vadd.xlane.f32.xlu0 %v4550_v44 }
0x3998   :  { %4574 = vadd.xlane.f32.xlu1 %v4573_v61  ;;  %4571 = vadd.xlane.f32.xlu0 %v4569_v1 }
0x399c   :  { %4597 = vadd.xlane.f32.xlu1 %v4596_v53 }
0x3a21   :  { %v4549_v37 = vpop.xlane.xlu1 %4548  ;;  %v4552_v62 = vpop.xlane.xlu0 %4551 }
0x3a22   :  { %5580 = vlog2.f32 %v4549_v37 }
0x3a23   :  { %5582 = vlog2.f32 %v4552_v62 }
0x3a25   :  { %v4572_v10 = vpop.xlane.xlu0 %4571  ;;  %v4575_v9 = vpop.xlane.xlu1 %4574 }
0x3a29   :  { %v4598_v32 = vpop.xlane.xlu1 %4597 }
0x3a2a   :  { %v4599_v60 = vrot.slane %v4598_v32, 4 }
0x3a2c   :  { %v5581_v23 = vpop.eup %5580  ;;  %v4600_v19 = vadd.f32 %v4599_v60, %v4598_v32 }
0x3a2d   :  { %v5583_v42 = vpop.eup %5582  ;;  %v4554_v46 = vmul.f32 0.6931472, %v5581_v23 }
0x3a2e   :  { %v4556_v55 = vmul.f32 0.6931472, %v5583_v42  ;;  %v4601_v24 = vrot.slane %v4600_v19, 2 }
0x3a2f   :  { %v4557_v14 = vadd.f32 %v4554_v46, %v4537_v45 }
0x3a30   :  { %v4558_v50 = vadd.f32 %v4556_v55, %v4541_v38  ;;  %v4602_v11 = vadd.f32 %v4601_v24, %v4600_v19 }
0x3a31   :  { %v4576_v33 = vsub.f32 %v4557_v14, %v4572_v10 }
0x3a32   :  { %v4577_v49 = vsub.f32 %v4558_v50, %v4575_v9 }
0x3a33   :  { %v4578_v43 = vmul.f32 %v7169_v22, %v4576_v33 }
0x3a34   :  { %v4579_v15 = vmul.f32 %v5589_v47, %v4577_v49 }
0x3a35   :  { %v4581_v58 = vsel %vm4580_vm10, %v4578_v43, 0.0 }
0x3a36   :  { %v4583_v56 = vsel %vm4582_vm9, %v4579_v15, 0.0 }
0x3a37   :  { %v4584_v17 = vadd.f32 %v4583_v56, %v4581_v58 }
0x3a39   :  { %4585 = vadd.xlane.f32.xlu0 %v4584_v17 }
0x3a3d   :  { %4614 = vadd.xlane.f32.xlu0 %v4613_v16 }
0x3ac6   :  { %v4586_v54 = vpop.xlane.xlu0 %4585 }
0x3ac7   :  { %v4587_v5 = vrot.slane %v4586_v54, 4 }
0x3ac9   :  { %v4588_v22 = vadd.f32 %v4587_v5, %v4586_v54 }
0x3acb   :  { %v4589_v39 = vrot.slane %v4588_v22, 2 }
0x3acc   :  { %5601 = shalt.err (!%p5598_p4)
}
0x3acd   :  { %s5602_s6 = scalar_lea.hbm %s7283_s19, 256 }
0x3ace   :  { %p5603_p5 = scmp.ne.s32.totalorder %s7283_s19, %s5602_s6  ;;  %p5606_p6 = scmp.lt.u32.totalorder %s5602_s6, %s7283_s19 }
0x3ad0   :  { %p5608_p7 = pnand %p5606_p6, %p5603_p5 }
0x3ad2   :  { %5611 = shalt.err (!%p5608_p7)
}
0x3ad3   :  { %s5647_s13 = smov 128   ;;  %s5648_s8 = smov 8   ;;  %v4590_v63 = vadd.f32 %v4589_v39, %v4588_v22  ;;  %v4603_v4 = vrot.slane %v4602_v11, 1  ;;  %v4615_v8 = vpop.xlane.xlu0 %4614  ;;  %vm4628_vm7 = vcmask 0  }
0x3ad4   :  { %4641 = dma.vmem_to_hbm [thread:$0]  %s4636_s4, 256, %s7283_s19, [#allocation4], %s5647_s13, %s5647_s13, %s5648_s8   ;;  %v4616_v21 = vrot.slane %v4615_v8, 4 }
0x3ad5   :  { %v4591_v27 = vrot.slane %v4590_v63, 1  ;;  %v4604_v25 = vadd.f32 %v4603_v4, %v4602_v11  ;;  %s5649_s24 = smov 1.0   ;;  %s5650_s26 = smov [#allocation5]  }
0x3ad6   :  { %v4617_v13 = vadd.f32 %v4616_v21, %v4615_v8  ;;  %s4648_s7 = sshll.u32 %s5650_s26, 4  ;;  %s4649_s7 = int_to_ptr.vmem [resolvable:$true] %s4648_s7 }
0x3ad7   :  { %v4592_v20 = vadd.f32 %v4591_v27, %v4590_v63  ;;  %s5612_s18 = scalar_lea.vmem %s4649_s7, 16  ;;  %s5616_s9 = scalar_lea.vmem %s4649_s7, 32 }
0x3ad8   :  { %v4618_v41 = vrot.slane %v4617_v13, 2  ;;  %p5613_p8 = scmp.ne.s32.totalorder %s4649_s7, %s5612_s18  ;;  %p5617_p9 = scmp.lt.s32.totalorder %s4649_s7, %s4649_s7 }
0x3ad9   :  { %5385 = vpush %v4592_v20  ;;  %p5618_p10 = scmp.lt.s32.totalorder %s5616_s9, %s5612_s18 }
0x3ada   :  { %5387 = vpush %v4604_v25  ;;  %v4619_v6 = vadd.f32 %v4618_v41, %v4617_v13 }
0x3adb   :  { %p5619_p11 = por %p5618_p10, %p5617_p9 }
0x3adc   :  { %v4620_v48 = vrot.slane %v4619_v6, 1 }
0x3add   :  { %p5620_p12 = pnand %p5619_p11, %p5613_p8 }
0x3ade   :  { %v4621_v51 = vadd.f32 %v4620_v48, %v4619_v6 }
0x3b0a   :  { %s5386_s12 = spop %5385 }
0x3b0b   :  { %s5388_s10 = spop %5387 }
0x3b0c   :  { %s4606_s30 = smax.f32 %s5649_s24, %s5388_s10 }
0x3b0d   :  { %v4607_v40 = vstv %s4606_s30 }
0x3b0e   :  { %5584 = vrcp.f32 %v4607_v40 }
0x3b18   :  { %v5585_v0 = vpop.eup %5584 }
0x3b19   :  { %5389 = vpush %v5585_v0 }
0x3b1a   :  { %5391 = vpush %v4621_v51 }
0x3b4a   :  { %s5390_s19 = spop %5389 }
0x3b4b   :  { %s4610_s25 = smul.f32 %s5390_s19, %s5386_s12  ;;  %s5392_s3 = spop %5391 }
0x3b4c   :  { %s4625_s17 = smul.f32 0.03125, %s5392_s3 }
0x3b4e   :  { %s4626_s27 = sadd.f32 %s4625_s17, %s4610_s25 }
0x3b50   :  { %v4627_v12 = vstv %s4626_s27 }
0x3b51   :  { %4629 = vst.msk [vmem:[#allocation5] sm:$0x1] %vm4628_vm7, %v4627_v12 }
0x3b52   :  { %5623 = shalt.err (!%p5620_p12)
}
0x3b53   :  { %s5624_s14 = scalar_lea.hbm %s7284_s20, 16 }
0x3b54   :  { %p5625_p13 = scmp.ne.s32.totalorder %s7284_s20, %s5624_s14  ;;  %p5628_p0 = scmp.lt.u32.totalorder %s5624_s14, %s7284_s20 }
0x3b56   :  { %p5630_p1 = pnand %p5628_p0, %p5625_p13 }
0x3b58   :  { %5633 = shalt.err (!%p5630_p1)
}
0x3b59   :  { %4651 = dma.vmem_to_hbm [thread:$0]  %s4649_s7, 16, %s7284_s20, [#allocation6]  }
0x3b5a   :  { %5634 = dma.done.wait [#allocation4], 256  }
0x3b5b   :  { %5635 = vsyncadd [#allocation4], 4294967040 }
0x3b5c   :  { %5636 = dma.done.wait [#allocation6], 16  }
0x3b5d   :  { %5637 = vsyncadd [#allocation6], 4294967280 }
0x3b5e   :  { %4658 = vsyncpa [#allocation4], 1 }
0x3b5f   :  { %4659 = vsyncpa [#allocation6], 1 }

</bundles_post_ra>
